<compile_context>
chip_gen: v7x
topology: tpu7x:2x2x1
jax: 0.10.0
libtpu: 0.0.40
codegen_flags: <defaults>
</compile_context>

<pallas_src>
import math
from functools import partial

import jax
import jax.numpy as jnp
from jax.experimental import pallas as pl
from jax.experimental.pallas import tpu as pltpu


# ----------------------------------------------------------------------------
# In-kernel helpers (operate on loaded f32 values / VMEM refs)
# ----------------------------------------------------------------------------
def _layer_norm(x, g, b, eps):
    mean = jnp.mean(x, axis=-1, keepdims=True)
    var = jnp.mean(jnp.square(x - mean), axis=-1, keepdims=True)
    return (x - mean) * jax.lax.rsqrt(var + eps) * g + b


def _mha(xq, xkv, wq_ref, bq_ref, wk_ref, bk_ref, wv_ref, bv_ref,
         wo_ref, bo_ref, nhead):
    """Multi-head attention for one batch element, fully in-kernel.

    xq: (Lq, E), xkv: (Lk, E).  Per-head weights: wq/wk/wv (H, E, Dh),
    bq/bk/bv (H, 1, Dh), wo (H, Dh, E), bo (1, E).  Returns (Lq, E).
    The head loop is a static Python unroll; the out-projection is folded
    per head (sum_h head_h @ Wo_h) so no lane-dim concatenation is needed.
    """
    Dh = wq_ref.shape[-1]
    scale = 1.0 / math.sqrt(Dh)
    out = None
    for h in range(nhead):
        qh = jnp.dot(xq, wq_ref[h], preferred_element_type=jnp.float32) + bq_ref[h]
        kh = jnp.dot(xkv, wk_ref[h], preferred_element_type=jnp.float32) + bk_ref[h]
        vh = jnp.dot(xkv, wv_ref[h], preferred_element_type=jnp.float32) + bv_ref[h]
        # scores = qh @ kh^T  (contract Dh on both sides, no explicit transpose)
        s = jax.lax.dot_general(qh, kh, (((1,), (1,)), ((), ())),
                                preferred_element_type=jnp.float32) * scale
        m = jnp.max(s, axis=-1, keepdims=True)
        p = jnp.exp(s - m)
        p = p * pl.reciprocal(jnp.sum(p, axis=-1, keepdims=True), approx=True)
        oh = jnp.dot(p, vh, preferred_element_type=jnp.float32)          # (Lq, Dh)
        c = jnp.dot(oh, wo_ref[h], preferred_element_type=jnp.float32)   # (Lq, E)
        out = c if out is None else out + c
    return out + bo_ref[...]


def _ffn(x, w1_ref, b1_ref, w2_ref, b2_ref):
    h = jnp.maximum(
        jnp.dot(x, w1_ref[...], preferred_element_type=jnp.float32) + b1_ref[...],
        0.0)
    return jnp.dot(h, w2_ref[...], preferred_element_type=jnp.float32) + b2_ref[...]


# ----------------------------------------------------------------------------
# Pallas kernels
# ----------------------------------------------------------------------------
def _encoder_layer_kernel(x_ref,
                          wq, bq, wk, bk, wv, bv, wo, bo,
                          g1, be1,
                          w1, b1, w2, b2,
                          g2, be2,
                          o_ref, *, nhead, eps):
    x = x_ref[0].astype(jnp.float32)                                    # (S, E)
    attn = _mha(x, x, wq, bq, wk, bk, wv, bv, wo, bo, nhead)
    x = _layer_norm(x + attn, g1[...], be1[...], eps)                   # post-norm
    x = _layer_norm(x + _ffn(x, w1, b1, w2, b2), g2[...], be2[...], eps)
    o_ref[0] = x.astype(o_ref.dtype)


def _decoder_layer_kernel(x_ref, mem_ref,
                          s_wq, s_bq, s_wk, s_bk, s_wv, s_bv, s_wo, s_bo,
                          g1, be1,
                          c_wq, c_bq, c_wk, c_bk, c_wv, c_bv, c_wo, c_bo,
                          g2, be2,
                          w1, b1, w2, b2,
                          g3, be3,
                          o_ref, *, nhead, eps):
    x = x_ref[0].astype(jnp.float32)                                    # (T, E)
    mem = mem_ref[0].astype(jnp.float32)                                # (S, E)
    sa = _mha(x, x, s_wq, s_bq, s_wk, s_bk, s_wv, s_bv, s_wo, s_bo, nhead)
    x = _layer_norm(x + sa, g1[...], be1[...], eps)
    ca = _mha(x, mem, c_wq, c_bq, c_wk, c_bk, c_wv, c_bv, c_wo, c_bo, nhead)
    x = _layer_norm(x + ca, g2[...], be2[...], eps)
    x = _layer_norm(x + _ffn(x, w1, b1, w2, b2), g3[...], be3[...], eps)
    o_ref[0] = x.astype(o_ref.dtype)


def _layernorm_kernel(x_ref, g_ref, b_ref, o_ref, *, eps):
    y = _layer_norm(x_ref[...].astype(jnp.float32), g_ref[...], b_ref[...], eps)
    o_ref[...] = y.astype(o_ref.dtype)


def _final_norm_project_kernel(x_ref, g_ref, b_ref, w_ref, bo_ref, o_ref, *, eps):
    x = _layer_norm(x_ref[...].astype(jnp.float32), g_ref[...], b_ref[...], eps)
    y = jnp.dot(x, w_ref[...], preferred_element_type=jnp.float32) + bo_ref[...]
    o_ref[...] = y.astype(o_ref.dtype)


# ----------------------------------------------------------------------------
# pallas_call wrappers
# ----------------------------------------------------------------------------
def _rep_spec(arr):
    """Full-array block, same block for every grid step (weights)."""
    zeros = (0,) * arr.ndim
    return pl.BlockSpec(arr.shape, lambda n, _z=zeros: _z)


def encoder_layer(x, p, nhead):
    N, S, E = x.shape
    sa = p["self_attn"]
    weights = [sa["wq"], sa["bq"], sa["wk"], sa["bk"], sa["wv"], sa["bv"],
               sa["wo"], sa["bo"],
               p["norm1_g"], p["norm1_b"],
               p["w1"], p["b1"], p["w2"], p["b2"],
               p["norm2_g"], p["norm2_b"]]
    in_specs = [pl.BlockSpec((1, S, E), lambda n: (n, 0, 0))] + \
               [_rep_spec(a) for a in weights]
    return pl.pallas_call(
        partial(_encoder_layer_kernel, nhead=nhead, eps=1e-5),
        out_shape=jax.ShapeDtypeStruct((N, S, E), x.dtype),
        grid=(N,),
        in_specs=in_specs,
        out_specs=pl.BlockSpec((1, S, E), lambda n: (n, 0, 0)),
        compiler_params=pltpu.CompilerParams(dimension_semantics=("parallel",)),
    )(x, *weights)


def decoder_layer(x, memory, p, nhead):
    N, T, E = x.shape
    S = memory.shape[1]
    sa, ca = p["self_attn"], p["cross_attn"]
    weights = [sa["wq"], sa["bq"], sa["wk"], sa["bk"], sa["wv"], sa["bv"],
               sa["wo"], sa["bo"],
               p["norm1_g"], p["norm1_b"],
               ca["wq"], ca["bq"], ca["wk"], ca["bk"], ca["wv"], ca["bv"],
               ca["wo"], ca["bo"],
               p["norm2_g"], p["norm2_b"],
               p["w1"], p["b1"], p["w2"], p["b2"],
               p["norm3_g"], p["norm3_b"]]
    in_specs = [pl.BlockSpec((1, T, E), lambda n: (n, 0, 0)),
                pl.BlockSpec((1, S, E), lambda n: (n, 0, 0))] + \
               [_rep_spec(a) for a in weights]
    return pl.pallas_call(
        partial(_decoder_layer_kernel, nhead=nhead, eps=1e-5),
        out_shape=jax.ShapeDtypeStruct((N, T, E), x.dtype),
        grid=(N,),
        in_specs=in_specs,
        out_specs=pl.BlockSpec((1, T, E), lambda n: (n, 0, 0)),
        compiler_params=pltpu.CompilerParams(dimension_semantics=("parallel",)),
    )(x, memory, *weights)


def layer_norm_2d(x2d, g, b, eps=1e-5):
    R, E = x2d.shape
    return pl.pallas_call(
        partial(_layernorm_kernel, eps=eps),
        out_shape=jax.ShapeDtypeStruct((R, E), x2d.dtype),
        in_specs=[pl.BlockSpec((R, E), lambda: (0, 0)),
                  pl.BlockSpec((1, E), lambda: (0, 0)),
                  pl.BlockSpec((1, E), lambda: (0, 0))],
        out_specs=pl.BlockSpec((R, E), lambda: (0, 0)),
    )(x2d, g, b)


def final_norm_project(x2d, g, b, w, bo, eps=1e-5):
    R, E = x2d.shape
    V = w.shape[1]
    return pl.pallas_call(
        partial(_final_norm_project_kernel, eps=eps),
        out_shape=jax.ShapeDtypeStruct((R, V), x2d.dtype),
        in_specs=[pl.BlockSpec((R, E), lambda: (0, 0)),
                  pl.BlockSpec((1, E), lambda: (0, 0)),
                  pl.BlockSpec((1, E), lambda: (0, 0)),
                  pl.BlockSpec((E, V), lambda: (0, 0)),
                  pl.BlockSpec((1, V), lambda: (0, 0))],
        out_specs=pl.BlockSpec((R, V), lambda: (0, 0)),
    )(x2d, g, b, w, bo)


# ----------------------------------------------------------------------------
# Forward pass (batch-first internally; output layout matches PyTorch)
# ----------------------------------------------------------------------------
def positional_encoding_table(max_len, d_model):
    position = jnp.arange(max_len, dtype=jnp.float32)[:, None]
    div_term = jnp.exp(jnp.arange(0, d_model, 2, dtype=jnp.float32)
                       * (-math.log(10000.0) / d_model))
    pe = jnp.zeros((max_len, d_model), jnp.float32)
    pe = pe.at[:, 0::2].set(jnp.sin(position * div_term))
    pe = pe.at[:, 1::2].set(jnp.cos(position * div_term))
    return pe  # (max_len, d_model)


def my_transformer_forward(params, src_tokens, tgt_tokens, *, nhead):
    """src_tokens: (N, S) int32, tgt_tokens: (N, T) int32 -> (T, N, vocab)."""
    emb = params["embedding"]                                  # (vocab, E)
    pe = params["pe"]
    # Embedding gather + positional encoding (tiny XLA ops; dropout == identity).
    src_e = jnp.take(emb, src_tokens, axis=0) + pe[None, :src_tokens.shape[1], :]
    tgt_e = jnp.take(emb, tgt_tokens, axis=0) + pe[None, :tgt_tokens.shape[1], :]
    # TODO(synk): dropout omitted (eval-mode identity); no causal/padding masks
    # (matches nn.Transformer called with all mask arguments left at None).

    N, S, E = src_e.shape
    T = tgt_e.shape[1]

    memory = src_e
    for lp in params["encoder_layers"]:
        memory = encoder_layer(memory, lp, nhead)
    memory = layer_norm_2d(memory.reshape(N * S, E),
                           params["enc_norm_g"], params["enc_norm_b"])
    memory = memory.reshape(N, S, E)

    out = tgt_e
    for lp in params["decoder_layers"]:
        out = decoder_layer(out, memory, lp, nhead)

    # Decoder final LayerNorm fused with the vocab projection (lane-dense out).
    logits2d = final_norm_project(out.reshape(N * T, E),
                                  params["dec_norm_g"], params["dec_norm_b"],
                                  params["out_w"], params["out_b"])
    V = logits2d.shape[-1]
    return logits2d.reshape(N, T, V).transpose(1, 0, 2)        # (T, N, vocab)


# ----------------------------------------------------------------------------
# Deterministic parameter initialization (kernel-friendly layouts)
# ----------------------------------------------------------------------------
def init_params(seed, d_model, nhead, num_enc, num_dec, dff, vocab, max_len=64):
    key = jax.random.PRNGKey(seed)
    counter = [0]

    def nxt():
        counter[0] += 1
        return jax.random.fold_in(key, counter[0])

    def w(shape, scale=0.02):
        return scale * jax.random.normal(nxt(), shape, jnp.float32)

    Dh = d_model // nhead

    def attn_params():
        def qkv_proj():
            W = w((d_model, d_model))            # PyTorch (out, in)
            b = w((d_model,))
            Wh = jnp.transpose(W).reshape(d_model, nhead, Dh).transpose(1, 0, 2)
            return Wh, b.reshape(nhead, 1, Dh)   # (H, E, Dh), (H, 1, Dh)
        wq, bq = qkv_proj()
        wk, bk = qkv_proj()
        wv, bv = qkv_proj()
        Wo = w((d_model, d_model))
        bo = w((d_model,))
        return {"wq": wq, "bq": bq, "wk": wk, "bk": bk, "wv": wv, "bv": bv,
                "wo": jnp.transpose(Wo).reshape(nhead, Dh, d_model),  # (H, Dh, E)
                "bo": bo.reshape(1, d_model)}

    def enc_layer():
        return {"self_attn": attn_params(),
                "w1": jnp.transpose(w((dff, d_model))),          # (E, DFF)
                "b1": w((dff,)).reshape(1, dff),
                "w2": jnp.transpose(w((d_model, dff))),          # (DFF, E)
                "b2": w((d_model,)).reshape(1, d_model),
                "norm1_g": jnp.ones((1, d_model)), "norm1_b": jnp.zeros((1, d_model)),
                "norm2_g": jnp.ones((1, d_model)), "norm2_b": jnp.zeros((1, d_model))}

    def dec_layer():
        p = enc_layer()
        p["cross_attn"] = attn_params()
        p["norm3_g"] = jnp.ones((1, d_model))
        p["norm3_b"] = jnp.zeros((1, d_model))
        return p

    return {
        "embedding": w((vocab, d_model), scale=1.0),
        "pe": positional_encoding_table(max_len, d_model),
        "encoder_layers": [enc_layer() for _ in range(num_enc)],
        "decoder_layers": [dec_layer() for _ in range(num_dec)],
        "enc_norm_g": jnp.ones((1, d_model)), "enc_norm_b": jnp.zeros((1, d_model)),
        "dec_norm_g": jnp.ones((1, d_model)), "dec_norm_b": jnp.zeros((1, d_model)),
        "out_w": jnp.transpose(w((vocab, d_model))),             # (E, vocab)
        "out_b": w((vocab,)).reshape(1, vocab),
    }


# ----------------------------------------------------------------------------
# Main
# ----------------------------------------------------------------------------
if __name__ == "__main__":
    # Small config consistent with the module's forward.
    D_MODEL, NHEAD, N_ENC, N_DEC, DFF, VOCAB = 32, 4, 2, 2, 64, 128
    BATCH, SRC_LEN, TGT_LEN = 2, 8, 10

    params = init_params(0, D_MODEL, NHEAD, N_ENC, N_DEC, DFF, VOCAB)

    key = jax.random.PRNGKey(0)
    k_src, k_tgt = jax.random.split(key)
    src = jax.random.randint(k_src, (BATCH, SRC_LEN), 0, VOCAB, jnp.int32)
    tgt = jax.random.randint(k_tgt, (BATCH, TGT_LEN), 0, VOCAB, jnp.int32)

    # nhead is static (closed over), NOT a traced pytree leaf -> fixes jit error.
    fwd = jax.jit(partial(my_transformer_forward, nhead=NHEAD))
    out = fwd(params, src, tgt)
    jax.block_until_ready(out)
    assert out.shape == (TGT_LEN, BATCH, VOCAB), out.shape
    assert bool(jnp.all(jnp.isfinite(out)))
    print("KERNEL_OK")
</pallas_src>

<mosaic_0001>
module attributes {stable_mosaic.version = 11 : i64} {
  func.func @_layernorm_kernel(%arg0: memref<16x32xf32, #tpu.memory_space<vmem>>, %arg1: memref<1x32xf32, #tpu.memory_space<vmem>>, %arg2: memref<1x32xf32, #tpu.memory_space<vmem>>, %arg3: memref<16x32xf32, #tpu.memory_space<vmem>>) attributes {dimension_semantics = [], scalar_prefetch = 0 : i64, scratch_operands = 0 : i64, tpu.core_type = #tpu.core_type<tc>} {
    %c0 = arith.constant 0 : index
    %c0_0 = arith.constant 0 : index
    %0 = vector.load %arg0[%c0, %c0_0] : memref<16x32xf32, #tpu.memory_space<vmem>>, vector<16x32xf32>
    %c0_1 = arith.constant 0 : index
    %c0_2 = arith.constant 0 : index
    %1 = vector.load %arg1[%c0_1, %c0_2] : memref<1x32xf32, #tpu.memory_space<vmem>>, vector<1x32xf32>
    %c0_3 = arith.constant 0 : index
    %c0_4 = arith.constant 0 : index
    %2 = vector.load %arg2[%c0_3, %c0_4] : memref<1x32xf32, #tpu.memory_space<vmem>>, vector<1x32xf32>
    %cst = arith.constant dense<0.000000e+00> : vector<16xf32>
    %3 = vector.multi_reduction <add>, %0, %cst [1] : vector<16x32xf32> to vector<16xf32>
    %4 = vector.shape_cast %3 : vector<16xf32> to vector<16x1xf32>
    %cst_5 = arith.constant 3.200000e+01 : f32
    %5 = vector.broadcast %cst_5 : f32 to vector<16x1xf32>
    %6 = arith.divf %4, %5 : vector<16x1xf32>
    %7 = vector.broadcast %6 : vector<16x1xf32> to vector<16x32xf32>
    %8 = arith.subf %0, %7 : vector<16x32xf32>
    %9 = arith.mulf %8, %8 : vector<16x32xf32>
    %cst_6 = arith.constant dense<0.000000e+00> : vector<16xf32>
    %10 = vector.multi_reduction <add>, %9, %cst_6 [1] : vector<16x32xf32> to vector<16xf32>
    %11 = vector.shape_cast %10 : vector<16xf32> to vector<16x1xf32>
    %cst_7 = arith.constant 3.200000e+01 : f32
    %12 = vector.broadcast %cst_7 : f32 to vector<16x1xf32>
    %13 = arith.divf %11, %12 : vector<16x1xf32>
    %14 = vector.broadcast %6 : vector<16x1xf32> to vector<16x32xf32>
    %15 = arith.subf %0, %14 : vector<16x32xf32>
    %cst_8 = arith.constant 9.99999974E-6 : f32
    %16 = vector.broadcast %cst_8 : f32 to vector<16x1xf32>
    %17 = arith.addf %13, %16 : vector<16x1xf32>
    %18 = math.rsqrt %17 : vector<16x1xf32>
    %19 = vector.broadcast %18 : vector<16x1xf32> to vector<16x32xf32>
    %20 = arith.mulf %15, %19 : vector<16x32xf32>
    %21 = vector.broadcast %1 : vector<1x32xf32> to vector<16x32xf32>
    %22 = arith.mulf %20, %21 : vector<16x32xf32>
    %23 = vector.broadcast %2 : vector<1x32xf32> to vector<16x32xf32>
    %24 = arith.addf %22, %23 : vector<16x32xf32>
    %c0_9 = arith.constant 0 : index
    %c0_10 = arith.constant 0 : index
    %25 = vector.load %arg3[%c0_9, %c0_10] : memref<16x32xf32, #tpu.memory_space<vmem>>, vector<16x32xf32>
    tpu.vector_store %arg3[%c0_9, %c0_10], %24 {strides = array<i32>} : memref<16x32xf32, #tpu.memory_space<vmem>>, vector<16x32xf32>,
    return
  }
}

module attributes {stable_mosaic.version = 11 : i64} {
  func.func @_encoder_layer_kernel(%arg0: i32, %arg1: memref<1x8x32xf32, #tpu.memory_space<vmem>>, %arg2: memref<4x32x8xf32, #tpu.memory_space<vmem>>, %arg3: memref<4x1x8xf32, #tpu.memory_space<vmem>>, %arg4: memref<4x32x8xf32, #tpu.memory_space<vmem>>, %arg5: memref<4x1x8xf32, #tpu.memory_space<vmem>>, %arg6: memref<4x32x8xf32, #tpu.memory_space<vmem>>, %arg7: memref<4x1x8xf32, #tpu.memory_space<vmem>>, %arg8: memref<4x8x32xf32, #tpu.memory_space<vmem>>, %arg9: memref<1x32xf32, #tpu.memory_space<vmem>>, %arg10: memref<1x32xf32, #tpu.memory_space<vmem>>, %arg11: memref<1x32xf32, #tpu.memory_space<vmem>>, %arg12: memref<32x64xf32, #tpu.memory_space<vmem>>, %arg13: memref<1x64xf32, #tpu.memory_space<vmem>>, %arg14: memref<64x32xf32, #tpu.memory_space<vmem>>, %arg15: memref<1x32xf32, #tpu.memory_space<vmem>>, %arg16: memref<1x32xf32, #tpu.memory_space<vmem>>, %arg17: memref<1x32xf32, #tpu.memory_space<vmem>>, %arg18: memref<1x8x32xf32, #tpu.memory_space<vmem>>) attributes {dimension_semantics = [#tpu.dimension_semantics<parallel>], iteration_bounds = array<i64: 2>, scalar_prefetch = 0 : i64, scratch_operands = 0 : i64, tpu.core_type = #tpu.core_type<tc>, window_params = [{transform_indices = @transform_0, window_bounds = array<i64: 1, 8, 32>}, {pipeline_mode = #tpu.pipeline_mode<synchronous>, transform_indices = @transform_1, window_bounds = array<i64: 4, 32, 8>}, {pipeline_mode = #tpu.pipeline_mode<synchronous>, transform_indices = @transform_2, window_bounds = array<i64: 4, 1, 8>}, {pipeline_mode = #tpu.pipeline_mode<synchronous>, transform_indices = @transform_3, window_bounds = array<i64: 4, 32, 8>}, {pipeline_mode = #tpu.pipeline_mode<synchronous>, transform_indices = @transform_4, window_bounds = array<i64: 4, 1, 8>}, {pipeline_mode = #tpu.pipeline_mode<synchronous>, transform_indices = @transform_5, window_bounds = array<i64: 4, 32, 8>}, {pipeline_mode = #tpu.pipeline_mode<synchronous>, transform_indices = @transform_6, window_bounds = array<i64: 4, 1, 8>}, {pipeline_mode = #tpu.pipeline_mode<synchronous>, transform_indices = @transform_7, window_bounds = array<i64: 4, 8, 32>}, {pipeline_mode = #tpu.pipeline_mode<synchronous>, transform_indices = @transform_8, window_bounds = array<i64: 1, 32>}, {pipeline_mode = #tpu.pipeline_mode<synchronous>, transform_indices = @transform_9, window_bounds = array<i64: 1, 32>}, {pipeline_mode = #tpu.pipeline_mode<synchronous>, transform_indices = @transform_10, window_bounds = array<i64: 1, 32>}, {pipeline_mode = #tpu.pipeline_mode<synchronous>, transform_indices = @transform_11, window_bounds = array<i64: 32, 64>}, {pipeline_mode = #tpu.pipeline_mode<synchronous>, transform_indices = @transform_12, window_bounds = array<i64: 1, 64>}, {pipeline_mode = #tpu.pipeline_mode<synchronous>, transform_indices = @transform_13, window_bounds = array<i64: 64, 32>}, {pipeline_mode = #tpu.pipeline_mode<synchronous>, transform_indices = @transform_14, window_bounds = array<i64: 1, 32>}, {pipeline_mode = #tpu.pipeline_mode<synchronous>, transform_indices = @transform_15, window_bounds = array<i64: 1, 32>}, {pipeline_mode = #tpu.pipeline_mode<synchronous>, transform_indices = @transform_16, window_bounds = array<i64: 1, 32>}, {transform_indices = @transform_17, window_bounds = array<i64: 1, 8, 32>}]} {
    %c0 = arith.constant 0 : index
    %c0_0 = arith.constant 0 : index
    %c0_1 = arith.constant 0 : index
    %0 = vector.load %arg1[%c0, %c0_0, %c0_1] : memref<1x8x32xf32, #tpu.memory_space<vmem>>, vector<1x8x32xf32>
    %1 = vector.shape_cast %0 : vector<1x8x32xf32> to vector<8x32xf32>
    %c0_2 = arith.constant 0 : index
    %c0_3 = arith.constant 0 : index
    %c0_4 = arith.constant 0 : index
    %2 = vector.load %arg2[%c0_2, %c0_3, %c0_4] : memref<4x32x8xf32, #tpu.memory_space<vmem>>, vector<1x32x8xf32>
    %3 = vector.shape_cast %2 : vector<1x32x8xf32> to vector<32x8xf32>
    %cst = arith.constant dense<0.000000e+00> : vector<8x8xf32>
    %4 = tpu.matmul %1, %3, %cst {dimension_numbers = #tpu.dot_dimension_numbers<[1], [0], [0], [1], [0, 0, 1, 1], [], []>} : vector<8x32xf32>, vector<32x8xf32>, vector<8x8xf32> -> vector<8x8xf32>
    %c0_5 = arith.constant 0 : index
    %c0_6 = arith.constant 0 : index
    %c0_7 = arith.constant 0 : index
    %5 = vector.load %arg3[%c0_5, %c0_6, %c0_7] : memref<4x1x8xf32, #tpu.memory_space<vmem>>, vector<1x1x8xf32>
    %6 = vector.shape_cast %5 : vector<1x1x8xf32> to vector<1x8xf32>
    %7 = vector.broadcast %6 : vector<1x8xf32> to vector<8x8xf32>
    %8 = arith.addf %4, %7 : vector<8x8xf32>
    %c0_8 = arith.constant 0 : index
    %c0_9 = arith.constant 0 : index
    %c0_10 = arith.constant 0 : index
    %9 = vector.load %arg4[%c0_8, %c0_9, %c0_10] : memref<4x32x8xf32, #tpu.memory_space<vmem>>, vector<1x32x8xf32>
    %10 = vector.shape_cast %9 : vector<1x32x8xf32> to vector<32x8xf32>
    %cst_11 = arith.constant dense<0.000000e+00> : vector<8x8xf32>
    %11 = tpu.matmul %1, %10, %cst_11 {dimension_numbers = #tpu.dot_dimension_numbers<[1], [0], [0], [1], [0, 0, 1, 1], [], []>} : vector<8x32xf32>, vector<32x8xf32>, vector<8x8xf32> -> vector<8x8xf32>
    %c0_12 = arith.constant 0 : index
    %c0_13 = arith.constant 0 : index
    %c0_14 = arith.constant 0 : index
    %12 = vector.load %arg5[%c0_12, %c0_13, %c0_14] : memref<4x1x8xf32, #tpu.memory_space<vmem>>, vector<1x1x8xf32>
    %13 = vector.shape_cast %12 : vector<1x1x8xf32> to vector<1x8xf32>
    %14 = vector.broadcast %13 : vector<1x8xf32> to vector<8x8xf32>
    %15 = arith.addf %11, %14 : vector<8x8xf32>
    %c0_15 = arith.constant 0 : index
    %c0_16 = arith.constant 0 : index
    %c0_17 = arith.constant 0 : index
    %16 = vector.load %arg6[%c0_15, %c0_16, %c0_17] : memref<4x32x8xf32, #tpu.memory_space<vmem>>, vector<1x32x8xf32>
    %17 = vector.shape_cast %16 : vector<1x32x8xf32> to vector<32x8xf32>
    %cst_18 = arith.constant dense<0.000000e+00> : vector<8x8xf32>
    %18 = tpu.matmul %1, %17, %cst_18 {dimension_numbers = #tpu.dot_dimension_numbers<[1], [0], [0], [1], [0, 0, 1, 1], [], []>} : vector<8x32xf32>, vector<32x8xf32>, vector<8x8xf32> -> vector<8x8xf32>
    %c0_19 = arith.constant 0 : index
    %c0_20 = arith.constant 0 : index
    %c0_21 = arith.constant 0 : index
    %19 = vector.load %arg7[%c0_19, %c0_20, %c0_21] : memref<4x1x8xf32, #tpu.memory_space<vmem>>, vector<1x1x8xf32>
    %20 = vector.shape_cast %19 : vector<1x1x8xf32> to vector<1x8xf32>
    %21 = vector.broadcast %20 : vector<1x8xf32> to vector<8x8xf32>
    %22 = arith.addf %18, %21 : vector<8x8xf32>
    %cst_22 = arith.constant dense<0.000000e+00> : vector<8x8xf32>
    %23 = tpu.matmul %8, %15, %cst_22 {dimension_numbers = #tpu.dot_dimension_numbers<[1], [1], [0], [0], [0, 0, 1, 0], [], []>} : vector<8x8xf32>, vector<8x8xf32>, vector<8x8xf32> -> vector<8x8xf32>
    %cst_23 = arith.constant 0.353553385 : f32
    %24 = vector.broadcast %cst_23 : f32 to vector<8x8xf32>
    %25 = arith.mulf %23, %24 : vector<8x8xf32>
    %cst_24 = arith.constant dense<0xFF800000> : vector<8xf32>
    %26 = vector.multi_reduction <maximumf>, %25, %cst_24 [1] : vector<8x8xf32> to vector<8xf32>
    %27 = vector.shape_cast %26 : vector<8xf32> to vector<8x1xf32>
    %28 = vector.broadcast %27 : vector<8x1xf32> to vector<8x8xf32>
    %29 = arith.subf %25, %28 : vector<8x8xf32>
    %30 = math.exp %29 : vector<8x8xf32>
    %cst_25 = arith.constant dense<0.000000e+00> : vector<8xf32>
    %31 = vector.multi_reduction <add>, %30, %cst_25 [1] : vector<8x8xf32> to vector<8xf32>
    %32 = vector.shape_cast %31 : vector<8xf32> to vector<8x1xf32>
    %33 = tpu.reciprocal %32 {approx = true} : vector<8x1xf32> -> vector<8x1xf32>
    %34 = vector.broadcast %33 : vector<8x1xf32> to vector<8x8xf32>
    %35 = arith.mulf %30, %34 : vector<8x8xf32>
    %cst_26 = arith.constant dense<0.000000e+00> : vector<8x8xf32>
    %36 = tpu.matmul %35, %22, %cst_26 {dimension_numbers = #tpu.dot_dimension_numbers<[1], [0], [0], [1], [0, 0, 1, 1], [], []>} : vector<8x8xf32>, vector<8x8xf32>, vector<8x8xf32> -> vector<8x8xf32>
    %c0_27 = arith.constant 0 : index
    %c0_28 = arith.constant 0 : index
    %c0_29 = arith.constant 0 : index
    %37 = vector.load %arg8[%c0_27, %c0_28, %c0_29] : memref<4x8x32xf32, #tpu.memory_space<vmem>>, vector<1x8x32xf32>
    %38 = vector.shape_cast %37 : vector<1x8x32xf32> to vector<8x32xf32>
    %cst_30 = arith.constant dense<0.000000e+00> : vector<8x32xf32>
    %39 = tpu.matmul %36, %38, %cst_30 {dimension_numbers = #tpu.dot_dimension_numbers<[1], [0], [0], [1], [0, 0, 1, 1], [], []>} : vector<8x8xf32>, vector<8x32xf32>, vector<8x32xf32> -> vector<8x32xf32>
    %c1 = arith.constant 1 : index
    %c0_31 = arith.constant 0 : index
    %c0_32 = arith.constant 0 : index
    %40 = vector.load %arg2[%c1, %c0_31, %c0_32] : memref<4x32x8xf32, #tpu.memory_space<vmem>>, vector<1x32x8xf32>
    %41 = vector.shape_cast %40 : vector<1x32x8xf32> to vector<32x8xf32>
    %cst_33 = arith.constant dense<0.000000e+00> : vector<8x8xf32>
    %42 = tpu.matmul %1, %41, %cst_33 {dimension_numbers = #tpu.dot_dimension_numbers<[1], [0], [0], [1], [0, 0, 1, 1], [], []>} : vector<8x32xf32>, vector<32x8xf32>, vector<8x8xf32> -> vector<8x8xf32>
    %c1_34 = arith.constant 1 : index
    %c0_35 = arith.constant 0 : index
    %c0_36 = arith.constant 0 : index
    %43 = vector.load %arg3[%c1_34, %c0_35, %c0_36] : memref<4x1x8xf32, #tpu.memory_space<vmem>>, vector<1x1x8xf32>
    %44 = vector.shape_cast %43 : vector<1x1x8xf32> to vector<1x8xf32>
    %45 = vector.broadcast %44 : vector<1x8xf32> to vector<8x8xf32>
    %46 = arith.addf %42, %45 : vector<8x8xf32>
    %c1_37 = arith.constant 1 : index
    %c0_38 = arith.constant 0 : index
    %c0_39 = arith.constant 0 : index
    %47 = vector.load %arg4[%c1_37, %c0_38, %c0_39] : memref<4x32x8xf32, #tpu.memory_space<vmem>>, vector<1x32x8xf32>
    %48 = vector.shape_cast %47 : vector<1x32x8xf32> to vector<32x8xf32>
    %cst_40 = arith.constant dense<0.000000e+00> : vector<8x8xf32>
    %49 = tpu.matmul %1, %48, %cst_40 {dimension_numbers = #tpu.dot_dimension_numbers<[1], [0], [0], [1], [0, 0, 1, 1], [], []>} : vector<8x32xf32>, vector<32x8xf32>, vector<8x8xf32> -> vector<8x8xf32>
    %c1_41 = arith.constant 1 : index
    %c0_42 = arith.constant 0 : index
    %c0_43 = arith.constant 0 : index
    %50 = vector.load %arg5[%c1_41, %c0_42, %c0_43] : memref<4x1x8xf32, #tpu.memory_space<vmem>>, vector<1x1x8xf32>
    %51 = vector.shape_cast %50 : vector<1x1x8xf32> to vector<1x8xf32>
    %52 = vector.broadcast %51 : vector<1x8xf32> to vector<8x8xf32>
    %53 = arith.addf %49, %52 : vector<8x8xf32>
    %c1_44 = arith.constant 1 : index
    %c0_45 = arith.constant 0 : index
    %c0_46 = arith.constant 0 : index
    %54 = vector.load %arg6[%c1_44, %c0_45, %c0_46] : memref<4x32x8xf32, #tpu.memory_space<vmem>>, vector<1x32x8xf32>
    %55 = vector.shape_cast %54 : vector<1x32x8xf32> to vector<32x8xf32>
    %cst_47 = arith.constant dense<0.000000e+00> : vector<8x8xf32>
    %56 = tpu.matmul %1, %55, %cst_47 {dimension_numbers = #tpu.dot_dimension_numbers<[1], [0], [0], [1], [0, 0, 1, 1], [], []>} : vector<8x32xf32>, vector<32x8xf32>, vector<8x8xf32> -> vector<8x8xf32>
    %c1_48 = arith.constant 1 : index
    %c0_49 = arith.constant 0 : index
    %c0_50 = arith.constant 0 : index
    %57 = vector.load %arg7[%c1_48, %c0_49, %c0_50] : memref<4x1x8xf32, #tpu.memory_space<vmem>>, vector<1x1x8xf32>
    %58 = vector.shape_cast %57 : vector<1x1x8xf32> to vector<1x8xf32>
    %59 = vector.broadcast %58 : vector<1x8xf32> to vector<8x8xf32>
    %60 = arith.addf %56, %59 : vector<8x8xf32>
    %cst_51 = arith.constant dense<0.000000e+00> : vector<8x8xf32>
    %61 = tpu.matmul %46, %53, %cst_51 {dimension_numbers = #tpu.dot_dimension_numbers<[1], [1], [0], [0], [0, 0, 1, 0], [], []>} : vector<8x8xf32>, vector<8x8xf32>, vector<8x8xf32> -> vector<8x8xf32>
    %cst_52 = arith.constant 0.353553385 : f32
    %62 = vector.broadcast %cst_52 : f32 to vector<8x8xf32>
    %63 = arith.mulf %61, %62 : vector<8x8xf32>
    %cst_53 = arith.constant dense<0xFF800000> : vector<8xf32>
    %64 = vector.multi_reduction <maximumf>, %63, %cst_53 [1] : vector<8x8xf32> to vector<8xf32>
    %65 = vector.shape_cast %64 : vector<8xf32> to vector<8x1xf32>
    %66 = vector.broadcast %65 : vector<8x1xf32> to vector<8x8xf32>
    %67 = arith.subf %63, %66 : vector<8x8xf32>
    %68 = math.exp %67 : vector<8x8xf32>
    %cst_54 = arith.constant dense<0.000000e+00> : vector<8xf32>
    %69 = vector.multi_reduction <add>, %68, %cst_54 [1] : vector<8x8xf32> to vector<8xf32>
    %70 = vector.shape_cast %69 : vector<8xf32> to vector<8x1xf32>
    %71 = tpu.reciprocal %70 {approx = true} : vector<8x1xf32> -> vector<8x1xf32>
    %72 = vector.broadcast %71 : vector<8x1xf32> to vector<8x8xf32>
    %73 = arith.mulf %68, %72 : vector<8x8xf32>
    %cst_55 = arith.constant dense<0.000000e+00> : vector<8x8xf32>
    %74 = tpu.matmul %73, %60, %cst_55 {dimension_numbers = #tpu.dot_dimension_numbers<[1], [0], [0], [1], [0, 0, 1, 1], [], []>} : vector<8x8xf32>, vector<8x8xf32>, vector<8x8xf32> -> vector<8x8xf32>
    %c1_56 = arith.constant 1 : index
    %c0_57 = arith.constant 0 : index
    %c0_58 = arith.constant 0 : index
    %75 = vector.load %arg8[%c1_56, %c0_57, %c0_58] : memref<4x8x32xf32, #tpu.memory_space<vmem>>, vector<1x8x32xf32>
    %76 = vector.shape_cast %75 : vector<1x8x32xf32> to vector<8x32xf32>
    %cst_59 = arith.constant dense<0.000000e+00> : vector<8x32xf32>
    %77 = tpu.matmul %74, %76, %cst_59 {dimension_numbers = #tpu.dot_dimension_numbers<[1], [0], [0], [1], [0, 0, 1, 1], [], []>} : vector<8x8xf32>, vector<8x32xf32>, vector<8x32xf32> -> vector<8x32xf32>
    %78 = arith.addf %39, %77 : vector<8x32xf32>
    %c2 = arith.constant 2 : index
    %c0_60 = arith.constant 0 : index
    %c0_61 = arith.constant 0 : index
    %79 = vector.load %arg2[%c2, %c0_60, %c0_61] : memref<4x32x8xf32, #tpu.memory_space<vmem>>, vector<1x32x8xf32>
    %80 = vector.shape_cast %79 : vector<1x32x8xf32> to vector<32x8xf32>
    %cst_62 = arith.constant dense<0.000000e+00> : vector<8x8xf32>
    %81 = tpu.matmul %1, %80, %cst_62 {dimension_numbers = #tpu.dot_dimension_numbers<[1], [0], [0], [1], [0, 0, 1, 1], [], []>} : vector<8x32xf32>, vector<32x8xf32>, vector<8x8xf32> -> vector<8x8xf32>
    %c2_63 = arith.constant 2 : index
    %c0_64 = arith.constant 0 : index
    %c0_65 = arith.constant 0 : index
    %82 = vector.load %arg3[%c2_63, %c0_64, %c0_65] : memref<4x1x8xf32, #tpu.memory_space<vmem>>, vector<1x1x8xf32>
    %83 = vector.shape_cast %82 : vector<1x1x8xf32> to vector<1x8xf32>
    %84 = vector.broadcast %83 : vector<1x8xf32> to vector<8x8xf32>
    %85 = arith.addf %81, %84 : vector<8x8xf32>
    %c2_66 = arith.constant 2 : index
    %c0_67 = arith.constant 0 : index
    %c0_68 = arith.constant 0 : index
    %86 = vector.load %arg4[%c2_66, %c0_67, %c0_68] : memref<4x32x8xf32, #tpu.memory_space<vmem>>, vector<1x32x8xf32>
    %87 = vector.shape_cast %86 : vector<1x32x8xf32> to vector<32x8xf32>
    %cst_69 = arith.constant dense<0.000000e+00> : vector<8x8xf32>
    %88 = tpu.matmul %1, %87, %cst_69 {dimension_numbers = #tpu.dot_dimension_numbers<[1], [0], [0], [1], [0, 0, 1, 1], [], []>} : vector<8x32xf32>, vector<32x8xf32>, vector<8x8xf32> -> vector<8x8xf32>
    %c2_70 = arith.constant 2 : index
    %c0_71 = arith.constant 0 : index
    %c0_72 = arith.constant 0 : index
    %89 = vector.load %arg5[%c2_70, %c0_71, %c0_72] : memref<4x1x8xf32, #tpu.memory_space<vmem>>, vector<1x1x8xf32>
    %90 = vector.shape_cast %89 : vector<1x1x8xf32> to vector<1x8xf32>
    %91 = vector.broadcast %90 : vector<1x8xf32> to vector<8x8xf32>
    %92 = arith.addf %88, %91 : vector<8x8xf32>
    %c2_73 = arith.constant 2 : index
    %c0_74 = arith.constant 0 : index
    %c0_75 = arith.constant 0 : index
    %93 = vector.load %arg6[%c2_73, %c0_74, %c0_75] : memref<4x32x8xf32, #tpu.memory_space<vmem>>, vector<1x32x8xf32>
    %94 = vector.shape_cast %93 : vector<1x32x8xf32> to vector<32x8xf32>
    %cst_76 = arith.constant dense<0.000000e+00> : vector<8x8xf32>
    %95 = tpu.matmul %1, %94, %cst_76 {dimension_numbers = #tpu.dot_dimension_numbers<[1], [0], [0], [1], [0, 0, 1, 1], [], []>} : vector<8x32xf32>, vector<32x8xf32>, vector<8x8xf32> -> vector<8x8xf32>
    %c2_77 = arith.constant 2 : index
    %c0_78 = arith.constant 0 : index
    %c0_79 = arith.constant 0 : index
    %96 = vector.load %arg7[%c2_77, %c0_78, %c0_79] : memref<4x1x8xf32, #tpu.memory_space<vmem>>, vector<1x1x8xf32>
    %97 = vector.shape_cast %96 : vector<1x1x8xf32> to vector<1x8xf32>
    %98 = vector.broadcast %97 : vector<1x8xf32> to vector<8x8xf32>
    %99 = arith.addf %95, %98 : vector<8x8xf32>
    %cst_80 = arith.constant dense<0.000000e+00> : vector<8x8xf32>
    %100 = tpu.matmul %85, %92, %cst_80 {dimension_numbers = #tpu.dot_dimension_numbers<[1], [1], [0], [0], [0, 0, 1, 0], [], []>} : vector<8x8xf32>, vector<8x8xf32>, vector<8x8xf32> -> vector<8x8xf32>
    %cst_81 = arith.constant 0.353553385 : f32
    %101 = vector.broadcast %cst_81 : f32 to vector<8x8xf32>
    %102 = arith.mulf %100, %101 : vector<8x8xf32>
    %cst_82 = arith.constant dense<0xFF800000> : vector<8xf32>
    %103 = vector.multi_reduction <maximumf>, %102, %cst_82 [1] : vector<8x8xf32> to vector<8xf32>
    %104 = vector.shape_cast %103 : vector<8xf32> to vector<8x1xf32>
    %105 = vector.broadcast %104 : vector<8x1xf32> to vector<8x8xf32>
    %106 = arith.subf %102, %105 : vector<8x8xf32>
    %107 = math.exp %106 : vector<8x8xf32>
    %cst_83 = arith.constant dense<0.000000e+00> : vector<8xf32>
    %108 = vector.multi_reduction <add>, %107, %cst_83 [1] : vector<8x8xf32> to vector<8xf32>
    %109 = vector.shape_cast %108 : vector<8xf32> to vector<8x1xf32>
    %110 = tpu.reciprocal %109 {approx = true} : vector<8x1xf32> -> vector<8x1xf32>
    %111 = vector.broadcast %110 : vector<8x1xf32> to vector<8x8xf32>
    %112 = arith.mulf %107, %111 : vector<8x8xf32>
    %cst_84 = arith.constant dense<0.000000e+00> : vector<8x8xf32>
    %113 = tpu.matmul %112, %99, %cst_84 {dimension_numbers = #tpu.dot_dimension_numbers<[1], [0], [0], [1], [0, 0, 1, 1], [], []>} : vector<8x8xf32>, vector<8x8xf32>, vector<8x8xf32> -> vector<8x8xf32>
    %c2_85 = arith.constant 2 : index
    %c0_86 = arith.constant 0 : index
    %c0_87 = arith.constant 0 : index
    %114 = vector.load %arg8[%c2_85, %c0_86, %c0_87] : memref<4x8x32xf32, #tpu.memory_space<vmem>>, vector<1x8x32xf32>
    %115 = vector.shape_cast %114 : vector<1x8x32xf32> to vector<8x32xf32>
    %cst_88 = arith.constant dense<0.000000e+00> : vector<8x32xf32>
    %116 = tpu.matmul %113, %115, %cst_88 {dimension_numbers = #tpu.dot_dimension_numbers<[1], [0], [0], [1], [0, 0, 1, 1], [], []>} : vector<8x8xf32>, vector<8x32xf32>, vector<8x32xf32> -> vector<8x32xf32>
    %117 = arith.addf %78, %116 : vector<8x32xf32>
    %c3 = arith.constant 3 : index
    %c0_89 = arith.constant 0 : index
    %c0_90 = arith.constant 0 : index
    %118 = vector.load %arg2[%c3, %c0_89, %c0_90] : memref<4x32x8xf32, #tpu.memory_space<vmem>>, vector<1x32x8xf32>
    %119 = vector.shape_cast %118 : vector<1x32x8xf32> to vector<32x8xf32>
    %cst_91 = arith.constant dense<0.000000e+00> : vector<8x8xf32>
    %120 = tpu.matmul %1, %119, %cst_91 {dimension_numbers = #tpu.dot_dimension_numbers<[1], [0], [0], [1], [0, 0, 1, 1], [], []>} : vector<8x32xf32>, vector<32x8xf32>, vector<8x8xf32> -> vector<8x8xf32>
    %c3_92 = arith.constant 3 : index
    %c0_93 = arith.constant 0 : index
    %c0_94 = arith.constant 0 : index
    %121 = vector.load %arg3[%c3_92, %c0_93, %c0_94] : memref<4x1x8xf32, #tpu.memory_space<vmem>>, vector<1x1x8xf32>
    %122 = vector.shape_cast %121 : vector<1x1x8xf32> to vector<1x8xf32>
    %123 = vector.broadcast %122 : vector<1x8xf32> to vector<8x8xf32>
    %124 = arith.addf %120, %123 : vector<8x8xf32>
    %c3_95 = arith.constant 3 : index
    %c0_96 = arith.constant 0 : index
    %c0_97 = arith.constant 0 : index
    %125 = vector.load %arg4[%c3_95, %c0_96, %c0_97] : memref<4x32x8xf32, #tpu.memory_space<vmem>>, vector<1x32x8xf32>
    %126 = vector.shape_cast %125 : vector<1x32x8xf32> to vector<32x8xf32>
    %cst_98 = arith.constant dense<0.000000e+00> : vector<8x8xf32>
    %127 = tpu.matmul %1, %126, %cst_98 {dimension_numbers = #tpu.dot_dimension_numbers<[1], [0], [0], [1], [0, 0, 1, 1], [], []>} : vector<8x32xf32>, vector<32x8xf32>, vector<8x8xf32> -> vector<8x8xf32>
    %c3_99 = arith.constant 3 : index
    %c0_100 = arith.constant 0 : index
    %c0_101 = arith.constant 0 : index
    %128 = vector.load %arg5[%c3_99, %c0_100, %c0_101] : memref<4x1x8xf32, #tpu.memory_space<vmem>>, vector<1x1x8xf32>
    %129 = vector.shape_cast %128 : vector<1x1x8xf32> to vector<1x8xf32>
    %130 = vector.broadcast %129 : vector<1x8xf32> to vector<8x8xf32>
    %131 = arith.addf %127, %130 : vector<8x8xf32>
    %c3_102 = arith.constant 3 : index
    %c0_103 = arith.constant 0 : index
    %c0_104 = arith.constant 0 : index
    %132 = vector.load %arg6[%c3_102, %c0_103, %c0_104] : memref<4x32x8xf32, #tpu.memory_space<vmem>>, vector<1x32x8xf32>
    %133 = vector.shape_cast %132 : vector<1x32x8xf32> to vector<32x8xf32>
    %cst_105 = arith.constant dense<0.000000e+00> : vector<8x8xf32>
    %134 = tpu.matmul %1, %133, %cst_105 {dimension_numbers = #tpu.dot_dimension_numbers<[1], [0], [0], [1], [0, 0, 1, 1], [], []>} : vector<8x32xf32>, vector<32x8xf32>, vector<8x8xf32> -> vector<8x8xf32>
    %c3_106 = arith.constant 3 : index
    %c0_107 = arith.constant 0 : index
    %c0_108 = arith.constant 0 : index
    %135 = vector.load %arg7[%c3_106, %c0_107, %c0_108] : memref<4x1x8xf32, #tpu.memory_space<vmem>>, vector<1x1x8xf32>
    %136 = vector.shape_cast %135 : vector<1x1x8xf32> to vector<1x8xf32>
    %137 = vector.broadcast %136 : vector<1x8xf32> to vector<8x8xf32>
    %138 = arith.addf %134, %137 : vector<8x8xf32>
    %cst_109 = arith.constant dense<0.000000e+00> : vector<8x8xf32>
    %139 = tpu.matmul %124, %131, %cst_109 {dimension_numbers = #tpu.dot_dimension_numbers<[1], [1], [0], [0], [0, 0, 1, 0], [], []>} : vector<8x8xf32>, vector<8x8xf32>, vector<8x8xf32> -> vector<8x8xf32>
    %cst_110 = arith.constant 0.353553385 : f32
    %140 = vector.broadcast %cst_110 : f32 to vector<8x8xf32>
    %141 = arith.mulf %139, %140 : vector<8x8xf32>
    %cst_111 = arith.constant dense<0xFF800000> : vector<8xf32>
    %142 = vector.multi_reduction <maximumf>, %141, %cst_111 [1] : vector<8x8xf32> to vector<8xf32>
    %143 = vector.shape_cast %142 : vector<8xf32> to vector<8x1xf32>
    %144 = vector.broadcast %143 : vector<8x1xf32> to vector<8x8xf32>
    %145 = arith.subf %141, %144 : vector<8x8xf32>
    %146 = math.exp %145 : vector<8x8xf32>
    %cst_112 = arith.constant dense<0.000000e+00> : vector<8xf32>
    %147 = vector.multi_reduction <add>, %146, %cst_112 [1] : vector<8x8xf32> to vector<8xf32>
    %148 = vector.shape_cast %147 : vector<8xf32> to vector<8x1xf32>
    %149 = tpu.reciprocal %148 {approx = true} : vector<8x1xf32> -> vector<8x1xf32>
    %150 = vector.broadcast %149 : vector<8x1xf32> to vector<8x8xf32>
    %151 = arith.mulf %146, %150 : vector<8x8xf32>
    %cst_113 = arith.constant dense<0.000000e+00> : vector<8x8xf32>
    %152 = tpu.matmul %151, %138, %cst_113 {dimension_numbers = #tpu.dot_dimension_numbers<[1], [0], [0], [1], [0, 0, 1, 1], [], []>} : vector<8x8xf32>, vector<8x8xf32>, vector<8x8xf32> -> vector<8x8xf32>
    %c3_114 = arith.constant 3 : index
    %c0_115 = arith.constant 0 : index
    %c0_116 = arith.constant 0 : index
    %153 = vector.load %arg8[%c3_114, %c0_115, %c0_116] : memref<4x8x32xf32, #tpu.memory_space<vmem>>, vector<1x8x32xf32>
    %154 = vector.shape_cast %153 : vector<1x8x32xf32> to vector<8x32xf32>
    %cst_117 = arith.constant dense<0.000000e+00> : vector<8x32xf32>
    %155 = tpu.matmul %152, %154, %cst_117 {dimension_numbers = #tpu.dot_dimension_numbers<[1], [0], [0], [1], [0, 0, 1, 1], [], []>} : vector<8x8xf32>, vector<8x32xf32>, vector<8x32xf32> -> vector<8x32xf32>
    %156 = arith.addf %117, %155 : vector<8x32xf32>
    %c0_118 = arith.constant 0 : index
    %c0_119 = arith.constant 0 : index
    %157 = vector.load %arg9[%c0_118, %c0_119] : memref<1x32xf32, #tpu.memory_space<vmem>>, vector<1x32xf32>
    %158 = vector.broadcast %157 : vector<1x32xf32> to vector<8x32xf32>
    %159 = arith.addf %156, %158 : vector<8x32xf32>
    %160 = arith.addf %1, %159 : vector<8x32xf32>
    %c0_120 = arith.constant 0 : index
    %c0_121 = arith.constant 0 : index
    %161 = vector.load %arg10[%c0_120, %c0_121] : memref<1x32xf32, #tpu.memory_space<vmem>>, vector<1x32xf32>
    %c0_122 = arith.constant 0 : index
    %c0_123 = arith.constant 0 : index
    %162 = vector.load %arg11[%c0_122, %c0_123] : memref<1x32xf32, #tpu.memory_space<vmem>>, vector<1x32xf32>
    %cst_124 = arith.constant dense<0.000000e+00> : vector<8xf32>
    %163 = vector.multi_reduction <add>, %160, %cst_124 [1] : vector<8x32xf32> to vector<8xf32>
    %164 = vector.shape_cast %163 : vector<8xf32> to vector<8x1xf32>
    %cst_125 = arith.constant 3.200000e+01 : f32
    %165 = vector.broadcast %cst_125 : f32 to vector<8x1xf32>
    %166 = arith.divf %164, %165 : vector<8x1xf32>
    %167 = vector.broadcast %166 : vector<8x1xf32> to vector<8x32xf32>
    %168 = arith.subf %160, %167 : vector<8x32xf32>
    %169 = arith.mulf %168, %168 : vector<8x32xf32>
    %cst_126 = arith.constant dense<0.000000e+00> : vector<8xf32>
    %170 = vector.multi_reduction <add>, %169, %cst_126 [1] : vector<8x32xf32> to vector<8xf32>
    %171 = vector.shape_cast %170 : vector<8xf32> to vector<8x1xf32>
    %cst_127 = arith.constant 3.200000e+01 : f32
    %172 = vector.broadcast %cst_127 : f32 to vector<8x1xf32>
    %173 = arith.divf %171, %172 : vector<8x1xf32>
    %174 = vector.broadcast %166 : vector<8x1xf32> to vector<8x32xf32>
    %175 = arith.subf %160, %174 : vector<8x32xf32>
    %cst_128 = arith.constant 9.99999974E-6 : f32
    %176 = vector.broadcast %cst_128 : f32 to vector<8x1xf32>
    %177 = arith.addf %173, %176 : vector<8x1xf32>
    %178 = math.rsqrt %177 : vector<8x1xf32>
    %179 = vector.broadcast %178 : vector<8x1xf32> to vector<8x32xf32>
    %180 = arith.mulf %175, %179 : vector<8x32xf32>
    %181 = vector.broadcast %161 : vector<1x32xf32> to vector<8x32xf32>
    %182 = arith.mulf %180, %181 : vector<8x32xf32>
    %183 = vector.broadcast %162 : vector<1x32xf32> to vector<8x32xf32>
    %184 = arith.addf %182, %183 : vector<8x32xf32>
    %c0_129 = arith.constant 0 : index
    %c0_130 = arith.constant 0 : index
    %185 = vector.load %arg12[%c0_129, %c0_130] : memref<32x64xf32, #tpu.memory_space<vmem>>, vector<32x64xf32>
    %cst_131 = arith.constant dense<0.000000e+00> : vector<8x64xf32>
    %186 = tpu.matmul %184, %185, %cst_131 {dimension_numbers = #tpu.dot_dimension_numbers<[1], [0], [0], [1], [0, 0, 1, 1], [], []>} : vector<8x32xf32>, vector<32x64xf32>, vector<8x64xf32> -> vector<8x64xf32>
    %c0_132 = arith.constant 0 : index
    %c0_133 = arith.constant 0 : index
    %187 = vector.load %arg13[%c0_132, %c0_133] : memref<1x64xf32, #tpu.memory_space<vmem>>, vector<1x64xf32>
    %188 = vector.broadcast %187 : vector<1x64xf32> to vector<8x64xf32>
    %189 = arith.addf %186, %188 : vector<8x64xf32>
    %cst_134 = arith.constant 0.000000e+00 : f32
    %190 = vector.broadcast %cst_134 : f32 to vector<8x64xf32>
    %191 = arith.maximumf %189, %190 : vector<8x64xf32>
    %c0_135 = arith.constant 0 : index
    %c0_136 = arith.constant 0 : index
    %192 = vector.load %arg14[%c0_135, %c0_136] : memref<64x32xf32, #tpu.memory_space<vmem>>, vector<64x32xf32>
    %cst_137 = arith.constant dense<0.000000e+00> : vector<8x32xf32>
    %193 = tpu.matmul %191, %192, %cst_137 {dimension_numbers = #tpu.dot_dimension_numbers<[1], [0], [0], [1], [0, 0, 1, 1], [], []>} : vector<8x64xf32>, vector<64x32xf32>, vector<8x32xf32> -> vector<8x32xf32>
    %c0_138 = arith.constant 0 : index
    %c0_139 = arith.constant 0 : index
    %194 = vector.load %arg15[%c0_138, %c0_139] : memref<1x32xf32, #tpu.memory_space<vmem>>, vector<1x32xf32>
    %195 = vector.broadcast %194 : vector<1x32xf32> to vector<8x32xf32>
    %196 = arith.addf %193, %195 : vector<8x32xf32>
    %197 = arith.addf %184, %196 : vector<8x32xf32>
    %c0_140 = arith.constant 0 : index
    %c0_141 = arith.constant 0 : index
    %198 = vector.load %arg16[%c0_140, %c0_141] : memref<1x32xf32, #tpu.memory_space<vmem>>, vector<1x32xf32>
    %c0_142 = arith.constant 0 : index
    %c0_143 = arith.constant 0 : index
    %199 = vector.load %arg17[%c0_142, %c0_143] : memref<1x32xf32, #tpu.memory_space<vmem>>, vector<1x32xf32>
    %cst_144 = arith.constant dense<0.000000e+00> : vector<8xf32>
    %200 = vector.multi_reduction <add>, %197, %cst_144 [1] : vector<8x32xf32> to vector<8xf32>
    %201 = vector.shape_cast %200 : vector<8xf32> to vector<8x1xf32>
    %cst_145 = arith.constant 3.200000e+01 : f32
    %202 = vector.broadcast %cst_145 : f32 to vector<8x1xf32>
    %203 = arith.divf %201, %202 : vector<8x1xf32>
    %204 = vector.broadcast %203 : vector<8x1xf32> to vector<8x32xf32>
    %205 = arith.subf %197, %204 : vector<8x32xf32>
    %206 = arith.mulf %205, %205 : vector<8x32xf32>
    %cst_146 = arith.constant dense<0.000000e+00> : vector<8xf32>
    %207 = vector.multi_reduction <add>, %206, %cst_146 [1] : vector<8x32xf32> to vector<8xf32>
    %208 = vector.shape_cast %207 : vector<8xf32> to vector<8x1xf32>
    %cst_147 = arith.constant 3.200000e+01 : f32
    %209 = vector.broadcast %cst_147 : f32 to vector<8x1xf32>
    %210 = arith.divf %208, %209 : vector<8x1xf32>
    %211 = vector.broadcast %203 : vector<8x1xf32> to vector<8x32xf32>
    %212 = arith.subf %197, %211 : vector<8x32xf32>
    %cst_148 = arith.constant 9.99999974E-6 : f32
    %213 = vector.broadcast %cst_148 : f32 to vector<8x1xf32>
    %214 = arith.addf %210, %213 : vector<8x1xf32>
    %215 = math.rsqrt %214 : vector<8x1xf32>
    %216 = vector.broadcast %215 : vector<8x1xf32> to vector<8x32xf32>
    %217 = arith.mulf %212, %216 : vector<8x32xf32>
    %218 = vector.broadcast %198 : vector<1x32xf32> to vector<8x32xf32>
    %219 = arith.mulf %217, %218 : vector<8x32xf32>
    %220 = vector.broadcast %199 : vector<1x32xf32> to vector<8x32xf32>
    %221 = arith.addf %219, %220 : vector<8x32xf32>
    %c0_149 = arith.constant 0 : index
    %c0_150 = arith.constant 0 : index
    %c0_151 = arith.constant 0 : index
    %222 = vector.load %arg18[%c0_149, %c0_150, %c0_151] : memref<1x8x32xf32, #tpu.memory_space<vmem>>, vector<1x8x32xf32>
    %223 = vector.shape_cast %222 : vector<1x8x32xf32> to vector<8x32xf32>
    %224 = vector.shape_cast %221 : vector<8x32xf32> to vector<1x8x32xf32>
    tpu.vector_store %arg18[%c0_149, %c0_150, %c0_151], %224 {strides = array<i32>} : memref<1x8x32xf32, #tpu.memory_space<vmem>>, vector<1x8x32xf32>,
    return
  }
  func.func @transform_0(%arg0: i32) -> (i32, i32, i32) {
    %c0_i32 = arith.constant 0 : i32
    %c0_i32_0 = arith.constant 0 : i32
    %c0_i32_1 = arith.constant 0 : i32
    return %arg0, %c0_i32, %c0_i32_0 : i32, i32, i32
  }
  func.func @transform_1(%arg0: i32) -> (i32, i32, i32) {
    %c0_i32 = arith.constant 0 : i32
    %c0_i32_0 = arith.constant 0 : i32
    %c0_i32_1 = arith.constant 0 : i32
    %c0_i32_2 = arith.constant 0 : i32
    return %c0_i32, %c0_i32_0, %c0_i32_1 : i32, i32, i32
  }
  func.func @transform_2(%arg0: i32) -> (i32, i32, i32) {
    %c0_i32 = arith.constant 0 : i32
    %c0_i32_0 = arith.constant 0 : i32
    %c0_i32_1 = arith.constant 0 : i32
    %c0_i32_2 = arith.constant 0 : i32
    return %c0_i32, %c0_i32_0, %c0_i32_1 : i32, i32, i32
  }
  func.func @transform_3(%arg0: i32) -> (i32, i32, i32) {
    %c0_i32 = arith.constant 0 : i32
    %c0_i32_0 = arith.constant 0 : i32
    %c0_i32_1 = arith.constant 0 : i32
    %c0_i32_2 = arith.constant 0 : i32
    return %c0_i32, %c0_i32_0, %c0_i32_1 : i32, i32, i32
  }
  func.func @transform_4(%arg0: i32) -> (i32, i32, i32) {
    %c0_i32 = arith.constant 0 : i32
    %c0_i32_0 = arith.constant 0 : i32
    %c0_i32_1 = arith.constant 0 : i32
    %c0_i32_2 = arith.constant 0 : i32
    return %c0_i32, %c0_i32_0, %c0_i32_1 : i32, i32, i32
  }
  func.func @transform_5(%arg0: i32) -> (i32, i32, i32) {
    %c0_i32 = arith.constant 0 : i32
    %c0_i32_0 = arith.constant 0 : i32
    %c0_i32_1 = arith.constant 0 : i32
    %c0_i32_2 = arith.constant 0 : i32
    return %c0_i32, %c0_i32_0, %c0_i32_1 : i32, i32, i32
  }
  func.func @transform_6(%arg0: i32) -> (i32, i32, i32) {
    %c0_i32 = arith.constant 0 : i32
    %c0_i32_0 = arith.constant 0 : i32
    %c0_i32_1 = arith.constant 0 : i32
    %c0_i32_2 = arith.constant 0 : i32
    return %c0_i32, %c0_i32_0, %c0_i32_1 : i32, i32, i32
  }
  func.func @transform_7(%arg0: i32) -> (i32, i32, i32) {
    %c0_i32 = arith.constant 0 : i32
    %c0_i32_0 = arith.constant 0 : i32
    %c0_i32_1 = arith.constant 0 : i32
    %c0_i32_2 = arith.constant 0 : i32
    return %c0_i32, %c0_i32_0, %c0_i32_1 : i32, i32, i32
  }
  func.func @transform_8(%arg0: i32) -> (i32, i32) {
    %c0_i32 = arith.constant 0 : i32
    %c0_i32_0 = arith.constant 0 : i32
    %c0_i32_1 = arith.constant 0 : i32
    return %c0_i32, %c0_i32_0 : i32, i32
  }
  func.func @transform_9(%arg0: i32) -> (i32, i32) {
    %c0_i32 = arith.constant 0 : i32
    %c0_i32_0 = arith.constant 0 : i32
    %c0_i32_1 = arith.constant 0 : i32
    return %c0_i32, %c0_i32_0 : i32, i32
  }
  func.func @transform_10(%arg0: i32) -> (i32, i32) {
    %c0_i32 = arith.constant 0 : i32
    %c0_i32_0 = arith.constant 0 : i32
    %c0_i32_1 = arith.constant 0 : i32
    return %c0_i32, %c0_i32_0 : i32, i32
  }
  func.func @transform_11(%arg0: i32) -> (i32, i32) {
    %c0_i32 = arith.constant 0 : i32
    %c0_i32_0 = arith.constant 0 : i32
    %c0_i32_1 = arith.constant 0 : i32
    return %c0_i32, %c0_i32_0 : i32, i32
  }
  func.func @transform_12(%arg0: i32) -> (i32, i32) {
    %c0_i32 = arith.constant 0 : i32
    %c0_i32_0 = arith.constant 0 : i32
    %c0_i32_1 = arith.constant 0 : i32
    return %c0_i32, %c0_i32_0 : i32, i32
  }
  func.func @transform_13(%arg0: i32) -> (i32, i32) {
    %c0_i32 = arith.constant 0 : i32
    %c0_i32_0 = arith.constant 0 : i32
    %c0_i32_1 = arith.constant 0 : i32
    return %c0_i32, %c0_i32_0 : i32, i32
  }
  func.func @transform_14(%arg0: i32) -> (i32, i32) {
    %c0_i32 = arith.constant 0 : i32
    %c0_i32_0 = arith.constant 0 : i32
    %c0_i32_1 = arith.constant 0 : i32
    return %c0_i32, %c0_i32_0 : i32, i32
  }
  func.func @transform_15(%arg0: i32) -> (i32, i32) {
    %c0_i32 = arith.constant 0 : i32
    %c0_i32_0 = arith.constant 0 : i32
    %c0_i32_1 = arith.constant 0 : i32
    return %c0_i32, %c0_i32_0 : i32, i32
  }
  func.func @transform_16(%arg0: i32) -> (i32, i32) {
    %c0_i32 = arith.constant 0 : i32
    %c0_i32_0 = arith.constant 0 : i32
    %c0_i32_1 = arith.constant 0 : i32
    return %c0_i32, %c0_i32_0 : i32, i32
  }
  func.func @transform_17(%arg0: i32) -> (i32, i32, i32) {
    %c0_i32 = arith.constant 0 : i32
    %c0_i32_0 = arith.constant 0 : i32
    %c0_i32_1 = arith.constant 0 : i32
    return %arg0, %c0_i32, %c0_i32_0 : i32, i32, i32
  }
}

module attributes {stable_mosaic.version = 11 : i64} {
  func.func @_final_norm_project_kernel(%arg0: memref<20x32xf32, #tpu.memory_space<vmem>>, %arg1: memref<1x32xf32, #tpu.memory_space<vmem>>, %arg2: memref<1x32xf32, #tpu.memory_space<vmem>>, %arg3: memref<32x128xf32, #tpu.memory_space<vmem>>, %arg4: memref<1x128xf32, #tpu.memory_space<vmem>>, %arg5: memref<20x128xf32, #tpu.memory_space<vmem>>) attributes {dimension_semantics = [], scalar_prefetch = 0 : i64, scratch_operands = 0 : i64, tpu.core_type = #tpu.core_type<tc>} {
    %c0 = arith.constant 0 : index
    %c0_0 = arith.constant 0 : index
    %0 = vector.load %arg0[%c0, %c0_0] : memref<20x32xf32, #tpu.memory_space<vmem>>, vector<20x32xf32>
    %c0_1 = arith.constant 0 : index
    %c0_2 = arith.constant 0 : index
    %1 = vector.load %arg1[%c0_1, %c0_2] : memref<1x32xf32, #tpu.memory_space<vmem>>, vector<1x32xf32>
    %c0_3 = arith.constant 0 : index
    %c0_4 = arith.constant 0 : index
    %2 = vector.load %arg2[%c0_3, %c0_4] : memref<1x32xf32, #tpu.memory_space<vmem>>, vector<1x32xf32>
    %cst = arith.constant dense<0.000000e+00> : vector<20xf32>
    %3 = vector.multi_reduction <add>, %0, %cst [1] : vector<20x32xf32> to vector<20xf32>
    %4 = vector.shape_cast %3 : vector<20xf32> to vector<20x1xf32>
    %cst_5 = arith.constant 3.200000e+01 : f32
    %5 = vector.broadcast %cst_5 : f32 to vector<20x1xf32>
    %6 = arith.divf %4, %5 : vector<20x1xf32>
    %7 = vector.broadcast %6 : vector<20x1xf32> to vector<20x32xf32>
    %8 = arith.subf %0, %7 : vector<20x32xf32>
    %9 = arith.mulf %8, %8 : vector<20x32xf32>
    %cst_6 = arith.constant dense<0.000000e+00> : vector<20xf32>
    %10 = vector.multi_reduction <add>, %9, %cst_6 [1] : vector<20x32xf32> to vector<20xf32>
    %11 = vector.shape_cast %10 : vector<20xf32> to vector<20x1xf32>
    %cst_7 = arith.constant 3.200000e+01 : f32
    %12 = vector.broadcast %cst_7 : f32 to vector<20x1xf32>
    %13 = arith.divf %11, %12 : vector<20x1xf32>
    %14 = vector.broadcast %6 : vector<20x1xf32> to vector<20x32xf32>
    %15 = arith.subf %0, %14 : vector<20x32xf32>
    %cst_8 = arith.constant 9.99999974E-6 : f32
    %16 = vector.broadcast %cst_8 : f32 to vector<20x1xf32>
    %17 = arith.addf %13, %16 : vector<20x1xf32>
    %18 = math.rsqrt %17 : vector<20x1xf32>
    %19 = vector.broadcast %18 : vector<20x1xf32> to vector<20x32xf32>
    %20 = arith.mulf %15, %19 : vector<20x32xf32>
    %21 = vector.broadcast %1 : vector<1x32xf32> to vector<20x32xf32>
    %22 = arith.mulf %20, %21 : vector<20x32xf32>
    %23 = vector.broadcast %2 : vector<1x32xf32> to vector<20x32xf32>
    %24 = arith.addf %22, %23 : vector<20x32xf32>
    %c0_9 = arith.constant 0 : index
    %c0_10 = arith.constant 0 : index
    %25 = vector.load %arg3[%c0_9, %c0_10] : memref<32x128xf32, #tpu.memory_space<vmem>>, vector<32x128xf32>
    %cst_11 = arith.constant dense<0.000000e+00> : vector<20x128xf32>
    %26 = tpu.matmul %24, %25, %cst_11 {dimension_numbers = #tpu.dot_dimension_numbers<[1], [0], [0], [1], [0, 0, 1, 1], [], []>} : vector<20x32xf32>, vector<32x128xf32>, vector<20x128xf32> -> vector<20x128xf32>
    %c0_12 = arith.constant 0 : index
    %c0_13 = arith.constant 0 : index
    %27 = vector.load %arg4[%c0_12, %c0_13] : memref<1x128xf32, #tpu.memory_space<vmem>>, vector<1x128xf32>
    %28 = vector.broadcast %27 : vector<1x128xf32> to vector<20x128xf32>
    %29 = arith.addf %26, %28 : vector<20x128xf32>
    %c0_14 = arith.constant 0 : index
    %c0_15 = arith.constant 0 : index
    %30 = vector.load %arg5[%c0_14, %c0_15] : memref<20x128xf32, #tpu.memory_space<vmem>>, vector<20x128xf32>
    tpu.vector_store %arg5[%c0_14, %c0_15], %29 {strides = array<i32>} : memref<20x128xf32, #tpu.memory_space<vmem>>, vector<20x128xf32>,
    return
  }
}

module attributes {stable_mosaic.version = 11 : i64} {
  func.func @_decoder_layer_kernel(%arg0: i32, %arg1: memref<1x10x32xf32, #tpu.memory_space<vmem>>, %arg2: memref<1x8x32xf32, #tpu.memory_space<vmem>>, %arg3: memref<4x32x8xf32, #tpu.memory_space<vmem>>, %arg4: memref<4x1x8xf32, #tpu.memory_space<vmem>>, %arg5: memref<4x32x8xf32, #tpu.memory_space<vmem>>, %arg6: memref<4x1x8xf32, #tpu.memory_space<vmem>>, %arg7: memref<4x32x8xf32, #tpu.memory_space<vmem>>, %arg8: memref<4x1x8xf32, #tpu.memory_space<vmem>>, %arg9: memref<4x8x32xf32, #tpu.memory_space<vmem>>, %arg10: memref<1x32xf32, #tpu.memory_space<vmem>>, %arg11: memref<1x32xf32, #tpu.memory_space<vmem>>, %arg12: memref<1x32xf32, #tpu.memory_space<vmem>>, %arg13: memref<4x32x8xf32, #tpu.memory_space<vmem>>, %arg14: memref<4x1x8xf32, #tpu.memory_space<vmem>>, %arg15: memref<4x32x8xf32, #tpu.memory_space<vmem>>, %arg16: memref<4x1x8xf32, #tpu.memory_space<vmem>>, %arg17: memref<4x32x8xf32, #tpu.memory_space<vmem>>, %arg18: memref<4x1x8xf32, #tpu.memory_space<vmem>>, %arg19: memref<4x8x32xf32, #tpu.memory_space<vmem>>, %arg20: memref<1x32xf32, #tpu.memory_space<vmem>>, %arg21: memref<1x32xf32, #tpu.memory_space<vmem>>, %arg22: memref<1x32xf32, #tpu.memory_space<vmem>>, %arg23: memref<32x64xf32, #tpu.memory_space<vmem>>, %arg24: memref<1x64xf32, #tpu.memory_space<vmem>>, %arg25: memref<64x32xf32, #tpu.memory_space<vmem>>, %arg26: memref<1x32xf32, #tpu.memory_space<vmem>>, %arg27: memref<1x32xf32, #tpu.memory_space<vmem>>, %arg28: memref<1x32xf32, #tpu.memory_space<vmem>>, %arg29: memref<1x10x32xf32, #tpu.memory_space<vmem>>) attributes {dimension_semantics = [#tpu.dimension_semantics<parallel>], iteration_bounds = array<i64: 2>, scalar_prefetch = 0 : i64, scratch_operands = 0 : i64, tpu.core_type = #tpu.core_type<tc>, window_params = [{transform_indices = @transform_0, window_bounds = array<i64: 1, 10, 32>}, {transform_indices = @transform_1, window_bounds = array<i64: 1, 8, 32>}, {pipeline_mode = #tpu.pipeline_mode<synchronous>, transform_indices = @transform_2, window_bounds = array<i64: 4, 32, 8>}, {pipeline_mode = #tpu.pipeline_mode<synchronous>, transform_indices = @transform_3, window_bounds = array<i64: 4, 1, 8>}, {pipeline_mode = #tpu.pipeline_mode<synchronous>, transform_indices = @transform_4, window_bounds = array<i64: 4, 32, 8>}, {pipeline_mode = #tpu.pipeline_mode<synchronous>, transform_indices = @transform_5, window_bounds = array<i64: 4, 1, 8>}, {pipeline_mode = #tpu.pipeline_mode<synchronous>, transform_indices = @transform_6, window_bounds = array<i64: 4, 32, 8>}, {pipeline_mode = #tpu.pipeline_mode<synchronous>, transform_indices = @transform_7, window_bounds = array<i64: 4, 1, 8>}, {pipeline_mode = #tpu.pipeline_mode<synchronous>, transform_indices = @transform_8, window_bounds = array<i64: 4, 8, 32>}, {pipeline_mode = #tpu.pipeline_mode<synchronous>, transform_indices = @transform_9, window_bounds = array<i64: 1, 32>}, {pipeline_mode = #tpu.pipeline_mode<synchronous>, transform_indices = @transform_10, window_bounds = array<i64: 1, 32>}, {pipeline_mode = #tpu.pipeline_mode<synchronous>, transform_indices = @transform_11, window_bounds = array<i64: 1, 32>}, {pipeline_mode = #tpu.pipeline_mode<synchronous>, transform_indices = @transform_12, window_bounds = array<i64: 4, 32, 8>}, {pipeline_mode = #tpu.pipeline_mode<synchronous>, transform_indices = @transform_13, window_bounds = array<i64: 4, 1, 8>}, {pipeline_mode = #tpu.pipeline_mode<synchronous>, transform_indices = @transform_14, window_bounds = array<i64: 4, 32, 8>}, {pipeline_mode = #tpu.pipeline_mode<synchronous>, transform_indices = @transform_15, window_bounds = array<i64: 4, 1, 8>}, {pipeline_mode = #tpu.pipeline_mode<synchronous>, transform_indices = @transform_16, window_bounds = array<i64: 4, 32, 8>}, {pipeline_mode = #tpu.pipeline_mode<synchronous>, transform_indices = @transform_17, window_bounds = array<i64: 4, 1, 8>}, {pipeline_mode = #tpu.pipeline_mode<synchronous>, transform_indices = @transform_18, window_bounds = array<i64: 4, 8, 32>}, {pipeline_mode = #tpu.pipeline_mode<synchronous>, transform_indices = @transform_19, window_bounds = array<i64: 1, 32>}, {pipeline_mode = #tpu.pipeline_mode<synchronous>, transform_indices = @transform_20, window_bounds = array<i64: 1, 32>}, {pipeline_mode = #tpu.pipeline_mode<synchronous>, transform_indices = @transform_21, window_bounds = array<i64: 1, 32>}, {pipeline_mode = #tpu.pipeline_mode<synchronous>, transform_indices = @transform_22, window_bounds = array<i64: 32, 64>}, {pipeline_mode = #tpu.pipeline_mode<synchronous>, transform_indices = @transform_23, window_bounds = array<i64: 1, 64>}, {pipeline_mode = #tpu.pipeline_mode<synchronous>, transform_indices = @transform_24, window_bounds = array<i64: 64, 32>}, {pipeline_mode = #tpu.pipeline_mode<synchronous>, transform_indices = @transform_25, window_bounds = array<i64: 1, 32>}, {pipeline_mode = #tpu.pipeline_mode<synchronous>, transform_indices = @transform_26, window_bounds = array<i64: 1, 32>}, {pipeline_mode = #tpu.pipeline_mode<synchronous>, transform_indices = @transform_27, window_bounds = array<i64: 1, 32>}, {transform_indices = @transform_28, window_bounds = array<i64: 1, 10, 32>}]} {
    %c0 = arith.constant 0 : index
    %c0_0 = arith.constant 0 : index
    %c0_1 = arith.constant 0 : index
    %0 = vector.load %arg1[%c0, %c0_0, %c0_1] : memref<1x10x32xf32, #tpu.memory_space<vmem>>, vector<1x10x32xf32>
    %1 = vector.shape_cast %0 : vector<1x10x32xf32> to vector<10x32xf32>
    %c0_2 = arith.constant 0 : index
    %c0_3 = arith.constant 0 : index
    %c0_4 = arith.constant 0 : index
    %2 = vector.load %arg2[%c0_2, %c0_3, %c0_4] : memref<1x8x32xf32, #tpu.memory_space<vmem>>, vector<1x8x32xf32>
    %3 = vector.shape_cast %2 : vector<1x8x32xf32> to vector<8x32xf32>
    %c0_5 = arith.constant 0 : index
    %c0_6 = arith.constant 0 : index
    %c0_7 = arith.constant 0 : index
    %4 = vector.load %arg3[%c0_5, %c0_6, %c0_7] : memref<4x32x8xf32, #tpu.memory_space<vmem>>, vector<1x32x8xf32>
    %5 = vector.shape_cast %4 : vector<1x32x8xf32> to vector<32x8xf32>
    %cst = arith.constant dense<0.000000e+00> : vector<10x8xf32>
    %6 = tpu.matmul %1, %5, %cst {dimension_numbers = #tpu.dot_dimension_numbers<[1], [0], [0], [1], [0, 0, 1, 1], [], []>} : vector<10x32xf32>, vector<32x8xf32>, vector<10x8xf32> -> vector<10x8xf32>
    %c0_8 = arith.constant 0 : index
    %c0_9 = arith.constant 0 : index
    %c0_10 = arith.constant 0 : index
    %7 = vector.load %arg4[%c0_8, %c0_9, %c0_10] : memref<4x1x8xf32, #tpu.memory_space<vmem>>, vector<1x1x8xf32>
    %8 = vector.shape_cast %7 : vector<1x1x8xf32> to vector<1x8xf32>
    %9 = vector.broadcast %8 : vector<1x8xf32> to vector<10x8xf32>
    %10 = arith.addf %6, %9 : vector<10x8xf32>
    %c0_11 = arith.constant 0 : index
    %c0_12 = arith.constant 0 : index
    %c0_13 = arith.constant 0 : index
    %11 = vector.load %arg5[%c0_11, %c0_12, %c0_13] : memref<4x32x8xf32, #tpu.memory_space<vmem>>, vector<1x32x8xf32>
    %12 = vector.shape_cast %11 : vector<1x32x8xf32> to vector<32x8xf32>
    %cst_14 = arith.constant dense<0.000000e+00> : vector<10x8xf32>
    %13 = tpu.matmul %1, %12, %cst_14 {dimension_numbers = #tpu.dot_dimension_numbers<[1], [0], [0], [1], [0, 0, 1, 1], [], []>} : vector<10x32xf32>, vector<32x8xf32>, vector<10x8xf32> -> vector<10x8xf32>
    %c0_15 = arith.constant 0 : index
    %c0_16 = arith.constant 0 : index
    %c0_17 = arith.constant 0 : index
    %14 = vector.load %arg6[%c0_15, %c0_16, %c0_17] : memref<4x1x8xf32, #tpu.memory_space<vmem>>, vector<1x1x8xf32>
    %15 = vector.shape_cast %14 : vector<1x1x8xf32> to vector<1x8xf32>
    %16 = vector.broadcast %15 : vector<1x8xf32> to vector<10x8xf32>
    %17 = arith.addf %13, %16 : vector<10x8xf32>
    %c0_18 = arith.constant 0 : index
    %c0_19 = arith.constant 0 : index
    %c0_20 = arith.constant 0 : index
    %18 = vector.load %arg7[%c0_18, %c0_19, %c0_20] : memref<4x32x8xf32, #tpu.memory_space<vmem>>, vector<1x32x8xf32>
    %19 = vector.shape_cast %18 : vector<1x32x8xf32> to vector<32x8xf32>
    %cst_21 = arith.constant dense<0.000000e+00> : vector<10x8xf32>
    %20 = tpu.matmul %1, %19, %cst_21 {dimension_numbers = #tpu.dot_dimension_numbers<[1], [0], [0], [1], [0, 0, 1, 1], [], []>} : vector<10x32xf32>, vector<32x8xf32>, vector<10x8xf32> -> vector<10x8xf32>
    %c0_22 = arith.constant 0 : index
    %c0_23 = arith.constant 0 : index
    %c0_24 = arith.constant 0 : index
    %21 = vector.load %arg8[%c0_22, %c0_23, %c0_24] : memref<4x1x8xf32, #tpu.memory_space<vmem>>, vector<1x1x8xf32>
    %22 = vector.shape_cast %21 : vector<1x1x8xf32> to vector<1x8xf32>
    %23 = vector.broadcast %22 : vector<1x8xf32> to vector<10x8xf32>
    %24 = arith.addf %20, %23 : vector<10x8xf32>
    %cst_25 = arith.constant dense<0.000000e+00> : vector<10x10xf32>
    %25 = tpu.matmul %10, %17, %cst_25 {dimension_numbers = #tpu.dot_dimension_numbers<[1], [1], [0], [0], [0, 0, 1, 0], [], []>} : vector<10x8xf32>, vector<10x8xf32>, vector<10x10xf32> -> vector<10x10xf32>
    %cst_26 = arith.constant 0.353553385 : f32
    %26 = vector.broadcast %cst_26 : f32 to vector<10x10xf32>
    %27 = arith.mulf %25, %26 : vector<10x10xf32>
    %cst_27 = arith.constant dense<0xFF800000> : vector<10xf32>
    %28 = vector.multi_reduction <maximumf>, %27, %cst_27 [1] : vector<10x10xf32> to vector<10xf32>
    %29 = vector.shape_cast %28 : vector<10xf32> to vector<10x1xf32>
    %30 = vector.broadcast %29 : vector<10x1xf32> to vector<10x10xf32>
    %31 = arith.subf %27, %30 : vector<10x10xf32>
    %32 = math.exp %31 : vector<10x10xf32>
    %cst_28 = arith.constant dense<0.000000e+00> : vector<10xf32>
    %33 = vector.multi_reduction <add>, %32, %cst_28 [1] : vector<10x10xf32> to vector<10xf32>
    %34 = vector.shape_cast %33 : vector<10xf32> to vector<10x1xf32>
    %35 = tpu.reciprocal %34 {approx = true} : vector<10x1xf32> -> vector<10x1xf32>
    %36 = vector.broadcast %35 : vector<10x1xf32> to vector<10x10xf32>
    %37 = arith.mulf %32, %36 : vector<10x10xf32>
    %cst_29 = arith.constant dense<0.000000e+00> : vector<10x8xf32>
    %38 = tpu.matmul %37, %24, %cst_29 {dimension_numbers = #tpu.dot_dimension_numbers<[1], [0], [0], [1], [0, 0, 1, 1], [], []>} : vector<10x10xf32>, vector<10x8xf32>, vector<10x8xf32> -> vector<10x8xf32>
    %c0_30 = arith.constant 0 : index
    %c0_31 = arith.constant 0 : index
    %c0_32 = arith.constant 0 : index
    %39 = vector.load %arg9[%c0_30, %c0_31, %c0_32] : memref<4x8x32xf32, #tpu.memory_space<vmem>>, vector<1x8x32xf32>
    %40 = vector.shape_cast %39 : vector<1x8x32xf32> to vector<8x32xf32>
    %cst_33 = arith.constant dense<0.000000e+00> : vector<10x32xf32>
    %41 = tpu.matmul %38, %40, %cst_33 {dimension_numbers = #tpu.dot_dimension_numbers<[1], [0], [0], [1], [0, 0, 1, 1], [], []>} : vector<10x8xf32>, vector<8x32xf32>, vector<10x32xf32> -> vector<10x32xf32>
    %c1 = arith.constant 1 : index
    %c0_34 = arith.constant 0 : index
    %c0_35 = arith.constant 0 : index
    %42 = vector.load %arg3[%c1, %c0_34, %c0_35] : memref<4x32x8xf32, #tpu.memory_space<vmem>>, vector<1x32x8xf32>
    %43 = vector.shape_cast %42 : vector<1x32x8xf32> to vector<32x8xf32>
    %cst_36 = arith.constant dense<0.000000e+00> : vector<10x8xf32>
    %44 = tpu.matmul %1, %43, %cst_36 {dimension_numbers = #tpu.dot_dimension_numbers<[1], [0], [0], [1], [0, 0, 1, 1], [], []>} : vector<10x32xf32>, vector<32x8xf32>, vector<10x8xf32> -> vector<10x8xf32>
    %c1_37 = arith.constant 1 : index
    %c0_38 = arith.constant 0 : index
    %c0_39 = arith.constant 0 : index
    %45 = vector.load %arg4[%c1_37, %c0_38, %c0_39] : memref<4x1x8xf32, #tpu.memory_space<vmem>>, vector<1x1x8xf32>
    %46 = vector.shape_cast %45 : vector<1x1x8xf32> to vector<1x8xf32>
    %47 = vector.broadcast %46 : vector<1x8xf32> to vector<10x8xf32>
    %48 = arith.addf %44, %47 : vector<10x8xf32>
    %c1_40 = arith.constant 1 : index
    %c0_41 = arith.constant 0 : index
    %c0_42 = arith.constant 0 : index
    %49 = vector.load %arg5[%c1_40, %c0_41, %c0_42] : memref<4x32x8xf32, #tpu.memory_space<vmem>>, vector<1x32x8xf32>
    %50 = vector.shape_cast %49 : vector<1x32x8xf32> to vector<32x8xf32>
    %cst_43 = arith.constant dense<0.000000e+00> : vector<10x8xf32>
    %51 = tpu.matmul %1, %50, %cst_43 {dimension_numbers = #tpu.dot_dimension_numbers<[1], [0], [0], [1], [0, 0, 1, 1], [], []>} : vector<10x32xf32>, vector<32x8xf32>, vector<10x8xf32> -> vector<10x8xf32>
    %c1_44 = arith.constant 1 : index
    %c0_45 = arith.constant 0 : index
    %c0_46 = arith.constant 0 : index
    %52 = vector.load %arg6[%c1_44, %c0_45, %c0_46] : memref<4x1x8xf32, #tpu.memory_space<vmem>>, vector<1x1x8xf32>
    %53 = vector.shape_cast %52 : vector<1x1x8xf32> to vector<1x8xf32>
    %54 = vector.broadcast %53 : vector<1x8xf32> to vector<10x8xf32>
    %55 = arith.addf %51, %54 : vector<10x8xf32>
    %c1_47 = arith.constant 1 : index
    %c0_48 = arith.constant 0 : index
    %c0_49 = arith.constant 0 : index
    %56 = vector.load %arg7[%c1_47, %c0_48, %c0_49] : memref<4x32x8xf32, #tpu.memory_space<vmem>>, vector<1x32x8xf32>
    %57 = vector.shape_cast %56 : vector<1x32x8xf32> to vector<32x8xf32>
    %cst_50 = arith.constant dense<0.000000e+00> : vector<10x8xf32>
    %58 = tpu.matmul %1, %57, %cst_50 {dimension_numbers = #tpu.dot_dimension_numbers<[1], [0], [0], [1], [0, 0, 1, 1], [], []>} : vector<10x32xf32>, vector<32x8xf32>, vector<10x8xf32> -> vector<10x8xf32>
    %c1_51 = arith.constant 1 : index
    %c0_52 = arith.constant 0 : index
    %c0_53 = arith.constant 0 : index
    %59 = vector.load %arg8[%c1_51, %c0_52, %c0_53] : memref<4x1x8xf32, #tpu.memory_space<vmem>>, vector<1x1x8xf32>
    %60 = vector.shape_cast %59 : vector<1x1x8xf32> to vector<1x8xf32>
    %61 = vector.broadcast %60 : vector<1x8xf32> to vector<10x8xf32>
    %62 = arith.addf %58, %61 : vector<10x8xf32>
    %cst_54 = arith.constant dense<0.000000e+00> : vector<10x10xf32>
    %63 = tpu.matmul %48, %55, %cst_54 {dimension_numbers = #tpu.dot_dimension_numbers<[1], [1], [0], [0], [0, 0, 1, 0], [], []>} : vector<10x8xf32>, vector<10x8xf32>, vector<10x10xf32> -> vector<10x10xf32>
    %cst_55 = arith.constant 0.353553385 : f32
    %64 = vector.broadcast %cst_55 : f32 to vector<10x10xf32>
    %65 = arith.mulf %63, %64 : vector<10x10xf32>
    %cst_56 = arith.constant dense<0xFF800000> : vector<10xf32>
    %66 = vector.multi_reduction <maximumf>, %65, %cst_56 [1] : vector<10x10xf32> to vector<10xf32>
    %67 = vector.shape_cast %66 : vector<10xf32> to vector<10x1xf32>
    %68 = vector.broadcast %67 : vector<10x1xf32> to vector<10x10xf32>
    %69 = arith.subf %65, %68 : vector<10x10xf32>
    %70 = math.exp %69 : vector<10x10xf32>
    %cst_57 = arith.constant dense<0.000000e+00> : vector<10xf32>
    %71 = vector.multi_reduction <add>, %70, %cst_57 [1] : vector<10x10xf32> to vector<10xf32>
    %72 = vector.shape_cast %71 : vector<10xf32> to vector<10x1xf32>
    %73 = tpu.reciprocal %72 {approx = true} : vector<10x1xf32> -> vector<10x1xf32>
    %74 = vector.broadcast %73 : vector<10x1xf32> to vector<10x10xf32>
    %75 = arith.mulf %70, %74 : vector<10x10xf32>
    %cst_58 = arith.constant dense<0.000000e+00> : vector<10x8xf32>
    %76 = tpu.matmul %75, %62, %cst_58 {dimension_numbers = #tpu.dot_dimension_numbers<[1], [0], [0], [1], [0, 0, 1, 1], [], []>} : vector<10x10xf32>, vector<10x8xf32>, vector<10x8xf32> -> vector<10x8xf32>
    %c1_59 = arith.constant 1 : index
    %c0_60 = arith.constant 0 : index
    %c0_61 = arith.constant 0 : index
    %77 = vector.load %arg9[%c1_59, %c0_60, %c0_61] : memref<4x8x32xf32, #tpu.memory_space<vmem>>, vector<1x8x32xf32>
    %78 = vector.shape_cast %77 : vector<1x8x32xf32> to vector<8x32xf32>
    %cst_62 = arith.constant dense<0.000000e+00> : vector<10x32xf32>
    %79 = tpu.matmul %76, %78, %cst_62 {dimension_numbers = #tpu.dot_dimension_numbers<[1], [0], [0], [1], [0, 0, 1, 1], [], []>} : vector<10x8xf32>, vector<8x32xf32>, vector<10x32xf32> -> vector<10x32xf32>
    %80 = arith.addf %41, %79 : vector<10x32xf32>
    %c2 = arith.constant 2 : index
    %c0_63 = arith.constant 0 : index
    %c0_64 = arith.constant 0 : index
    %81 = vector.load %arg3[%c2, %c0_63, %c0_64] : memref<4x32x8xf32, #tpu.memory_space<vmem>>, vector<1x32x8xf32>
    %82 = vector.shape_cast %81 : vector<1x32x8xf32> to vector<32x8xf32>
    %cst_65 = arith.constant dense<0.000000e+00> : vector<10x8xf32>
    %83 = tpu.matmul %1, %82, %cst_65 {dimension_numbers = #tpu.dot_dimension_numbers<[1], [0], [0], [1], [0, 0, 1, 1], [], []>} : vector<10x32xf32>, vector<32x8xf32>, vector<10x8xf32> -> vector<10x8xf32>
    %c2_66 = arith.constant 2 : index
    %c0_67 = arith.constant 0 : index
    %c0_68 = arith.constant 0 : index
    %84 = vector.load %arg4[%c2_66, %c0_67, %c0_68] : memref<4x1x8xf32, #tpu.memory_space<vmem>>, vector<1x1x8xf32>
    %85 = vector.shape_cast %84 : vector<1x1x8xf32> to vector<1x8xf32>
    %86 = vector.broadcast %85 : vector<1x8xf32> to vector<10x8xf32>
    %87 = arith.addf %83, %86 : vector<10x8xf32>
    %c2_69 = arith.constant 2 : index
    %c0_70 = arith.constant 0 : index
    %c0_71 = arith.constant 0 : index
    %88 = vector.load %arg5[%c2_69, %c0_70, %c0_71] : memref<4x32x8xf32, #tpu.memory_space<vmem>>, vector<1x32x8xf32>
    %89 = vector.shape_cast %88 : vector<1x32x8xf32> to vector<32x8xf32>
    %cst_72 = arith.constant dense<0.000000e+00> : vector<10x8xf32>
    %90 = tpu.matmul %1, %89, %cst_72 {dimension_numbers = #tpu.dot_dimension_numbers<[1], [0], [0], [1], [0, 0, 1, 1], [], []>} : vector<10x32xf32>, vector<32x8xf32>, vector<10x8xf32> -> vector<10x8xf32>
    %c2_73 = arith.constant 2 : index
    %c0_74 = arith.constant 0 : index
    %c0_75 = arith.constant 0 : index
    %91 = vector.load %arg6[%c2_73, %c0_74, %c0_75] : memref<4x1x8xf32, #tpu.memory_space<vmem>>, vector<1x1x8xf32>
    %92 = vector.shape_cast %91 : vector<1x1x8xf32> to vector<1x8xf32>
    %93 = vector.broadcast %92 : vector<1x8xf32> to vector<10x8xf32>
    %94 = arith.addf %90, %93 : vector<10x8xf32>
    %c2_76 = arith.constant 2 : index
    %c0_77 = arith.constant 0 : index
    %c0_78 = arith.constant 0 : index
    %95 = vector.load %arg7[%c2_76, %c0_77, %c0_78] : memref<4x32x8xf32, #tpu.memory_space<vmem>>, vector<1x32x8xf32>
    %96 = vector.shape_cast %95 : vector<1x32x8xf32> to vector<32x8xf32>
    %cst_79 = arith.constant dense<0.000000e+00> : vector<10x8xf32>
    %97 = tpu.matmul %1, %96, %cst_79 {dimension_numbers = #tpu.dot_dimension_numbers<[1], [0], [0], [1], [0, 0, 1, 1], [], []>} : vector<10x32xf32>, vector<32x8xf32>, vector<10x8xf32> -> vector<10x8xf32>
    %c2_80 = arith.constant 2 : index
    %c0_81 = arith.constant 0 : index
    %c0_82 = arith.constant 0 : index
    %98 = vector.load %arg8[%c2_80, %c0_81, %c0_82] : memref<4x1x8xf32, #tpu.memory_space<vmem>>, vector<1x1x8xf32>
    %99 = vector.shape_cast %98 : vector<1x1x8xf32> to vector<1x8xf32>
    %100 = vector.broadcast %99 : vector<1x8xf32> to vector<10x8xf32>
    %101 = arith.addf %97, %100 : vector<10x8xf32>
    %cst_83 = arith.constant dense<0.000000e+00> : vector<10x10xf32>
    %102 = tpu.matmul %87, %94, %cst_83 {dimension_numbers = #tpu.dot_dimension_numbers<[1], [1], [0], [0], [0, 0, 1, 0], [], []>} : vector<10x8xf32>, vector<10x8xf32>, vector<10x10xf32> -> vector<10x10xf32>
    %cst_84 = arith.constant 0.353553385 : f32
    %103 = vector.broadcast %cst_84 : f32 to vector<10x10xf32>
    %104 = arith.mulf %102, %103 : vector<10x10xf32>
    %cst_85 = arith.constant dense<0xFF800000> : vector<10xf32>
    %105 = vector.multi_reduction <maximumf>, %104, %cst_85 [1] : vector<10x10xf32> to vector<10xf32>
    %106 = vector.shape_cast %105 : vector<10xf32> to vector<10x1xf32>
    %107 = vector.broadcast %106 : vector<10x1xf32> to vector<10x10xf32>
    %108 = arith.subf %104, %107 : vector<10x10xf32>
    %109 = math.exp %108 : vector<10x10xf32>
    %cst_86 = arith.constant dense<0.000000e+00> : vector<10xf32>
    %110 = vector.multi_reduction <add>, %109, %cst_86 [1] : vector<10x10xf32> to vector<10xf32>
    %111 = vector.shape_cast %110 : vector<10xf32> to vector<10x1xf32>
    %112 = tpu.reciprocal %111 {approx = true} : vector<10x1xf32> -> vector<10x1xf32>
    %113 = vector.broadcast %112 : vector<10x1xf32> to vector<10x10xf32>
    %114 = arith.mulf %109, %113 : vector<10x10xf32>
    %cst_87 = arith.constant dense<0.000000e+00> : vector<10x8xf32>
    %115 = tpu.matmul %114, %101, %cst_87 {dimension_numbers = #tpu.dot_dimension_numbers<[1], [0], [0], [1], [0, 0, 1, 1], [], []>} : vector<10x10xf32>, vector<10x8xf32>, vector<10x8xf32> -> vector<10x8xf32>
    %c2_88 = arith.constant 2 : index
    %c0_89 = arith.constant 0 : index
    %c0_90 = arith.constant 0 : index
    %116 = vector.load %arg9[%c2_88, %c0_89, %c0_90] : memref<4x8x32xf32, #tpu.memory_space<vmem>>, vector<1x8x32xf32>
    %117 = vector.shape_cast %116 : vector<1x8x32xf32> to vector<8x32xf32>
    %cst_91 = arith.constant dense<0.000000e+00> : vector<10x32xf32>
    %118 = tpu.matmul %115, %117, %cst_91 {dimension_numbers = #tpu.dot_dimension_numbers<[1], [0], [0], [1], [0, 0, 1, 1], [], []>} : vector<10x8xf32>, vector<8x32xf32>, vector<10x32xf32> -> vector<10x32xf32>
    %119 = arith.addf %80, %118 : vector<10x32xf32>
    %c3 = arith.constant 3 : index
    %c0_92 = arith.constant 0 : index
    %c0_93 = arith.constant 0 : index
    %120 = vector.load %arg3[%c3, %c0_92, %c0_93] : memref<4x32x8xf32, #tpu.memory_space<vmem>>, vector<1x32x8xf32>
    %121 = vector.shape_cast %120 : vector<1x32x8xf32> to vector<32x8xf32>
    %cst_94 = arith.constant dense<0.000000e+00> : vector<10x8xf32>
    %122 = tpu.matmul %1, %121, %cst_94 {dimension_numbers = #tpu.dot_dimension_numbers<[1], [0], [0], [1], [0, 0, 1, 1], [], []>} : vector<10x32xf32>, vector<32x8xf32>, vector<10x8xf32> -> vector<10x8xf32>
    %c3_95 = arith.constant 3 : index
    %c0_96 = arith.constant 0 : index
    %c0_97 = arith.constant 0 : index
    %123 = vector.load %arg4[%c3_95, %c0_96, %c0_97] : memref<4x1x8xf32, #tpu.memory_space<vmem>>, vector<1x1x8xf32>
    %124 = vector.shape_cast %123 : vector<1x1x8xf32> to vector<1x8xf32>
    %125 = vector.broadcast %124 : vector<1x8xf32> to vector<10x8xf32>
    %126 = arith.addf %122, %125 : vector<10x8xf32>
    %c3_98 = arith.constant 3 : index
    %c0_99 = arith.constant 0 : index
    %c0_100 = arith.constant 0 : index
    %127 = vector.load %arg5[%c3_98, %c0_99, %c0_100] : memref<4x32x8xf32, #tpu.memory_space<vmem>>, vector<1x32x8xf32>
    %128 = vector.shape_cast %127 : vector<1x32x8xf32> to vector<32x8xf32>
    %cst_101 = arith.constant dense<0.000000e+00> : vector<10x8xf32>
    %129 = tpu.matmul %1, %128, %cst_101 {dimension_numbers = #tpu.dot_dimension_numbers<[1], [0], [0], [1], [0, 0, 1, 1], [], []>} : vector<10x32xf32>, vector<32x8xf32>, vector<10x8xf32> -> vector<10x8xf32>
    %c3_102 = arith.constant 3 : index
    %c0_103 = arith.constant 0 : index
    %c0_104 = arith.constant 0 : index
    %130 = vector.load %arg6[%c3_102, %c0_103, %c0_104] : memref<4x1x8xf32, #tpu.memory_space<vmem>>, vector<1x1x8xf32>
    %131 = vector.shape_cast %130 : vector<1x1x8xf32> to vector<1x8xf32>
    %132 = vector.broadcast %131 : vector<1x8xf32> to vector<10x8xf32>
    %133 = arith.addf %129, %132 : vector<10x8xf32>
    %c3_105 = arith.constant 3 : index
    %c0_106 = arith.constant 0 : index
    %c0_107 = arith.constant 0 : index
    %134 = vector.load %arg7[%c3_105, %c0_106, %c0_107] : memref<4x32x8xf32, #tpu.memory_space<vmem>>, vector<1x32x8xf32>
    %135 = vector.shape_cast %134 : vector<1x32x8xf32> to vector<32x8xf32>
    %cst_108 = arith.constant dense<0.000000e+00> : vector<10x8xf32>
    %136 = tpu.matmul %1, %135, %cst_108 {dimension_numbers = #tpu.dot_dimension_numbers<[1], [0], [0], [1], [0, 0, 1, 1], [], []>} : vector<10x32xf32>, vector<32x8xf32>, vector<10x8xf32> -> vector<10x8xf32>
    %c3_109 = arith.constant 3 : index
    %c0_110 = arith.constant 0 : index
    %c0_111 = arith.constant 0 : index
    %137 = vector.load %arg8[%c3_109, %c0_110, %c0_111] : memref<4x1x8xf32, #tpu.memory_space<vmem>>, vector<1x1x8xf32>
    %138 = vector.shape_cast %137 : vector<1x1x8xf32> to vector<1x8xf32>
    %139 = vector.broadcast %138 : vector<1x8xf32> to vector<10x8xf32>
    %140 = arith.addf %136, %139 : vector<10x8xf32>
    %cst_112 = arith.constant dense<0.000000e+00> : vector<10x10xf32>
    %141 = tpu.matmul %126, %133, %cst_112 {dimension_numbers = #tpu.dot_dimension_numbers<[1], [1], [0], [0], [0, 0, 1, 0], [], []>} : vector<10x8xf32>, vector<10x8xf32>, vector<10x10xf32> -> vector<10x10xf32>
    %cst_113 = arith.constant 0.353553385 : f32
    %142 = vector.broadcast %cst_113 : f32 to vector<10x10xf32>
    %143 = arith.mulf %141, %142 : vector<10x10xf32>
    %cst_114 = arith.constant dense<0xFF800000> : vector<10xf32>
    %144 = vector.multi_reduction <maximumf>, %143, %cst_114 [1] : vector<10x10xf32> to vector<10xf32>
    %145 = vector.shape_cast %144 : vector<10xf32> to vector<10x1xf32>
    %146 = vector.broadcast %145 : vector<10x1xf32> to vector<10x10xf32>
    %147 = arith.subf %143, %146 : vector<10x10xf32>
    %148 = math.exp %147 : vector<10x10xf32>
    %cst_115 = arith.constant dense<0.000000e+00> : vector<10xf32>
    %149 = vector.multi_reduction <add>, %148, %cst_115 [1] : vector<10x10xf32> to vector<10xf32>
    %150 = vector.shape_cast %149 : vector<10xf32> to vector<10x1xf32>
    %151 = tpu.reciprocal %150 {approx = true} : vector<10x1xf32> -> vector<10x1xf32>
    %152 = vector.broadcast %151 : vector<10x1xf32> to vector<10x10xf32>
    %153 = arith.mulf %148, %152 : vector<10x10xf32>
    %cst_116 = arith.constant dense<0.000000e+00> : vector<10x8xf32>
    %154 = tpu.matmul %153, %140, %cst_116 {dimension_numbers = #tpu.dot_dimension_numbers<[1], [0], [0], [1], [0, 0, 1, 1], [], []>} : vector<10x10xf32>, vector<10x8xf32>, vector<10x8xf32> -> vector<10x8xf32>
    %c3_117 = arith.constant 3 : index
    %c0_118 = arith.constant 0 : index
    %c0_119 = arith.constant 0 : index
    %155 = vector.load %arg9[%c3_117, %c0_118, %c0_119] : memref<4x8x32xf32, #tpu.memory_space<vmem>>, vector<1x8x32xf32>
    %156 = vector.shape_cast %155 : vector<1x8x32xf32> to vector<8x32xf32>
    %cst_120 = arith.constant dense<0.000000e+00> : vector<10x32xf32>
    %157 = tpu.matmul %154, %156, %cst_120 {dimension_numbers = #tpu.dot_dimension_numbers<[1], [0], [0], [1], [0, 0, 1, 1], [], []>} : vector<10x8xf32>, vector<8x32xf32>, vector<10x32xf32> -> vector<10x32xf32>
    %158 = arith.addf %119, %157 : vector<10x32xf32>
    %c0_121 = arith.constant 0 : index
    %c0_122 = arith.constant 0 : index
    %159 = vector.load %arg10[%c0_121, %c0_122] : memref<1x32xf32, #tpu.memory_space<vmem>>, vector<1x32xf32>
    %160 = vector.broadcast %159 : vector<1x32xf32> to vector<10x32xf32>
    %161 = arith.addf %158, %160 : vector<10x32xf32>
    %162 = arith.addf %1, %161 : vector<10x32xf32>
    %c0_123 = arith.constant 0 : index
    %c0_124 = arith.constant 0 : index
    %163 = vector.load %arg11[%c0_123, %c0_124] : memref<1x32xf32, #tpu.memory_space<vmem>>, vector<1x32xf32>
    %c0_125 = arith.constant 0 : index
    %c0_126 = arith.constant 0 : index
    %164 = vector.load %arg12[%c0_125, %c0_126] : memref<1x32xf32, #tpu.memory_space<vmem>>, vector<1x32xf32>
    %cst_127 = arith.constant dense<0.000000e+00> : vector<10xf32>
    %165 = vector.multi_reduction <add>, %162, %cst_127 [1] : vector<10x32xf32> to vector<10xf32>
    %166 = vector.shape_cast %165 : vector<10xf32> to vector<10x1xf32>
    %cst_128 = arith.constant 3.200000e+01 : f32
    %167 = vector.broadcast %cst_128 : f32 to vector<10x1xf32>
    %168 = arith.divf %166, %167 : vector<10x1xf32>
    %169 = vector.broadcast %168 : vector<10x1xf32> to vector<10x32xf32>
    %170 = arith.subf %162, %169 : vector<10x32xf32>
    %171 = arith.mulf %170, %170 : vector<10x32xf32>
    %cst_129 = arith.constant dense<0.000000e+00> : vector<10xf32>
    %172 = vector.multi_reduction <add>, %171, %cst_129 [1] : vector<10x32xf32> to vector<10xf32>
    %173 = vector.shape_cast %172 : vector<10xf32> to vector<10x1xf32>
    %cst_130 = arith.constant 3.200000e+01 : f32
    %174 = vector.broadcast %cst_130 : f32 to vector<10x1xf32>
    %175 = arith.divf %173, %174 : vector<10x1xf32>
    %176 = vector.broadcast %168 : vector<10x1xf32> to vector<10x32xf32>
    %177 = arith.subf %162, %176 : vector<10x32xf32>
    %cst_131 = arith.constant 9.99999974E-6 : f32
    %178 = vector.broadcast %cst_131 : f32 to vector<10x1xf32>
    %179 = arith.addf %175, %178 : vector<10x1xf32>
    %180 = math.rsqrt %179 : vector<10x1xf32>
    %181 = vector.broadcast %180 : vector<10x1xf32> to vector<10x32xf32>
    %182 = arith.mulf %177, %181 : vector<10x32xf32>
    %183 = vector.broadcast %163 : vector<1x32xf32> to vector<10x32xf32>
    %184 = arith.mulf %182, %183 : vector<10x32xf32>
    %185 = vector.broadcast %164 : vector<1x32xf32> to vector<10x32xf32>
    %186 = arith.addf %184, %185 : vector<10x32xf32>
    %c0_132 = arith.constant 0 : index
    %c0_133 = arith.constant 0 : index
    %c0_134 = arith.constant 0 : index
    %187 = vector.load %arg13[%c0_132, %c0_133, %c0_134] : memref<4x32x8xf32, #tpu.memory_space<vmem>>, vector<1x32x8xf32>
    %188 = vector.shape_cast %187 : vector<1x32x8xf32> to vector<32x8xf32>
    %cst_135 = arith.constant dense<0.000000e+00> : vector<10x8xf32>
    %189 = tpu.matmul %186, %188, %cst_135 {dimension_numbers = #tpu.dot_dimension_numbers<[1], [0], [0], [1], [0, 0, 1, 1], [], []>} : vector<10x32xf32>, vector<32x8xf32>, vector<10x8xf32> -> vector<10x8xf32>
    %c0_136 = arith.constant 0 : index
    %c0_137 = arith.constant 0 : index
    %c0_138 = arith.constant 0 : index
    %190 = vector.load %arg14[%c0_136, %c0_137, %c0_138] : memref<4x1x8xf32, #tpu.memory_space<vmem>>, vector<1x1x8xf32>
    %191 = vector.shape_cast %190 : vector<1x1x8xf32> to vector<1x8xf32>
    %192 = vector.broadcast %191 : vector<1x8xf32> to vector<10x8xf32>
    %193 = arith.addf %189, %192 : vector<10x8xf32>
    %c0_139 = arith.constant 0 : index
    %c0_140 = arith.constant 0 : index
    %c0_141 = arith.constant 0 : index
    %194 = vector.load %arg15[%c0_139, %c0_140, %c0_141] : memref<4x32x8xf32, #tpu.memory_space<vmem>>, vector<1x32x8xf32>
    %195 = vector.shape_cast %194 : vector<1x32x8xf32> to vector<32x8xf32>
    %cst_142 = arith.constant dense<0.000000e+00> : vector<8x8xf32>
    %196 = tpu.matmul %3, %195, %cst_142 {dimension_numbers = #tpu.dot_dimension_numbers<[1], [0], [0], [1], [0, 0, 1, 1], [], []>} : vector<8x32xf32>, vector<32x8xf32>, vector<8x8xf32> -> vector<8x8xf32>
    %c0_143 = arith.constant 0 : index
    %c0_144 = arith.constant 0 : index
    %c0_145 = arith.constant 0 : index
    %197 = vector.load %arg16[%c0_143, %c0_144, %c0_145] : memref<4x1x8xf32, #tpu.memory_space<vmem>>, vector<1x1x8xf32>
    %198 = vector.shape_cast %197 : vector<1x1x8xf32> to vector<1x8xf32>
    %199 = vector.broadcast %198 : vector<1x8xf32> to vector<8x8xf32>
    %200 = arith.addf %196, %199 : vector<8x8xf32>
    %c0_146 = arith.constant 0 : index
    %c0_147 = arith.constant 0 : index
    %c0_148 = arith.constant 0 : index
    %201 = vector.load %arg17[%c0_146, %c0_147, %c0_148] : memref<4x32x8xf32, #tpu.memory_space<vmem>>, vector<1x32x8xf32>
    %202 = vector.shape_cast %201 : vector<1x32x8xf32> to vector<32x8xf32>
    %cst_149 = arith.constant dense<0.000000e+00> : vector<8x8xf32>
    %203 = tpu.matmul %3, %202, %cst_149 {dimension_numbers = #tpu.dot_dimension_numbers<[1], [0], [0], [1], [0, 0, 1, 1], [], []>} : vector<8x32xf32>, vector<32x8xf32>, vector<8x8xf32> -> vector<8x8xf32>
    %c0_150 = arith.constant 0 : index
    %c0_151 = arith.constant 0 : index
    %c0_152 = arith.constant 0 : index
    %204 = vector.load %arg18[%c0_150, %c0_151, %c0_152] : memref<4x1x8xf32, #tpu.memory_space<vmem>>, vector<1x1x8xf32>
    %205 = vector.shape_cast %204 : vector<1x1x8xf32> to vector<1x8xf32>
    %206 = vector.broadcast %205 : vector<1x8xf32> to vector<8x8xf32>
    %207 = arith.addf %203, %206 : vector<8x8xf32>
    %cst_153 = arith.constant dense<0.000000e+00> : vector<10x8xf32>
    %208 = tpu.matmul %193, %200, %cst_153 {dimension_numbers = #tpu.dot_dimension_numbers<[1], [1], [0], [0], [0, 0, 1, 0], [], []>} : vector<10x8xf32>, vector<8x8xf32>, vector<10x8xf32> -> vector<10x8xf32>
    %cst_154 = arith.constant 0.353553385 : f32
    %209 = vector.broadcast %cst_154 : f32 to vector<10x8xf32>
    %210 = arith.mulf %208, %209 : vector<10x8xf32>
    %cst_155 = arith.constant dense<0xFF800000> : vector<10xf32>
    %211 = vector.multi_reduction <maximumf>, %210, %cst_155 [1] : vector<10x8xf32> to vector<10xf32>
    %212 = vector.shape_cast %211 : vector<10xf32> to vector<10x1xf32>
    %213 = vector.broadcast %212 : vector<10x1xf32> to vector<10x8xf32>
    %214 = arith.subf %210, %213 : vector<10x8xf32>
    %215 = math.exp %214 : vector<10x8xf32>
    %cst_156 = arith.constant dense<0.000000e+00> : vector<10xf32>
    %216 = vector.multi_reduction <add>, %215, %cst_156 [1] : vector<10x8xf32> to vector<10xf32>
    %217 = vector.shape_cast %216 : vector<10xf32> to vector<10x1xf32>
    %218 = tpu.reciprocal %217 {approx = true} : vector<10x1xf32> -> vector<10x1xf32>
    %219 = vector.broadcast %218 : vector<10x1xf32> to vector<10x8xf32>
    %220 = arith.mulf %215, %219 : vector<10x8xf32>
    %cst_157 = arith.constant dense<0.000000e+00> : vector<10x8xf32>
    %221 = tpu.matmul %220, %207, %cst_157 {dimension_numbers = #tpu.dot_dimension_numbers<[1], [0], [0], [1], [0, 0, 1, 1], [], []>} : vector<10x8xf32>, vector<8x8xf32>, vector<10x8xf32> -> vector<10x8xf32>
    %c0_158 = arith.constant 0 : index
    %c0_159 = arith.constant 0 : index
    %c0_160 = arith.constant 0 : index
    %222 = vector.load %arg19[%c0_158, %c0_159, %c0_160] : memref<4x8x32xf32, #tpu.memory_space<vmem>>, vector<1x8x32xf32>
    %223 = vector.shape_cast %222 : vector<1x8x32xf32> to vector<8x32xf32>
    %cst_161 = arith.constant dense<0.000000e+00> : vector<10x32xf32>
    %224 = tpu.matmul %221, %223, %cst_161 {dimension_numbers = #tpu.dot_dimension_numbers<[1], [0], [0], [1], [0, 0, 1, 1], [], []>} : vector<10x8xf32>, vector<8x32xf32>, vector<10x32xf32> -> vector<10x32xf32>
    %c1_162 = arith.constant 1 : index
    %c0_163 = arith.constant 0 : index
    %c0_164 = arith.constant 0 : index
    %225 = vector.load %arg13[%c1_162, %c0_163, %c0_164] : memref<4x32x8xf32, #tpu.memory_space<vmem>>, vector<1x32x8xf32>
    %226 = vector.shape_cast %225 : vector<1x32x8xf32> to vector<32x8xf32>
    %cst_165 = arith.constant dense<0.000000e+00> : vector<10x8xf32>
    %227 = tpu.matmul %186, %226, %cst_165 {dimension_numbers = #tpu.dot_dimension_numbers<[1], [0], [0], [1], [0, 0, 1, 1], [], []>} : vector<10x32xf32>, vector<32x8xf32>, vector<10x8xf32> -> vector<10x8xf32>
    %c1_166 = arith.constant 1 : index
    %c0_167 = arith.constant 0 : index
    %c0_168 = arith.constant 0 : index
    %228 = vector.load %arg14[%c1_166, %c0_167, %c0_168] : memref<4x1x8xf32, #tpu.memory_space<vmem>>, vector<1x1x8xf32>
    %229 = vector.shape_cast %228 : vector<1x1x8xf32> to vector<1x8xf32>
    %230 = vector.broadcast %229 : vector<1x8xf32> to vector<10x8xf32>
    %231 = arith.addf %227, %230 : vector<10x8xf32>
    %c1_169 = arith.constant 1 : index
    %c0_170 = arith.constant 0 : index
    %c0_171 = arith.constant 0 : index
    %232 = vector.load %arg15[%c1_169, %c0_170, %c0_171] : memref<4x32x8xf32, #tpu.memory_space<vmem>>, vector<1x32x8xf32>
    %233 = vector.shape_cast %232 : vector<1x32x8xf32> to vector<32x8xf32>
    %cst_172 = arith.constant dense<0.000000e+00> : vector<8x8xf32>
    %234 = tpu.matmul %3, %233, %cst_172 {dimension_numbers = #tpu.dot_dimension_numbers<[1], [0], [0], [1], [0, 0, 1, 1], [], []>} : vector<8x32xf32>, vector<32x8xf32>, vector<8x8xf32> -> vector<8x8xf32>
    %c1_173 = arith.constant 1 : index
    %c0_174 = arith.constant 0 : index
    %c0_175 = arith.constant 0 : index
    %235 = vector.load %arg16[%c1_173, %c0_174, %c0_175] : memref<4x1x8xf32, #tpu.memory_space<vmem>>, vector<1x1x8xf32>
    %236 = vector.shape_cast %235 : vector<1x1x8xf32> to vector<1x8xf32>
    %237 = vector.broadcast %236 : vector<1x8xf32> to vector<8x8xf32>
    %238 = arith.addf %234, %237 : vector<8x8xf32>
    %c1_176 = arith.constant 1 : index
    %c0_177 = arith.constant 0 : index
    %c0_178 = arith.constant 0 : index
    %239 = vector.load %arg17[%c1_176, %c0_177, %c0_178] : memref<4x32x8xf32, #tpu.memory_space<vmem>>, vector<1x32x8xf32>
    %240 = vector.shape_cast %239 : vector<1x32x8xf32> to vector<32x8xf32>
    %cst_179 = arith.constant dense<0.000000e+00> : vector<8x8xf32>
    %241 = tpu.matmul %3, %240, %cst_179 {dimension_numbers = #tpu.dot_dimension_numbers<[1], [0], [0], [1], [0, 0, 1, 1], [], []>} : vector<8x32xf32>, vector<32x8xf32>, vector<8x8xf32> -> vector<8x8xf32>
    %c1_180 = arith.constant 1 : index
    %c0_181 = arith.constant 0 : index
    %c0_182 = arith.constant 0 : index
    %242 = vector.load %arg18[%c1_180, %c0_181, %c0_182] : memref<4x1x8xf32, #tpu.memory_space<vmem>>, vector<1x1x8xf32>
    %243 = vector.shape_cast %242 : vector<1x1x8xf32> to vector<1x8xf32>
    %244 = vector.broadcast %243 : vector<1x8xf32> to vector<8x8xf32>
    %245 = arith.addf %241, %244 : vector<8x8xf32>
    %cst_183 = arith.constant dense<0.000000e+00> : vector<10x8xf32>
    %246 = tpu.matmul %231, %238, %cst_183 {dimension_numbers = #tpu.dot_dimension_numbers<[1], [1], [0], [0], [0, 0, 1, 0], [], []>} : vector<10x8xf32>, vector<8x8xf32>, vector<10x8xf32> -> vector<10x8xf32>
    %cst_184 = arith.constant 0.353553385 : f32
    %247 = vector.broadcast %cst_184 : f32 to vector<10x8xf32>
    %248 = arith.mulf %246, %247 : vector<10x8xf32>
    %cst_185 = arith.constant dense<0xFF800000> : vector<10xf32>
    %249 = vector.multi_reduction <maximumf>, %248, %cst_185 [1] : vector<10x8xf32> to vector<10xf32>
    %250 = vector.shape_cast %249 : vector<10xf32> to vector<10x1xf32>
    %251 = vector.broadcast %250 : vector<10x1xf32> to vector<10x8xf32>
    %252 = arith.subf %248, %251 : vector<10x8xf32>
    %253 = math.exp %252 : vector<10x8xf32>
    %cst_186 = arith.constant dense<0.000000e+00> : vector<10xf32>
    %254 = vector.multi_reduction <add>, %253, %cst_186 [1] : vector<10x8xf32> to vector<10xf32>
    %255 = vector.shape_cast %254 : vector<10xf32> to vector<10x1xf32>
    %256 = tpu.reciprocal %255 {approx = true} : vector<10x1xf32> -> vector<10x1xf32>
    %257 = vector.broadcast %256 : vector<10x1xf32> to vector<10x8xf32>
    %258 = arith.mulf %253, %257 : vector<10x8xf32>
    %cst_187 = arith.constant dense<0.000000e+00> : vector<10x8xf32>
    %259 = tpu.matmul %258, %245, %cst_187 {dimension_numbers = #tpu.dot_dimension_numbers<[1], [0], [0], [1], [0, 0, 1, 1], [], []>} : vector<10x8xf32>, vector<8x8xf32>, vector<10x8xf32> -> vector<10x8xf32>
    %c1_188 = arith.constant 1 : index
    %c0_189 = arith.constant 0 : index
    %c0_190 = arith.constant 0 : index
    %260 = vector.load %arg19[%c1_188, %c0_189, %c0_190] : memref<4x8x32xf32, #tpu.memory_space<vmem>>, vector<1x8x32xf32>
    %261 = vector.shape_cast %260 : vector<1x8x32xf32> to vector<8x32xf32>
    %cst_191 = arith.constant dense<0.000000e+00> : vector<10x32xf32>
    %262 = tpu.matmul %259, %261, %cst_191 {dimension_numbers = #tpu.dot_dimension_numbers<[1], [0], [0], [1], [0, 0, 1, 1], [], []>} : vector<10x8xf32>, vector<8x32xf32>, vector<10x32xf32> -> vector<10x32xf32>
    %263 = arith.addf %224, %262 : vector<10x32xf32>
    %c2_192 = arith.constant 2 : index
    %c0_193 = arith.constant 0 : index
    %c0_194 = arith.constant 0 : index
    %264 = vector.load %arg13[%c2_192, %c0_193, %c0_194] : memref<4x32x8xf32, #tpu.memory_space<vmem>>, vector<1x32x8xf32>
    %265 = vector.shape_cast %264 : vector<1x32x8xf32> to vector<32x8xf32>
    %cst_195 = arith.constant dense<0.000000e+00> : vector<10x8xf32>
    %266 = tpu.matmul %186, %265, %cst_195 {dimension_numbers = #tpu.dot_dimension_numbers<[1], [0], [0], [1], [0, 0, 1, 1], [], []>} : vector<10x32xf32>, vector<32x8xf32>, vector<10x8xf32> -> vector<10x8xf32>
    %c2_196 = arith.constant 2 : index
    %c0_197 = arith.constant 0 : index
    %c0_198 = arith.constant 0 : index
    %267 = vector.load %arg14[%c2_196, %c0_197, %c0_198] : memref<4x1x8xf32, #tpu.memory_space<vmem>>, vector<1x1x8xf32>
    %268 = vector.shape_cast %267 : vector<1x1x8xf32> to vector<1x8xf32>
    %269 = vector.broadcast %268 : vector<1x8xf32> to vector<10x8xf32>
    %270 = arith.addf %266, %269 : vector<10x8xf32>
    %c2_199 = arith.constant 2 : index
    %c0_200 = arith.constant 0 : index
    %c0_201 = arith.constant 0 : index
    %271 = vector.load %arg15[%c2_199, %c0_200, %c0_201] : memref<4x32x8xf32, #tpu.memory_space<vmem>>, vector<1x32x8xf32>
    %272 = vector.shape_cast %271 : vector<1x32x8xf32> to vector<32x8xf32>
    %cst_202 = arith.constant dense<0.000000e+00> : vector<8x8xf32>
    %273 = tpu.matmul %3, %272, %cst_202 {dimension_numbers = #tpu.dot_dimension_numbers<[1], [0], [0], [1], [0, 0, 1, 1], [], []>} : vector<8x32xf32>, vector<32x8xf32>, vector<8x8xf32> -> vector<8x8xf32>
    %c2_203 = arith.constant 2 : index
    %c0_204 = arith.constant 0 : index
    %c0_205 = arith.constant 0 : index
    %274 = vector.load %arg16[%c2_203, %c0_204, %c0_205] : memref<4x1x8xf32, #tpu.memory_space<vmem>>, vector<1x1x8xf32>
    %275 = vector.shape_cast %274 : vector<1x1x8xf32> to vector<1x8xf32>
    %276 = vector.broadcast %275 : vector<1x8xf32> to vector<8x8xf32>
    %277 = arith.addf %273, %276 : vector<8x8xf32>
    %c2_206 = arith.constant 2 : index
    %c0_207 = arith.constant 0 : index
    %c0_208 = arith.constant 0 : index
    %278 = vector.load %arg17[%c2_206, %c0_207, %c0_208] : memref<4x32x8xf32, #tpu.memory_space<vmem>>, vector<1x32x8xf32>
    %279 = vector.shape_cast %278 : vector<1x32x8xf32> to vector<32x8xf32>
    %cst_209 = arith.constant dense<0.000000e+00> : vector<8x8xf32>
    %280 = tpu.matmul %3, %279, %cst_209 {dimension_numbers = #tpu.dot_dimension_numbers<[1], [0], [0], [1], [0, 0, 1, 1], [], []>} : vector<8x32xf32>, vector<32x8xf32>, vector<8x8xf32> -> vector<8x8xf32>
    %c2_210 = arith.constant 2 : index
    %c0_211 = arith.constant 0 : index
    %c0_212 = arith.constant 0 : index
    %281 = vector.load %arg18[%c2_210, %c0_211, %c0_212] : memref<4x1x8xf32, #tpu.memory_space<vmem>>, vector<1x1x8xf32>
    %282 = vector.shape_cast %281 : vector<1x1x8xf32> to vector<1x8xf32>
    %283 = vector.broadcast %282 : vector<1x8xf32> to vector<8x8xf32>
    %284 = arith.addf %280, %283 : vector<8x8xf32>
    %cst_213 = arith.constant dense<0.000000e+00> : vector<10x8xf32>
    %285 = tpu.matmul %270, %277, %cst_213 {dimension_numbers = #tpu.dot_dimension_numbers<[1], [1], [0], [0], [0, 0, 1, 0], [], []>} : vector<10x8xf32>, vector<8x8xf32>, vector<10x8xf32> -> vector<10x8xf32>
    %cst_214 = arith.constant 0.353553385 : f32
    %286 = vector.broadcast %cst_214 : f32 to vector<10x8xf32>
    %287 = arith.mulf %285, %286 : vector<10x8xf32>
    %cst_215 = arith.constant dense<0xFF800000> : vector<10xf32>
    %288 = vector.multi_reduction <maximumf>, %287, %cst_215 [1] : vector<10x8xf32> to vector<10xf32>
    %289 = vector.shape_cast %288 : vector<10xf32> to vector<10x1xf32>
    %290 = vector.broadcast %289 : vector<10x1xf32> to vector<10x8xf32>
    %291 = arith.subf %287, %290 : vector<10x8xf32>
    %292 = math.exp %291 : vector<10x8xf32>
    %cst_216 = arith.constant dense<0.000000e+00> : vector<10xf32>
    %293 = vector.multi_reduction <add>, %292, %cst_216 [1] : vector<10x8xf32> to vector<10xf32>
    %294 = vector.shape_cast %293 : vector<10xf32> to vector<10x1xf32>
    %295 = tpu.reciprocal %294 {approx = true} : vector<10x1xf32> -> vector<10x1xf32>
    %296 = vector.broadcast %295 : vector<10x1xf32> to vector<10x8xf32>
    %297 = arith.mulf %292, %296 : vector<10x8xf32>
    %cst_217 = arith.constant dense<0.000000e+00> : vector<10x8xf32>
    %298 = tpu.matmul %297, %284, %cst_217 {dimension_numbers = #tpu.dot_dimension_numbers<[1], [0], [0], [1], [0, 0, 1, 1], [], []>} : vector<10x8xf32>, vector<8x8xf32>, vector<10x8xf32> -> vector<10x8xf32>
    %c2_218 = arith.constant 2 : index
    %c0_219 = arith.constant 0 : index
    %c0_220 = arith.constant 0 : index
    %299 = vector.load %arg19[%c2_218, %c0_219, %c0_220] : memref<4x8x32xf32, #tpu.memory_space<vmem>>, vector<1x8x32xf32>
    %300 = vector.shape_cast %299 : vector<1x8x32xf32> to vector<8x32xf32>
    %cst_221 = arith.constant dense<0.000000e+00> : vector<10x32xf32>
    %301 = tpu.matmul %298, %300, %cst_221 {dimension_numbers = #tpu.dot_dimension_numbers<[1], [0], [0], [1], [0, 0, 1, 1], [], []>} : vector<10x8xf32>, vector<8x32xf32>, vector<10x32xf32> -> vector<10x32xf32>
    %302 = arith.addf %263, %301 : vector<10x32xf32>
    %c3_222 = arith.constant 3 : index
    %c0_223 = arith.constant 0 : index
    %c0_224 = arith.constant 0 : index
    %303 = vector.load %arg13[%c3_222, %c0_223, %c0_224] : memref<4x32x8xf32, #tpu.memory_space<vmem>>, vector<1x32x8xf32>
    %304 = vector.shape_cast %303 : vector<1x32x8xf32> to vector<32x8xf32>
    %cst_225 = arith.constant dense<0.000000e+00> : vector<10x8xf32>
    %305 = tpu.matmul %186, %304, %cst_225 {dimension_numbers = #tpu.dot_dimension_numbers<[1], [0], [0], [1], [0, 0, 1, 1], [], []>} : vector<10x32xf32>, vector<32x8xf32>, vector<10x8xf32> -> vector<10x8xf32>
    %c3_226 = arith.constant 3 : index
    %c0_227 = arith.constant 0 : index
    %c0_228 = arith.constant 0 : index
    %306 = vector.load %arg14[%c3_226, %c0_227, %c0_228] : memref<4x1x8xf32, #tpu.memory_space<vmem>>, vector<1x1x8xf32>
    %307 = vector.shape_cast %306 : vector<1x1x8xf32> to vector<1x8xf32>
    %308 = vector.broadcast %307 : vector<1x8xf32> to vector<10x8xf32>
    %309 = arith.addf %305, %308 : vector<10x8xf32>
    %c3_229 = arith.constant 3 : index
    %c0_230 = arith.constant 0 : index
    %c0_231 = arith.constant 0 : index
    %310 = vector.load %arg15[%c3_229, %c0_230, %c0_231] : memref<4x32x8xf32, #tpu.memory_space<vmem>>, vector<1x32x8xf32>
    %311 = vector.shape_cast %310 : vector<1x32x8xf32> to vector<32x8xf32>
    %cst_232 = arith.constant dense<0.000000e+00> : vector<8x8xf32>
    %312 = tpu.matmul %3, %311, %cst_232 {dimension_numbers = #tpu.dot_dimension_numbers<[1], [0], [0], [1], [0, 0, 1, 1], [], []>} : vector<8x32xf32>, vector<32x8xf32>, vector<8x8xf32> -> vector<8x8xf32>
    %c3_233 = arith.constant 3 : index
    %c0_234 = arith.constant 0 : index
    %c0_235 = arith.constant 0 : index
    %313 = vector.load %arg16[%c3_233, %c0_234, %c0_235] : memref<4x1x8xf32, #tpu.memory_space<vmem>>, vector<1x1x8xf32>
    %314 = vector.shape_cast %313 : vector<1x1x8xf32> to vector<1x8xf32>
    %315 = vector.broadcast %314 : vector<1x8xf32> to vector<8x8xf32>
    %316 = arith.addf %312, %315 : vector<8x8xf32>
    %c3_236 = arith.constant 3 : index
    %c0_237 = arith.constant 0 : index
    %c0_238 = arith.constant 0 : index
    %317 = vector.load %arg17[%c3_236, %c0_237, %c0_238] : memref<4x32x8xf32, #tpu.memory_space<vmem>>, vector<1x32x8xf32>
    %318 = vector.shape_cast %317 : vector<1x32x8xf32> to vector<32x8xf32>
    %cst_239 = arith.constant dense<0.000000e+00> : vector<8x8xf32>
    %319 = tpu.matmul %3, %318, %cst_239 {dimension_numbers = #tpu.dot_dimension_numbers<[1], [0], [0], [1], [0, 0, 1, 1], [], []>} : vector<8x32xf32>, vector<32x8xf32>, vector<8x8xf32> -> vector<8x8xf32>
    %c3_240 = arith.constant 3 : index
    %c0_241 = arith.constant 0 : index
    %c0_242 = arith.constant 0 : index
    %320 = vector.load %arg18[%c3_240, %c0_241, %c0_242] : memref<4x1x8xf32, #tpu.memory_space<vmem>>, vector<1x1x8xf32>
    %321 = vector.shape_cast %320 : vector<1x1x8xf32> to vector<1x8xf32>
    %322 = vector.broadcast %321 : vector<1x8xf32> to vector<8x8xf32>
    %323 = arith.addf %319, %322 : vector<8x8xf32>
    %cst_243 = arith.constant dense<0.000000e+00> : vector<10x8xf32>
    %324 = tpu.matmul %309, %316, %cst_243 {dimension_numbers = #tpu.dot_dimension_numbers<[1], [1], [0], [0], [0, 0, 1, 0], [], []>} : vector<10x8xf32>, vector<8x8xf32>, vector<10x8xf32> -> vector<10x8xf32>
    %cst_244 = arith.constant 0.353553385 : f32
    %325 = vector.broadcast %cst_244 : f32 to vector<10x8xf32>
    %326 = arith.mulf %324, %325 : vector<10x8xf32>
    %cst_245 = arith.constant dense<0xFF800000> : vector<10xf32>
    %327 = vector.multi_reduction <maximumf>, %326, %cst_245 [1] : vector<10x8xf32> to vector<10xf32>
    %328 = vector.shape_cast %327 : vector<10xf32> to vector<10x1xf32>
    %329 = vector.broadcast %328 : vector<10x1xf32> to vector<10x8xf32>
    %330 = arith.subf %326, %329 : vector<10x8xf32>
    %331 = math.exp %330 : vector<10x8xf32>
    %cst_246 = arith.constant dense<0.000000e+00> : vector<10xf32>
    %332 = vector.multi_reduction <add>, %331, %cst_246 [1] : vector<10x8xf32> to vector<10xf32>
    %333 = vector.shape_cast %332 : vector<10xf32> to vector<10x1xf32>
    %334 = tpu.reciprocal %333 {approx = true} : vector<10x1xf32> -> vector<10x1xf32>
    %335 = vector.broadcast %334 : vector<10x1xf32> to vector<10x8xf32>
    %336 = arith.mulf %331, %335 : vector<10x8xf32>
    %cst_247 = arith.constant dense<0.000000e+00> : vector<10x8xf32>
    %337 = tpu.matmul %336, %323, %cst_247 {dimension_numbers = #tpu.dot_dimension_numbers<[1], [0], [0], [1], [0, 0, 1, 1], [], []>} : vector<10x8xf32>, vector<8x8xf32>, vector<10x8xf32> -> vector<10x8xf32>
    %c3_248 = arith.constant 3 : index
    %c0_249 = arith.constant 0 : index
    %c0_250 = arith.constant 0 : index
    %338 = vector.load %arg19[%c3_248, %c0_249, %c0_250] : memref<4x8x32xf32, #tpu.memory_space<vmem>>, vector<1x8x32xf32>
    %339 = vector.shape_cast %338 : vector<1x8x32xf32> to vector<8x32xf32>
    %cst_251 = arith.constant dense<0.000000e+00> : vector<10x32xf32>
    %340 = tpu.matmul %337, %339, %cst_251 {dimension_numbers = #tpu.dot_dimension_numbers<[1], [0], [0], [1], [0, 0, 1, 1], [], []>} : vector<10x8xf32>, vector<8x32xf32>, vector<10x32xf32> -> vector<10x32xf32>
    %341 = arith.addf %302, %340 : vector<10x32xf32>
    %c0_252 = arith.constant 0 : index
    %c0_253 = arith.constant 0 : index
    %342 = vector.load %arg20[%c0_252, %c0_253] : memref<1x32xf32, #tpu.memory_space<vmem>>, vector<1x32xf32>
    %343 = vector.broadcast %342 : vector<1x32xf32> to vector<10x32xf32>
    %344 = arith.addf %341, %343 : vector<10x32xf32>
    %345 = arith.addf %186, %344 : vector<10x32xf32>
    %c0_254 = arith.constant 0 : index
    %c0_255 = arith.constant 0 : index
    %346 = vector.load %arg21[%c0_254, %c0_255] : memref<1x32xf32, #tpu.memory_space<vmem>>, vector<1x32xf32>
    %c0_256 = arith.constant 0 : index
    %c0_257 = arith.constant 0 : index
    %347 = vector.load %arg22[%c0_256, %c0_257] : memref<1x32xf32, #tpu.memory_space<vmem>>, vector<1x32xf32>
    %cst_258 = arith.constant dense<0.000000e+00> : vector<10xf32>
    %348 = vector.multi_reduction <add>, %345, %cst_258 [1] : vector<10x32xf32> to vector<10xf32>
    %349 = vector.shape_cast %348 : vector<10xf32> to vector<10x1xf32>
    %cst_259 = arith.constant 3.200000e+01 : f32
    %350 = vector.broadcast %cst_259 : f32 to vector<10x1xf32>
    %351 = arith.divf %349, %350 : vector<10x1xf32>
    %352 = vector.broadcast %351 : vector<10x1xf32> to vector<10x32xf32>
    %353 = arith.subf %345, %352 : vector<10x32xf32>
    %354 = arith.mulf %353, %353 : vector<10x32xf32>
    %cst_260 = arith.constant dense<0.000000e+00> : vector<10xf32>
    %355 = vector.multi_reduction <add>, %354, %cst_260 [1] : vector<10x32xf32> to vector<10xf32>
    %356 = vector.shape_cast %355 : vector<10xf32> to vector<10x1xf32>
    %cst_261 = arith.constant 3.200000e+01 : f32
    %357 = vector.broadcast %cst_261 : f32 to vector<10x1xf32>
    %358 = arith.divf %356, %357 : vector<10x1xf32>
    %359 = vector.broadcast %351 : vector<10x1xf32> to vector<10x32xf32>
    %360 = arith.subf %345, %359 : vector<10x32xf32>
    %cst_262 = arith.constant 9.99999974E-6 : f32
    %361 = vector.broadcast %cst_262 : f32 to vector<10x1xf32>
    %362 = arith.addf %358, %361 : vector<10x1xf32>
    %363 = math.rsqrt %362 : vector<10x1xf32>
    %364 = vector.broadcast %363 : vector<10x1xf32> to vector<10x32xf32>
    %365 = arith.mulf %360, %364 : vector<10x32xf32>
    %366 = vector.broadcast %346 : vector<1x32xf32> to vector<10x32xf32>
    %367 = arith.mulf %365, %366 : vector<10x32xf32>
    %368 = vector.broadcast %347 : vector<1x32xf32> to vector<10x32xf32>
    %369 = arith.addf %367, %368 : vector<10x32xf32>
    %c0_263 = arith.constant 0 : index
    %c0_264 = arith.constant 0 : index
    %370 = vector.load %arg23[%c0_263, %c0_264] : memref<32x64xf32, #tpu.memory_space<vmem>>, vector<32x64xf32>
    %cst_265 = arith.constant dense<0.000000e+00> : vector<10x64xf32>
    %371 = tpu.matmul %369, %370, %cst_265 {dimension_numbers = #tpu.dot_dimension_numbers<[1], [0], [0], [1], [0, 0, 1, 1], [], []>} : vector<10x32xf32>, vector<32x64xf32>, vector<10x64xf32> -> vector<10x64xf32>
    %c0_266 = arith.constant 0 : index
    %c0_267 = arith.constant 0 : index
    %372 = vector.load %arg24[%c0_266, %c0_267] : memref<1x64xf32, #tpu.memory_space<vmem>>, vector<1x64xf32>
    %373 = vector.broadcast %372 : vector<1x64xf32> to vector<10x64xf32>
    %374 = arith.addf %371, %373 : vector<10x64xf32>
    %cst_268 = arith.constant 0.000000e+00 : f32
    %375 = vector.broadcast %cst_268 : f32 to vector<10x64xf32>
    %376 = arith.maximumf %374, %375 : vector<10x64xf32>
    %c0_269 = arith.constant 0 : index
    %c0_270 = arith.constant 0 : index
    %377 = vector.load %arg25[%c0_269, %c0_270] : memref<64x32xf32, #tpu.memory_space<vmem>>, vector<64x32xf32>
    %cst_271 = arith.constant dense<0.000000e+00> : vector<10x32xf32>
    %378 = tpu.matmul %376, %377, %cst_271 {dimension_numbers = #tpu.dot_dimension_numbers<[1], [0], [0], [1], [0, 0, 1, 1], [], []>} : vector<10x64xf32>, vector<64x32xf32>, vector<10x32xf32> -> vector<10x32xf32>
    %c0_272 = arith.constant 0 : index
    %c0_273 = arith.constant 0 : index
    %379 = vector.load %arg26[%c0_272, %c0_273] : memref<1x32xf32, #tpu.memory_space<vmem>>, vector<1x32xf32>
    %380 = vector.broadcast %379 : vector<1x32xf32> to vector<10x32xf32>
    %381 = arith.addf %378, %380 : vector<10x32xf32>
    %382 = arith.addf %369, %381 : vector<10x32xf32>
    %c0_274 = arith.constant 0 : index
    %c0_275 = arith.constant 0 : index
    %383 = vector.load %arg27[%c0_274, %c0_275] : memref<1x32xf32, #tpu.memory_space<vmem>>, vector<1x32xf32>
    %c0_276 = arith.constant 0 : index
    %c0_277 = arith.constant 0 : index
    %384 = vector.load %arg28[%c0_276, %c0_277] : memref<1x32xf32, #tpu.memory_space<vmem>>, vector<1x32xf32>
    %cst_278 = arith.constant dense<0.000000e+00> : vector<10xf32>
    %385 = vector.multi_reduction <add>, %382, %cst_278 [1] : vector<10x32xf32> to vector<10xf32>
    %386 = vector.shape_cast %385 : vector<10xf32> to vector<10x1xf32>
    %cst_279 = arith.constant 3.200000e+01 : f32
    %387 = vector.broadcast %cst_279 : f32 to vector<10x1xf32>
    %388 = arith.divf %386, %387 : vector<10x1xf32>
    %389 = vector.broadcast %388 : vector<10x1xf32> to vector<10x32xf32>
    %390 = arith.subf %382, %389 : vector<10x32xf32>
    %391 = arith.mulf %390, %390 : vector<10x32xf32>
    %cst_280 = arith.constant dense<0.000000e+00> : vector<10xf32>
    %392 = vector.multi_reduction <add>, %391, %cst_280 [1] : vector<10x32xf32> to vector<10xf32>
    %393 = vector.shape_cast %392 : vector<10xf32> to vector<10x1xf32>
    %cst_281 = arith.constant 3.200000e+01 : f32
    %394 = vector.broadcast %cst_281 : f32 to vector<10x1xf32>
    %395 = arith.divf %393, %394 : vector<10x1xf32>
    %396 = vector.broadcast %388 : vector<10x1xf32> to vector<10x32xf32>
    %397 = arith.subf %382, %396 : vector<10x32xf32>
    %cst_282 = arith.constant 9.99999974E-6 : f32
    %398 = vector.broadcast %cst_282 : f32 to vector<10x1xf32>
    %399 = arith.addf %395, %398 : vector<10x1xf32>
    %400 = math.rsqrt %399 : vector<10x1xf32>
    %401 = vector.broadcast %400 : vector<10x1xf32> to vector<10x32xf32>
    %402 = arith.mulf %397, %401 : vector<10x32xf32>
    %403 = vector.broadcast %383 : vector<1x32xf32> to vector<10x32xf32>
    %404 = arith.mulf %402, %403 : vector<10x32xf32>
    %405 = vector.broadcast %384 : vector<1x32xf32> to vector<10x32xf32>
    %406 = arith.addf %404, %405 : vector<10x32xf32>
    %c0_283 = arith.constant 0 : index
    %c0_284 = arith.constant 0 : index
    %c0_285 = arith.constant 0 : index
    %407 = vector.load %arg29[%c0_283, %c0_284, %c0_285] : memref<1x10x32xf32, #tpu.memory_space<vmem>>, vector<1x10x32xf32>
    %408 = vector.shape_cast %407 : vector<1x10x32xf32> to vector<10x32xf32>
    %409 = vector.shape_cast %406 : vector<10x32xf32> to vector<1x10x32xf32>
    tpu.vector_store %arg29[%c0_283, %c0_284, %c0_285], %409 {strides = array<i32>} : memref<1x10x32xf32, #tpu.memory_space<vmem>>, vector<1x10x32xf32>,
    return
  }
  func.func @transform_0(%arg0: i32) -> (i32, i32, i32) {
    %c0_i32 = arith.constant 0 : i32
    %c0_i32_0 = arith.constant 0 : i32
    %c0_i32_1 = arith.constant 0 : i32
    return %arg0, %c0_i32, %c0_i32_0 : i32, i32, i32
  }
  func.func @transform_1(%arg0: i32) -> (i32, i32, i32) {
    %c0_i32 = arith.constant 0 : i32
    %c0_i32_0 = arith.constant 0 : i32
    %c0_i32_1 = arith.constant 0 : i32
    return %arg0, %c0_i32, %c0_i32_0 : i32, i32, i32
  }
  func.func @transform_2(%arg0: i32) -> (i32, i32, i32) {
    %c0_i32 = arith.constant 0 : i32
    %c0_i32_0 = arith.constant 0 : i32
    %c0_i32_1 = arith.constant 0 : i32
    %c0_i32_2 = arith.constant 0 : i32
    return %c0_i32, %c0_i32_0, %c0_i32_1 : i32, i32, i32
  }
  func.func @transform_3(%arg0: i32) -> (i32, i32, i32) {
    %c0_i32 = arith.constant 0 : i32
    %c0_i32_0 = arith.constant 0 : i32
    %c0_i32_1 = arith.constant 0 : i32
    %c0_i32_2 = arith.constant 0 : i32
    return %c0_i32, %c0_i32_0, %c0_i32_1 : i32, i32, i32
  }
  func.func @transform_4(%arg0: i32) -> (i32, i32, i32) {
    %c0_i32 = arith.constant 0 : i32
    %c0_i32_0 = arith.constant 0 : i32
    %c0_i32_1 = arith.constant 0 : i32
    %c0_i32_2 = arith.constant 0 : i32
    return %c0_i32, %c0_i32_0, %c0_i32_1 : i32, i32, i32
  }
  func.func @transform_5(%arg0: i32) -> (i32, i32, i32) {
    %c0_i32 = arith.constant 0 : i32
    %c0_i32_0 = arith.constant 0 : i32
    %c0_i32_1 = arith.constant 0 : i32
    %c0_i32_2 = arith.constant 0 : i32
    return %c0_i32, %c0_i32_0, %c0_i32_1 : i32, i32, i32
  }
  func.func @transform_6(%arg0: i32) -> (i32, i32, i32) {
    %c0_i32 = arith.constant 0 : i32
    %c0_i32_0 = arith.constant 0 : i32
    %c0_i32_1 = arith.constant 0 : i32
    %c0_i32_2 = arith.constant 0 : i32
    return %c0_i32, %c0_i32_0, %c0_i32_1 : i32, i32, i32
  }
  func.func @transform_7(%arg0: i32) -> (i32, i32, i32) {
    %c0_i32 = arith.constant 0 : i32
    %c0_i32_0 = arith.constant 0 : i32
    %c0_i32_1 = arith.constant 0 : i32
    %c0_i32_2 = arith.constant 0 : i32
    return %c0_i32, %c0_i32_0, %c0_i32_1 : i32, i32, i32
  }
  func.func @transform_8(%arg0: i32) -> (i32, i32, i32) {
    %c0_i32 = arith.constant 0 : i32
    %c0_i32_0 = arith.constant 0 : i32
    %c0_i32_1 = arith.constant 0 : i32
    %c0_i32_2 = arith.constant 0 : i32
    return %c0_i32, %c0_i32_0, %c0_i32_1 : i32, i32, i32
  }
  func.func @transform_9(%arg0: i32) -> (i32, i32) {
    %c0_i32 = arith.constant 0 : i32
    %c0_i32_0 = arith.constant 0 : i32
    %c0_i32_1 = arith.constant 0 : i32
    return %c0_i32, %c0_i32_0 : i32, i32
  }
  func.func @transform_10(%arg0: i32) -> (i32, i32) {
    %c0_i32 = arith.constant 0 : i32
    %c0_i32_0 = arith.constant 0 : i32
    %c0_i32_1 = arith.constant 0 : i32
    return %c0_i32, %c0_i32_0 : i32, i32
  }
  func.func @transform_11(%arg0: i32) -> (i32, i32) {
    %c0_i32 = arith.constant 0 : i32
    %c0_i32_0 = arith.constant 0 : i32
    %c0_i32_1 = arith.constant 0 : i32
    return %c0_i32, %c0_i32_0 : i32, i32
  }
  func.func @transform_12(%arg0: i32) -> (i32, i32, i32) {
    %c0_i32 = arith.constant 0 : i32
    %c0_i32_0 = arith.constant 0 : i32
    %c0_i32_1 = arith.constant 0 : i32
    %c0_i32_2 = arith.constant 0 : i32
    return %c0_i32, %c0_i32_0, %c0_i32_1 : i32, i32, i32
  }
  func.func @transform_13(%arg0: i32) -> (i32, i32, i32) {
    %c0_i32 = arith.constant 0 : i32
    %c0_i32_0 = arith.constant 0 : i32
    %c0_i32_1 = arith.constant 0 : i32
    %c0_i32_2 = arith.constant 0 : i32
    return %c0_i32, %c0_i32_0, %c0_i32_1 : i32, i32, i32
  }
  func.func @transform_14(%arg0: i32) -> (i32, i32, i32) {
    %c0_i32 = arith.constant 0 : i32
    %c0_i32_0 = arith.constant 0 : i32
    %c0_i32_1 = arith.constant 0 : i32
    %c0_i32_2 = arith.constant 0 : i32
    return %c0_i32, %c0_i32_0, %c0_i32_1 : i32, i32, i32
  }
  func.func @transform_15(%arg0: i32) -> (i32, i32, i32) {
    %c0_i32 = arith.constant 0 : i32
    %c0_i32_0 = arith.constant 0 : i32
    %c0_i32_1 = arith.constant 0 : i32
    %c0_i32_2 = arith.constant 0 : i32
    return %c0_i32, %c0_i32_0, %c0_i32_1 : i32, i32, i32
  }
  func.func @transform_16(%arg0: i32) -> (i32, i32, i32) {
    %c0_i32 = arith.constant 0 : i32
    %c0_i32_0 = arith.constant 0 : i32
    %c0_i32_1 = arith.constant 0 : i32
    %c0_i32_2 = arith.constant 0 : i32
    return %c0_i32, %c0_i32_0, %c0_i32_1 : i32, i32, i32
  }
  func.func @transform_17(%arg0: i32) -> (i32, i32, i32) {
    %c0_i32 = arith.constant 0 : i32
    %c0_i32_0 = arith.constant 0 : i32
    %c0_i32_1 = arith.constant 0 : i32
    %c0_i32_2 = arith.constant 0 : i32
    return %c0_i32, %c0_i32_0, %c0_i32_1 : i32, i32, i32
  }
  func.func @transform_18(%arg0: i32) -> (i32, i32, i32) {
    %c0_i32 = arith.constant 0 : i32
    %c0_i32_0 = arith.constant 0 : i32
    %c0_i32_1 = arith.constant 0 : i32
    %c0_i32_2 = arith.constant 0 : i32
    return %c0_i32, %c0_i32_0, %c0_i32_1 : i32, i32, i32
  }
  func.func @transform_19(%arg0: i32) -> (i32, i32) {
    %c0_i32 = arith.constant 0 : i32
    %c0_i32_0 = arith.constant 0 : i32
    %c0_i32_1 = arith.constant 0 : i32
    return %c0_i32, %c0_i32_0 : i32, i32
  }
  func.func @transform_20(%arg0: i32) -> (i32, i32) {
    %c0_i32 = arith.constant 0 : i32
    %c0_i32_0 = arith.constant 0 : i32
    %c0_i32_1 = arith.constant 0 : i32
    return %c0_i32, %c0_i32_0 : i32, i32
  }
  func.func @transform_21(%arg0: i32) -> (i32, i32) {
    %c0_i32 = arith.constant 0 : i32
    %c0_i32_0 = arith.constant 0 : i32
    %c0_i32_1 = arith.constant 0 : i32
    return %c0_i32, %c0_i32_0 : i32, i32
  }
  func.func @transform_22(%arg0: i32) -> (i32, i32) {
    %c0_i32 = arith.constant 0 : i32
    %c0_i32_0 = arith.constant 0 : i32
    %c0_i32_1 = arith.constant 0 : i32
    return %c0_i32, %c0_i32_0 : i32, i32
  }
  func.func @transform_23(%arg0: i32) -> (i32, i32) {
    %c0_i32 = arith.constant 0 : i32
    %c0_i32_0 = arith.constant 0 : i32
    %c0_i32_1 = arith.constant 0 : i32
    return %c0_i32, %c0_i32_0 : i32, i32
  }
  func.func @transform_24(%arg0: i32) -> (i32, i32) {
    %c0_i32 = arith.constant 0 : i32
    %c0_i32_0 = arith.constant 0 : i32
    %c0_i32_1 = arith.constant 0 : i32
    return %c0_i32, %c0_i32_0 : i32, i32
  }
  func.func @transform_25(%arg0: i32) -> (i32, i32) {
    %c0_i32 = arith.constant 0 : i32
    %c0_i32_0 = arith.constant 0 : i32
    %c0_i32_1 = arith.constant 0 : i32
    return %c0_i32, %c0_i32_0 : i32, i32
  }
  func.func @transform_26(%arg0: i32) -> (i32, i32) {
    %c0_i32 = arith.constant 0 : i32
    %c0_i32_0 = arith.constant 0 : i32
    %c0_i32_1 = arith.constant 0 : i32
    return %c0_i32, %c0_i32_0 : i32, i32
  }
  func.func @transform_27(%arg0: i32) -> (i32, i32) {
    %c0_i32 = arith.constant 0 : i32
    %c0_i32_0 = arith.constant 0 : i32
    %c0_i32_1 = arith.constant 0 : i32
    return %c0_i32, %c0_i32_0 : i32, i32
  }
  func.func @transform_28(%arg0: i32) -> (i32, i32, i32) {
    %c0_i32 = arith.constant 0 : i32
    %c0_i32_0 = arith.constant 0 : i32
    %c0_i32_1 = arith.constant 0 : i32
    return %arg0, %c0_i32, %c0_i32_0 : i32, i32, i32
  }
}

</mosaic_0001>

<bundles_post_ra>
// kernel: my_transformer_forward.8
= control target key start
LH: loop header
LB: loop body
LE: loop exit
PB: predicated region body
PF: predicated region fallthrough
CT: control target
= control target key end

     0   :  { %vm18_vm0 = vcmask 261120   ;;  %s118_s0 = inlined_call_operand.vmem [shape: f32[16,32], index: 0, kind: input, shape index: {}]   ;;  %s119_s1 = inlined_call_operand.vmem [shape: f32[1,32], index: 1, kind: input, shape index: {}]   ;;  %s120_s2 = inlined_call_operand.vmem [shape: f32[1,32], index: 2, kind: input, shape index: {}]   ;;  %s121_s3 = inlined_call_operand.vmem [shape: f32[16,32], index: 3, kind: output, shape index: {}]  }
   0x1   :  { %v14_v0 = vld [vmem:[%s118_s0] sm:$0xff]  ;;  %v15_v1 = vld [vmem:[%s118_s0 + $0x8] sm:$0xff] }
   0x2   :  { %v19_v2 = vsel %vm18_vm0, %v14_v0, 0.0  ;;  %v22_v3 = vsel %vm18_vm0, %v15_v1, 0.0  ;;  %v68_v21 = vld [vmem:[%s119_s1] ss:$0 sm:$0xff] }
   0x3   :  { %20 = vadd.xlane.f32.xlu0 %v19_v2  ;;  %v69_v23 = vld [vmem:[%s120_s2] ss:$0 sm:$0xff] }
   0x7   :  { %23 = vadd.xlane.f32.xlu0 %v22_v3 }
  0x90   :  { %v21_v4 = vpop.xlane.xlu0 %20 }
  0x91   :  { %v26_v5 = vmul.f32 0.03125, %v21_v4 }
  0x93   :  { %v28_v6 = vsub.f32 %v14_v0, %v26_v5 }
  0x94   :  { %v24_v7 = vpop.xlane.xlu0 %23 }
  0x95   :  { %v27_v8 = vmul.f32 0.03125, %v24_v7  ;;  %v30_v9 = vmul.f32 %v28_v6, %v28_v6 }
  0x97   :  { %v29_v10 = vsub.f32 %v15_v1, %v27_v8  ;;  %v32_v11 = vsel %vm18_vm0, %v30_v9, 0.0 }
  0x98   :  { %33 = vadd.xlane.f32.xlu1 %v32_v11 }
  0x99   :  { %v31_v12 = vmul.f32 %v29_v10, %v29_v10 }
  0x9b   :  { %v35_v13 = vsel %vm18_vm0, %v31_v12, 0.0 }
  0x9c   :  { %36 = vadd.xlane.f32.xlu1 %v35_v13 }
 0x125   :  { %v34_v14 = vpop.xlane.xlu1 %33 }
 0x126   :  { %v38_v15 = vmul.f32 0.03125, %v34_v14 }
 0x128   :  { %v40_v16 = vadd.f32 1e-05, %v38_v15 }
 0x129   :  { %v37_v17 = vpop.xlane.xlu1 %36 }
 0x12a   :  { %70 = vrsqrt.f32 %v40_v16  ;;  %v39_v18 = vmul.f32 0.03125, %v37_v17 }
 0x12c   :  { %v41_v19 = vadd.f32 1e-05, %v39_v18 }
 0x12e   :  { %72 = vrsqrt.f32 %v41_v19 }
 0x134   :  { %v71_v20 = vpop.eup %70 }
 0x135   :  { %v44_v22 = vmul.f32 %v71_v20, %v28_v6 }
 0x137   :  { %v52_v24 = vmul.f32 %v68_v21, %v44_v22 }
 0x138   :  { %v73_v25 = vpop.eup %72 }
 0x139   :  { %v60_v26 = vadd.f32 %v69_v23, %v52_v24  ;;  %v45_v27 = vmul.f32 %v73_v25, %v29_v10 }
 0x13b   :  { %62 = vst.msk [vmem:[%s121_s3] sm:$0xff] %vm18_vm0, %v60_v26  ;;  %v53_v28 = vmul.f32 %v68_v21, %v45_v27 }
 0x13d   :  { %v61_v29 = vadd.f32 %v69_v23, %v53_v28 }
 0x13f   :  { %63 = vst.msk [vmem:[%s121_s3 + $0x8] sm:$0xff] %vm18_vm0, %v61_v29 }

// kernel: my_transformer_forward.11
= control target key start
LH: loop header
LB: loop body
LE: loop exit
PB: predicated region body
PF: predicated region fallthrough
CT: control target
= control target key end

     0   :  { %vm25_vm0 = vcmask 261120   ;;  %vm32_vm1 = vcmask 257024   ;;  %v241_v21 = vmov 0.0|0.0   ;;  %vm242_vm2 = vmmov 0   ;;  %s325_s0 = inlined_call_operand.vmem [shape: f32[20,32], index: 0, kind: input, shape index: {}]   ;;  %s326_s3 = inlined_call_operand.vmem [shape: f32[32,128], index: 3, kind: input, shape index: {}]   ;;  %s327_s1 = inlined_call_operand.vmem [shape: f32[1,32], index: 1, kind: input, shape index: {}]   ;;  %s328_s2 = inlined_call_operand.vmem [shape: f32[1,32], index: 2, kind: input, shape index: {}]   ;;  %s329_s4 = inlined_call_operand.vmem [shape: f32[1,128], index: 4, kind: input, shape index: {}]   ;;  %s330_s5 = inlined_call_operand.vmem [shape: f32[20,128], index: 5, kind: output, shape index: {}]  }
   0x1   :  { %v21_v0 = vld [vmem:[%s325_s0 + $0x8] sm:$0xff]  ;;  %v22_v1 = vld [vmem:[%s325_s0 + $0x10] sm:$0xf]  ;;  %v20_v2 = vld [vmem:[%s325_s0] sm:$0xff]  ;;  %228 = vmatprep.subr.bf16.mxu1 %v241_v21  ;;  %222 = vmatprep.subr.bf16.mxu0 %v241_v21  ;;  %v243_v27 = vmov 0.0  }
   0x2   :  { %v29_v3 = vsel %vm25_vm0, %v21_v0, 0.0  ;;  %v33_v4 = vsel %vm32_vm1, %v22_v1, 0.0  ;;  %v26_v5 = vsel %vm25_vm0, %v20_v2, 0.0  ;;  %v85_v22 = vld [vmem:[%s326_s3] sm:$0xff]  ;;  %v86_v23 = vld [vmem:[%s326_s3 + $0x8] sm:$0xff]  ;;  %v87_v24 = vld [vmem:[%s326_s3 + $0x10] sm:$0xff]  ;;  %216 = vmatprep.mubr.msk.f32.mxu1 %vm242_vm2, %v243_v27  ;;  %213 = vmatprep.mubr.msk.f32.mxu0 %vm242_vm2, %v243_v27 }
   0x3   :  { %30 = vadd.xlane.f32.xlu0 %v29_v3  ;;  %34 = vadd.xlane.f32.xlu1 %v33_v4  ;;  %v223_v25 = vpack.c.bf16 %v86_v23, %v85_v22  ;;  %v88_v26 = vld [vmem:[%s326_s3 + $0x18] sm:$0xff]  ;;  %v192_v39 = vld [vmem:[%s327_s1] ss:$0 sm:$0xff] }
   0x4   :  { %v226_v28 = vpack.c.bf16 %v88_v26, %v87_v24  ;;  %v193_v41 = vld [vmem:[%s328_s2] ss:$0 sm:$0xff] }
   0x5   :  { %230 = vmatpush3.bf16.msra.mxu1 %v223_v25  ;;  %224 = vmatpush3.bf16.msra.mxu0 %v223_v25  ;;  %v194_v52 = vld [vmem:[%s329_s4] ss:$0 sm:$0xff] }
   0x6   :  { %229 = vmatprep.subr.bf16.mxu1 %v241_v21  ;;  %225 = vmatprep.subr.bf16.mxu0 %v241_v21 }
   0x7   :  { %27 = vadd.xlane.f32.xlu0 %v26_v5 }
   0x9   :  { %231 = vmatpush3.bf16.msra.mxu1 %v226_v28  ;;  %227 = vmatpush3.bf16.msra.mxu0 %v226_v28 }
  0x90   :  { %v31_v6 = vpop.xlane.xlu0 %30  ;;  %v35_v7 = vpop.xlane.xlu1 %34 }
  0x91   :  { %v38_v8 = vmul.f32 0.03125, %v31_v6  ;;  %v39_v9 = vmul.f32 0.03125, %v35_v7 }
  0x93   :  { %v41_v10 = vsub.f32 %v21_v0, %v38_v8  ;;  %v42_v11 = vsub.f32 %v22_v1, %v39_v9 }
  0x94   :  { %v28_v12 = vpop.xlane.xlu0 %27 }
  0x95   :  { %v37_v13 = vmul.f32 0.03125, %v28_v12  ;;  %v44_v14 = vmul.f32 %v41_v10, %v41_v10  ;;  %v45_v15 = vmul.f32 %v42_v11, %v42_v11 }
  0x97   :  { %v40_v16 = vsub.f32 %v20_v2, %v37_v13  ;;  %v49_v17 = vsel %vm25_vm0, %v44_v14, 0.0  ;;  %v52_v18 = vsel %vm32_vm1, %v45_v15, 0.0 }
  0x98   :  { %50 = vadd.xlane.f32.xlu1 %v49_v17 }
  0x99   :  { %v43_v19 = vmul.f32 %v40_v16, %v40_v16 }
  0x9b   :  { %v46_v20 = vsel %vm25_vm0, %v43_v19, 0.0 }
  0x9c   :  { %53 = vadd.xlane.f32.xlu1 %v52_v18  ;;  %47 = vadd.xlane.f32.xlu0 %v46_v20 }
 0x125   :  { %v51_v29 = vpop.xlane.xlu1 %50 }
 0x126   :  { %v56_v30 = vmul.f32 0.03125, %v51_v29 }
 0x128   :  { %v59_v31 = vadd.f32 1e-05, %v56_v30 }
 0x129   :  { %v54_v32 = vpop.xlane.xlu1 %53  ;;  %v48_v33 = vpop.xlane.xlu0 %47 }
 0x12a   :  { %235 = vrsqrt.f32 %v59_v31  ;;  %v57_v34 = vmul.f32 0.03125, %v54_v32  ;;  %v55_v35 = vmul.f32 0.03125, %v48_v33 }
 0x12c   :  { %v60_v36 = vadd.f32 1e-05, %v57_v34  ;;  %v58_v37 = vadd.f32 1e-05, %v55_v35 }
 0x12e   :  { %237 = vrsqrt.f32 %v60_v36 }
 0x12f   :  { %239 = vrsqrt.f32 %v58_v37 }
 0x134   :  { %v236_v38 = vpop.eup %235 }
 0x135   :  { %v65_v40 = vmul.f32 %v236_v38, %v41_v10 }
 0x137   :  { %v74_v42 = vmul.f32 %v192_v39, %v65_v40 }
 0x138   :  { %v238_v43 = vpop.eup %237 }
 0x139   :  { %v240_v44 = vpop.eup %239  ;;  %v83_v45 = vadd.f32 %v193_v41, %v74_v42  ;;  %v66_v46 = vmul.f32 %v238_v43, %v42_v11 }
 0x13a   :  { %v64_v47 = vmul.f32 %v240_v44, %v40_v16 }
 0x13b   :  { %217 = vmatmul.mubr.msk.f32.vlgmr.msra.gmra.mrb[0].mxu1 %vm25_vm0, %v83_v45  ;;  %v75_v48 = vmul.f32 %v192_v39, %v66_v46 }
 0x13c   :  { %219 = vmatprep.mubr.msk.f32.mxu1 %vm242_vm2, %v243_v27  ;;  %v73_v49 = vmul.f32 %v192_v39, %v64_v47 }
 0x13d   :  { %v84_v50 = vadd.f32 %v193_v41, %v75_v48 }
 0x13e   :  { %v82_v51 = vadd.f32 %v193_v41, %v73_v49 }
 0x13f   :  { %220 = vmatmul.mubr.msk.f32.gmra.mrb[2].mxu1 %vm25_vm0, %v84_v50 }
 0x140   :  { %214 = vmatmul.mubr.msk.f32.vlgmr.msra.gmra.mrb[0].mxu0 %vm25_vm0, %v82_v51 }
 0x20e   :  { %v176_v53 = vpop.f32.mrb[0].mxu1 }
 0x20f   :  { %v177_v54 = vadd.f32 %v194_v52, %v176_v53  ;;  %v218_v55 = vpop.f32.mrb[1].mxu1 }
 0x211   :  { %186 = vst [vmem:[%s330_s5 + $0x8] sm:$0xff] %v177_v54 }
 0x212   :  { %v181_v56 = vpop.f32.mrb[2].mxu1 }
 0x213   :  { %v171_v57 = vpop.f32.mrb[0].mxu0  ;;  %v182_v58 = vadd.f32 %v194_v52, %v181_v56  ;;  %v221_v59 = vpop.f32.mrb[3].mxu1 }
 0x214   :  { %v172_v60 = vadd.f32 %v194_v52, %v171_v57  ;;  %v215_v61 = vpop.f32.mrb[1].mxu0 }
 0x215   :  { %187 = vst [vmem:[%s330_s5 + $0x10] sm:$0xf] %v182_v58 }
 0x216   :  { %185 = vst [vmem:[%s330_s5] sm:$0xff] %v172_v60 }

// kernel: my_transformer_forward.6
= control target key start
LH: loop header
LB: loop body
LE: loop exit
PB: predicated region body
PF: predicated region fallthrough
CT: control target
= control target key end

     0   :  { %s3430_s24 = smov 0   ;;  %s3857_s0 = inlined_call_operand.vmem [shape: f32[2,8,32], index: 0, kind: input, shape index: {}]   ;;  %s3858_s1 = inlined_call_operand.vmem [shape: f32[4,32,8], index: 1, kind: input, shape index: {}]   ;;  %s3859_s2 = inlined_call_operand.vmem [shape: f32[4,1,8], index: 2, kind: input, shape index: {}]   ;;  %s3860_s3 = inlined_call_operand.vmem [shape: f32[4,32,8], index: 3, kind: input, shape index: {}]   ;;  %s3861_s4 = inlined_call_operand.vmem [shape: f32[4,1,8], index: 4, kind: input, shape index: {}]   ;;  %s3862_s5 = inlined_call_operand.vmem [shape: f32[4,32,8], index: 5, kind: input, shape index: {}]   ;;  %s3863_s6 = inlined_call_operand.vmem [shape: f32[4,1,8], index: 6, kind: input, shape index: {}]   ;;  %s3864_s7 = inlined_call_operand.vmem [shape: f32[4,8,32], index: 7, kind: input, shape index: {}]   ;;  %s3865_s8 = inlined_call_operand.vmem [shape: f32[1,32], index: 8, kind: input, shape index: {}]   ;;  %s3866_s9 = inlined_call_operand.vmem [shape: f32[1,32], index: 9, kind: input, shape index: {}]   ;;  %s3867_s10 = inlined_call_operand.vmem [shape: f32[1,32], index: 10, kind: input, shape index: {}]   ;;  %s3868_s11 = inlined_call_operand.vmem [shape: f32[32,64], index: 11, kind: input, shape index: {}]   ;;  %s3869_s12 = inlined_call_operand.vmem [shape: f32[1,64], index: 12, kind: input, shape index: {}]   ;;  %s3870_s13 = inlined_call_operand.vmem [shape: f32[64,32], index: 13, kind: input, shape index: {}]   ;;  %s3871_s14 = inlined_call_operand.vmem [shape: f32[1,32], index: 14, kind: input, shape index: {}]   ;;  %s3872_s15 = inlined_call_operand.vmem [shape: f32[1,32], index: 15, kind: input, shape index: {}]   ;;  %s3873_s16 = inlined_call_operand.vmem [shape: f32[1,32], index: 16, kind: input, shape index: {}]   ;;  %s3874_s17 = inlined_call_operand.vmem [shape: f32[2,8,32], index: 17, kind: output, shape index: {}]  }
   0x1   :  { %3876 = sst [smem:[#allocation2_spill]] %s3857_s0 }
   0x2   :  { %3877 = sst [smem:[#allocation3_spill]] %s3858_s1 }
   0x3 LB: > { %s2782_s25 = sadd.s32 4294967295, %s3335_s24   ;;  %p2786_p0 = scmp.ge.s32.totalorder %s3335_s24, 1  ;;  %s3335_s24 = sphi %s3430_s24, %s27_s24  }
   0x4   : > { %p486_p1 = scmp.lt.s32.totalorder %s3335_s24, 3 }
   0x6   : > { %p487_p2 = pnand %p2786_p0, %p486_p1 }
   0x7   : > { %v630_v0 = vld [vmem:[%s3860_s3] sm:$0xff] (!%p487_p2)  ;;  %v631_v1 = vld [vmem:[%s3860_s3 + $0x8] sm:$0xff] (!%p487_p2)  ;;  %s3878_s18 = sld [smem:[#allocation3_spill]] (!%p487_p2)  ;;  %v3337_v3 = vmov (!%p487_p2), 0.0|0.0   ;;  %v632_v6 = vld [vmem:[%s3860_s3 + $0x10] sm:$0xff] (!%p487_p2)  ;;  %p536_p3 = scmp.lt.s32.totalorder (!%p487_p2), %s2782_s25, 1 }
   0x8   : > { %490 = sbr.rel (%p487_p2) target bundleno = 4934 (0x1346), region = 88  ;;  %3214 = vmatprep.subr.bf16.mxu1 (!%p487_p2), %v3337_v3  ;;  %v3215_v4 = vpack.c.bf16 (!%p487_p2), %v631_v1, %v630_v0  ;;  %3208 = vmatprep.subr.bf16.mxu0 (!%p487_p2), %v3337_v3  ;;  %v633_v7 = vld [vmem:[%s3860_s3 + $0x18] sm:$0xff] (!%p487_p2)  ;;  %vm3338_vm0 = vmmov (!%p487_p2), 0   ;;  %v3339_v11 = vmov (!%p487_p2), 0.0   ;;  %v711_v14 = vld [vmem:[%s3862_s5] sm:$0xff] (!%p487_p2)  ;;  %v712_v15 = vld [vmem:[%s3862_s5 + $0x8] sm:$0xff] (!%p487_p2) }
   0x9   : > { %3005 = vmatprep.mubr.msk.f32.mxu1 (!%p487_p2), %vm3338_vm0, %v3339_v11  ;;  %2994 = vmatprep.mubr.msk.f32.mxu0 (!%p487_p2), %vm3338_vm0, %v3339_v11  ;;  %v3218_v12 = vpack.c.bf16 (!%p487_p2), %v633_v7, %v632_v6  ;;  %s3879_s23 = sld [smem:[#allocation2_spill]] (!%p487_p2)  ;;  %vm556_vm1 = vcmask (!%p487_p2), 261120   ;;  %v3221_v17 = vpack.c.bf16 (!%p487_p2), %v712_v15, %v711_v14  ;;  %v713_v18 = vld [vmem:[%s3862_s5 + $0x10] sm:$0xff] (!%p487_p2)  ;;  %v714_v19 = vld [vmem:[%s3862_s5 + $0x18] sm:$0xff] (!%p487_p2)  ;;  %v2791_v21 = vld [vmem:[%s3861_s4] ss:$0 sm:$0xff] (!%p487_p2) }
   0xa   : > { %3216 = vmatpush3.bf16.msra.mxu1 (!%p487_p2), %v3215_v4  ;;  %v3224_v20 = vpack.c.bf16 (!%p487_p2), %v714_v19, %v713_v18  ;;  %v2789_v22 = vld [vmem:[%s3859_s2] ss:$0 sm:$0xff] (!%p487_p2)  ;;  %vm792_vm2 = vcmask (!%p487_p2), 64512   ;;  %v2806_v50 = vld [vmem:[%s3860_s3 + $0x28] sm:$0xff] (!%p487_p2)  ;;  %v2807_v54 = vld [vmem:[%s3860_s3 + $0x30] sm:$0xff] (!%p487_p2)  ;;  %vm2624_vm3 = vcmask (!%p487_p2), 523264  }
   0xb   : > { %3217 = vmatprep.subr.bf16.mxu1 (!%p487_p2), %v3337_v3  ;;  %v2793_v29 = vld [vmem:[%s3863_s6] ss:$0 sm:$0xff] (!%p487_p2)  ;;  %v2808_v55 = vld [vmem:[%s3860_s3 + $0x38] sm:$0xff] (!%p487_p2)  ;;  %v2810_v61 = vld [vmem:[%s3861_s4 + $0x1] ss:$0 sm:$0xff] (!%p487_p2) }
   0xc   : > { %v2805_v49 = vld [vmem:[%s3860_s3 + $0x20] sm:$0xff] (!%p487_p2)  ;;  %v3236_v56 = vpack.c.bf16 (!%p487_p2), %v2808_v55, %v2807_v54  ;;  %v2814_v6 = vld [vmem:[%s3862_s5 + $0x30] sm:$0xff] (!%p487_p2) }
   0xd   : > { %v545_v2 = vld [vmem:[%s3878_s18] sm:$0xff] (!%p487_p2)  ;;  %v546_v5 = vld [vmem:[%s3878_s18 + $0x8] sm:$0xff] (!%p487_p2)  ;;  %v547_v9 = vld [vmem:[%s3878_s18 + $0x10] sm:$0xff] (!%p487_p2)  ;;  %v3233_v52 = vpack.c.bf16 (!%p487_p2), %v2806_v50, %v2805_v49 }
   0xe   : > { %v3209_v8 = vpack.c.bf16 (!%p487_p2), %v546_v5, %v545_v2  ;;  %v548_v10 = vld [vmem:[%s3878_s18 + $0x18] sm:$0xff] (!%p487_p2)  ;;  %3219 = vmatpush3.bf16.msra.mxu1 (!%p487_p2), %v3218_v12  ;;  %v2798_v42 = vld [vmem:[%s3878_s18 + $0x20] sm:$0xff] (!%p487_p2)  ;;  %v2799_v43 = vld [vmem:[%s3878_s18 + $0x28] sm:$0xff] (!%p487_p2) }
   0xf   : > { %s3881_s25 = smov (!%p536_p3, %s2782_s25), 1  ;;  %v3212_v13 = vpack.c.bf16 %v548_v10, %v547_v9  ;;  %3024 = vmatprep.subr.mxu1 %v3339_v11  ;;  %v3227_v44 = vpack.c.bf16 %v2799_v43, %v2798_v42  ;;  %v2800_v45 = vld [vmem:[%s3878_s18 + $0x30] sm:$0xff]  ;;  %v2801_v46 = vld [vmem:[%s3878_s18 + $0x38] sm:$0xff]  ;;  %v2803_v62 = vld [vmem:[%s3859_s2 + $0x1] ss:$0 sm:$0xff] }
  0x10   : > { %3210 = vmatpush3.bf16.msra.mxu0 %v3209_v8  ;;  %s2787_s0 = sshll.u32 %s3881_s25, 3  ;;  %v3230_v47 = vpack.c.bf16 %v2801_v46, %v2800_v45  ;;  %v2812_v4 = vld [vmem:[%s3862_s5 + $0x20] sm:$0xff]  ;;  %v2813_v5 = vld [vmem:[%s3862_s5 + $0x28] sm:$0xff]  ;;  %v2815_v8 = vld [vmem:[%s3862_s5 + $0x38] sm:$0xff] }
  0x11   : > { %3211 = vmatprep.subr.bf16.mxu0 %v3337_v3  ;;  %s539_s26 = scalar_lea.vmem %s3879_s23, %s2787_s0  ;;  %v3239_v7 = vpack.c.bf16 %v2813_v5, %v2812_v4  ;;  %v3242_v9 = vpack.c.bf16 %v2815_v8, %v2814_v6  ;;  %v2837_v46 = vld [vmem:[%s3861_s4 + $0x2] ss:$0 sm:$0xff]  ;;  %s543_s1 = scalar_lea.vmem %s3874_s17, %s2787_s0 }
  0x12   : > { %v3484_v16 = vld [vmem:[%s539_s26] sm:$0xff] }
  0x13   : > { %3006 = vmatmul.mubr.msk.f32.vlgmr.msra.gmra.mrb[0].mxu1 %vm556_vm1, %v3484_v16 }
  0x14   : > { %3213 = vmatpush3.bf16.msra.mxu0 %v3212_v13  ;;  %3026 = vmatprep.mubr.msk.f32.mxu1 %vm3338_vm0, %v3339_v11 }
  0x15   : > { %3220 = vmatprep.subr.bf16.mxu0 %v3337_v3 }
  0x17   : > { %2995 = vmatmul.mubr.msk.f32.vlgmr.msra.gmra.mrb[0].mxu0 %vm556_vm1, %v3484_v16 }
  0x18   : > { %3222 = vmatpush3.bf16.msra.mxu0 %v3221_v17  ;;  %3016 = vmatprep.mubr.msk.f32.mxu0 %vm3338_vm0, %v3339_v11 }
  0x19   : > { %3223 = vmatprep.subr.bf16.mxu0 %v3337_v3 }
  0x1c   : > { %3225 = vmatpush3.bf16.msra.mxu0 %v3224_v20 }
  0x1d   : > { %3019 = vmatprep.subr.mxu0 %v3339_v11 }
  0x1f   : > { %3017 = vmatmul.mubr.msk.f32.vlgmr.msra.gmra.mrb[2].mxu0 %vm556_vm1, %v3484_v16 }
  0x20   : > { %3021 = vmatprep.mubr.msk.f32.mxu0 %vm3338_vm0, %v3339_v11 }
  0xe6   : > { %v707_v23 = vpop.f32.mrb[0].mxu1 }
  0xe7   : > { %v708_v24 = vadd.f32 %v2791_v21, %v707_v23  ;;  %v3007_v25 = vpop.f32.mrb[1].mxu1 }
  0xe8   : > { %v2822_v25 = vld [vmem:[%s3864_s7 + $0x8] sm:$0xff] }
  0xe9   : > { %3020 = vmatpush3.xpose.msk.msra.mxu0 %vm792_vm2, %v708_v24 }
  0xea   : > { %v626_v26 = vpop.f32.mrb[0].mxu0  ;;  %3226 = vmatprep.subr.bf16.mxu0 %v3337_v3 }
  0xeb   : > { %v627_v27 = vadd.f32 %v2789_v22, %v626_v26  ;;  %v2996_v28 = vpop.f32.mrb[1].mxu0  ;;  %v2817_v22 = vld [vmem:[%s3863_s6 + $0x1] ss:$0 sm:$0xff] }
  0xed   : > { %3022 = vmatmul.mubr.msk.f32.vlgmr.msra.gmra.mrb[4].mxu0 %vm792_vm2, %v627_v27 }
  0xee   : > { %3037 = vmatprep.mubr.msk.f32.mxu0 %vm3338_vm0, %v3339_v11  ;;  %3228 = vmatpush3.bf16.msra.mxu0 %v3227_v44 }
  0xef   : > { %3229 = vmatprep.subr.bf16.mxu0 %v3337_v3 }
  0xf2   : > { %v788_v30 = vpop.f32.mrb[2].mxu0  ;;  %3231 = vmatpush3.bf16.msra.mxu0 %v3230_v47 }
  0xf3   : > { %v789_v31 = vadd.f32 %v2793_v29, %v788_v30  ;;  %v3018_v32 = vpop.f32.mrb[3].mxu0  ;;  %3238 = vmatprep.subr.bf16.mxu0 %v3337_v3  ;;  %v954_v29 = vld [vmem:[%s3864_s7] sm:$0xff] }
  0xf4   : > { %v2832_v30 = vld [vmem:[%s3860_s3 + $0x40] sm:$0xff] }
  0xf5   : > { %3025 = vmatpush3.msra.mxu1 %v789_v31  ;;  %3038 = vmatmul.mubr.msk.f32.vlgmr.msra.gmra.mrb[6].mxu0 %vm556_vm1, %v3484_v16  ;;  %v2833_v31 = vld [vmem:[%s3860_s3 + $0x48] sm:$0xff] }
  0xf6   : > { %3232 = vmatprep.subr.bf16.mxu1 %v3337_v3  ;;  %3059 = vmatprep.mubr.msk.f32.mxu0 %vm3338_vm0, %v3339_v11  ;;  %v3251_v32 = vpack.c.bf16 %v2833_v31, %v2832_v30 }
  0xf7   : > { %3240 = vmatpush3.bf16.msra.mxu0 %v3239_v7 }
  0xf8   : > { %3241 = vmatprep.subr.bf16.mxu0 %v3337_v3 }
  0xfb   : > { %3243 = vmatpush3.bf16.msra.mxu0 %v3242_v9 }
  0xfc   : > { %3072 = vmatprep.subr.mxu0 %v3339_v11 }
  0xfe   : > { %3060 = vmatmul.mubr.msk.f32.vlgmr.msra.gmra.mrb[8].mxu0 %vm556_vm1, %v3484_v16 }
  0xff   : > { %3074 = vmatprep.mubr.msk.f32.mxu0 %vm3338_vm0, %v3339_v11  ;;  %3073 = vmatpush3.msra.mxu0 %v2822_v25  ;;  %v2858_v25 = vld [vmem:[%s3860_s3 + $0x60] sm:$0xff] }
 0x100   : > { %3244 = vmatprep.subr.bf16.mxu0 %v3337_v3 }
 0x1c0   : > { %v865_v33 = vpop.f32.mrb[4].mxu0 }
 0x1c1   : > { %v869_v34 = vmul.f32 0.35355338, %v865_v33  ;;  %v3023_v35 = vpop.f32.mrb[5].mxu0  ;;  %v2834_v33 = vld [vmem:[%s3860_s3 + $0x50] sm:$0xff] }
 0x1c3   : > { %v870_v36 = vsel %vm792_vm2, %v869_v34, -inf }
 0x1c4   : > { %871 = vmax.xlane.f32.xlu0 %v870_v36  ;;  %v2825_v36 = vld [vmem:[%s3878_s18 + $0x40] sm:$0xff] }
 0x1c8   : > { %v1034_v57 = vpop.f32.mrb[6].mxu0 }
 0x1c9   : > { %v3039_v58 = vpop.f32.mrb[7].mxu0  ;;  %v1035_v2 = vadd.f32 %v2803_v62, %v1034_v57  ;;  %v2839_v57 = vld [vmem:[%s3862_s5 + $0x40] sm:$0xff] }
 0x1ca   : > { %v2840_v58 = vld [vmem:[%s3862_s5 + $0x48] sm:$0xff] }
 0x1d1   : > { %v1200_v21 = vpop.f32.mrb[8].mxu0 }
 0x1d2   : > { %v3061_v23 = vpop.f32.mrb[9].mxu0  ;;  %v1201_v24 = vadd.f32 %v2817_v22, %v1200_v21  ;;  %v2853_v22 = vld [vmem:[%s3878_s18 + $0x70] sm:$0xff] }
 0x1d3   : > { %v2854_v23 = vld [vmem:[%s3878_s18 + $0x78] sm:$0xff] }
 0x251   : > { %v872_v37 = vpop.xlane.xlu0 %871 }
 0x252   : > { %v873_v38 = vsub.f32 %v869_v34, %v872_v37  ;;  %v2835_v34 = vld [vmem:[%s3860_s3 + $0x58] sm:$0xff]  ;;  %v2826_v37 = vld [vmem:[%s3878_s18 + $0x48] sm:$0xff] }
 0x253   : > { %v3254_v35 = vpack.c.bf16 %v2835_v34, %v2834_v33 }
 0x254   : > { %v874_v39 = vmul.f32 1.442695, %v873_v38  ;;  %v3245_v38 = vpack.c.bf16 %v2826_v37, %v2825_v36 }
 0x256   : > { %3309 = vpow2.f32 %v874_v39  ;;  %v2827_v39 = vld [vmem:[%s3878_s18 + $0x50] sm:$0xff] }
 0x260   : > { %v3310_v40 = vpop.eup %3309 }
 0x261   : > { %v876_v41 = vsel %vm792_vm2, %v3310_v40, 0.0 }
 0x262   : > { %877 = vadd.xlane.f32.xlu0 %v876_v41 }
 0x2ef   : > { %v878_v48 = vpop.xlane.xlu0 %877 }
 0x2f0   : > { %3311 = vrcp.f32 %v878_v48 }
 0x2fa   : > { %v3312_v51 = vpop.eup %3311 }
 0x2fb   : > { %v880_v53 = vmul.f32 %v3312_v51, %v3310_v40  ;;  %v2828_v40 = vld [vmem:[%s3878_s18 + $0x58] sm:$0xff] }
 0x2fc   : > { %v3248_v43 = vpack.c.bf16 %v2828_v40, %v2827_v39  ;;  %v2856_v39 = vld [vmem:[%s3859_s2 + $0x3] ss:$0 sm:$0xff] }
 0x2fd   : > { %3027 = vmatmul.mubr.msk.f32.vlgmr.msra.gmra.mrb[2].mxu1 %vm792_vm2, %v880_v53  ;;  %v2830_v53 = vld [vmem:[%s3859_s2 + $0x2] ss:$0 sm:$0xff] }
 0x2fe   : > { %3234 = vmatpush3.bf16.msra.mxu1 %v3233_v52  ;;  %3048 = vmatprep.mubr.msk.f32.mxu1 %vm3338_vm0, %v3339_v11 }
 0x2ff   : > { %3235 = vmatprep.subr.bf16.mxu1 %v3337_v3 }
 0x302   : > { %3237 = vmatpush3.bf16.msra.mxu1 %v3236_v56 }
 0x303   : > { %3062 = vmatprep.subr.mxu1 %v3339_v11 }
 0x305   : > { %3049 = vmatmul.mubr.msk.f32.vlgmr.msra.gmra.mrb[4].mxu1 %vm556_vm1, %v3484_v16 }
 0x306   : > { %3064 = vmatprep.mubr.msk.f32.mxu1 %vm3338_vm0, %v3339_v11 }
 0x3d0   : > { %v950_v59 = vpop.f32.mrb[2].mxu1 }
 0x3d1   : > { %v3028_v60 = vpop.f32.mrb[3].mxu1 }
 0x3d2   : > { %v3257_v60 = vpack.c.bf16 %v2840_v58, %v2839_v57 }
 0x3d8   : > { %v1117_v63 = vpop.f32.mrb[4].mxu1 }
 0x3d9   : > { %v1118_v0 = vadd.f32 %v2810_v61, %v1117_v63  ;;  %v3050_v1 = vpop.f32.mrb[5].mxu1  ;;  %v2842_v61 = vld [vmem:[%s3862_s5 + $0x58] sm:$0xff] }
 0x3db   : > { %3063 = vmatpush3.xpose.msk.msra.mxu1 %vm792_vm2, %v1118_v0 }
 0x3dc   : > { %3067 = vmatprep.subr.mxu1 %v3339_v11 }
 0x3de   : > { %3065 = vmatmul.mubr.msk.f32.vlgmr.msra.gmra.mrb[6].mxu1 %vm792_vm2, %v1035_v2 }
 0x3df   : > { %3069 = vmatprep.mubr.msk.f32.mxu1 %vm3338_vm0, %v3339_v11  ;;  %3068 = vmatpush3.msra.mxu1 %v1201_v24  ;;  %v3266_v24 = vpack.c.bf16 %v2854_v23, %v2853_v22  ;;  %v2527_v22 = vld [vmem:[%s3868_s11 + $0x18] sm:$0xff] }
 0x3e0   : > { %3077 = vmatprep.subr.mxu1 %v3339_v11 }
 0x4b1   : > { %v1276_v10 = vpop.f32.mrb[6].mxu1 }
 0x4b2   : > { %v1280_v12 = vmul.f32 0.35355338, %v1276_v10  ;;  %v3066_v13 = vpop.f32.mrb[7].mxu1  ;;  %v2844_v10 = vld [vmem:[%s3863_s6 + $0x2] ss:$0 sm:$0xff] }
 0x4b4   : > { %v1281_v14 = vsel %vm792_vm2, %v1280_v12, -inf }
 0x4b5   : > { %1282 = vmax.xlane.f32.xlu1 %v1281_v14  ;;  %v2849_v14 = vld [vmem:[%s3864_s7 + $0x10] sm:$0xff] }
 0x542   : > { %v1283_v15 = vpop.xlane.xlu1 %1282 }
 0x543   : > { %v1284_v17 = vsub.f32 %v1280_v12, %v1283_v15 }
 0x545   : > { %v1285_v18 = vmul.f32 1.442695, %v1284_v17 }
 0x547   : > { %3313 = vpow2.f32 %v1285_v18 }
 0x551   : > { %v3314_v19 = vpop.eup %3313 }
 0x552   : > { %v1287_v20 = vsel %vm792_vm2, %v3314_v19, 0.0 }
 0x553   : > { %1288 = vadd.xlane.f32.xlu1 %v1287_v20  ;;  %v2852_v20 = vld [vmem:[%s3878_s18 + $0x68] sm:$0xff] }
 0x5e0   : > { %v1289_v26 = vpop.xlane.xlu1 %1288 }
 0x5e1   : > { %3315 = vrcp.f32 %v1289_v26  ;;  %v2859_v26 = vld [vmem:[%s3860_s3 + $0x68] sm:$0xff] }
 0x5eb   : > { %v3316_v27 = vpop.eup %3315 }
 0x5ec   : > { %v1291_v28 = vmul.f32 %v3316_v27, %v3314_v19  ;;  %v2851_v19 = vld [vmem:[%s3878_s18 + $0x60] sm:$0xff]  ;;  %v3269_v27 = vpack.c.bf16 %v2859_v26, %v2858_v25  ;;  %v2610_v25 = vld [vmem:[%s3870_s13 + $0x8] sm:$0xff]  ;;  %v2611_v26 = vld [vmem:[%s3870_s13 + $0x10] sm:$0xff] }
 0x5ed   : > { %v3263_v21 = vpack.c.bf16 %v2852_v20, %v2851_v19  ;;  %v2525_v20 = vld [vmem:[%s3868_s11 + $0x8] sm:$0xff] }
 0x5ee   : > { %3070 = vmatmul.mubr.msk.f32.vlgmr.msra.gmra.mrb[8].mxu1 %vm792_vm2, %v1291_v28  ;;  %v2860_v28 = vld [vmem:[%s3860_s3 + $0x70] sm:$0xff] }
 0x5ef   : > { %3078 = vmatpush3.msra.mxu1 %v954_v29  ;;  %3079 = vmatprep.mubr.msk.f32.mxu1 %vm3338_vm0, %v3339_v11  ;;  %v2861_v29 = vld [vmem:[%s3860_s3 + $0x78] sm:$0xff] }
 0x5f0   : > { %3250 = vmatprep.subr.bf16.mxu1 %v3337_v3 }
 0x5f2   : > { %3080 = vmatmul.mubr.msk.f32.vlgmr.msra.gmra.mrb[10].mxu1 %vm792_vm2, %v950_v59  ;;  %v2841_v59 = vld [vmem:[%s3862_s5 + $0x50] sm:$0xff] }
 0x5f3   : > { %3252 = vmatpush3.bf16.msra.mxu1 %v3251_v32  ;;  %3101 = vmatprep.mubr.msk.f32.mxu1 %vm3338_vm0, %v3339_v11  ;;  %v3260_v62 = vpack.c.bf16 %v2842_v61, %v2841_v59  ;;  %v3272_v32 = vpack.c.bf16 %v2861_v29, %v2860_v28  ;;  %v2612_v28 = vld [vmem:[%s3870_s13 + $0x18] sm:$0xff] }
 0x5f4   : > { %3253 = vmatprep.subr.bf16.mxu1 %v3337_v3  ;;  %v3290_v29 = vpack.c.bf16 %v2612_v28, %v2611_v26 }
 0x5f7   : > { %3255 = vmatpush3.bf16.msra.mxu1 %v3254_v35 }
 0x5f8   : > { %3115 = vmatprep.subr.mxu1 %v3339_v11 }
 0x5fa   : > { %3102 = vmatmul.mubr.msk.f32.vlgmr.msra.gmra.mrb[12].mxu1 %vm556_vm1, %v3484_v16 }
 0x5fb   : > { %3117 = vmatprep.mubr.msk.f32.mxu1 %vm3338_vm0, %v3339_v11 }
 0x6c1   : > { %v1361_v41 = vpop.f32.mrb[8].mxu1 }
 0x6c2   : > { %v3071_v42 = vpop.f32.mrb[9].mxu1  ;;  %3075 = vmatmul.mubr.msk.f32.vlgmr.msra.gmra.mrb[10].mxu0 %vm792_vm2, %v1361_v41 }
 0x6c3   : > { %3246 = vmatpush3.bf16.msra.mxu0 %v3245_v38  ;;  %3090 = vmatprep.mubr.msk.f32.mxu0 %vm3338_vm0, %v3339_v11  ;;  %v2863_v38 = vld [vmem:[%s3861_s4 + $0x3] ss:$0 sm:$0xff] }
 0x6c4   : > { %3247 = vmatprep.subr.bf16.mxu0 %v3337_v3 }
 0x6c5   : > { %v1509_v44 = vpop.f32.mrb[10].mxu1 }
 0x6c6   : > { %v3081_v45 = vpop.f32.mrb[11].mxu1 }
 0x6c7   : > { %3249 = vmatpush3.bf16.msra.mxu0 %v3248_v43  ;;  %v2866_v45 = vld [vmem:[%s3862_s5 + $0x68] sm:$0xff] }
 0x6c8   : > { %3256 = vmatprep.subr.bf16.mxu0 %v3337_v3 }
 0x6ca   : > { %3091 = vmatmul.mubr.msk.f32.vlgmr.msra.gmra.mrb[12].mxu0 %vm556_vm1, %v3484_v16 }
 0x6cb   : > { %3112 = vmatprep.mubr.msk.f32.mxu0 %vm3338_vm0, %v3339_v11  ;;  %3258 = vmatpush3.bf16.msra.mxu0 %v3257_v60  ;;  %v2870_v60 = vld [vmem:[%s3863_s6 + $0x3] ss:$0 sm:$0xff] }
 0x6cc   : > { %3259 = vmatprep.subr.bf16.mxu0 %v3337_v3 }
 0x6cd   : > { %v1675_v47 = vpop.f32.mrb[12].mxu1 }
 0x6ce   : > { %v1676_v48 = vadd.f32 %v2837_v46, %v1675_v47  ;;  %v3103_v49 = vpop.f32.mrb[13].mxu1  ;;  %v2867_v46 = vld [vmem:[%s3862_s5 + $0x70] sm:$0xff] }
 0x6cf   : > { %3261 = vmatpush3.bf16.msra.mxu0 %v3260_v62 }
 0x6d0   : > { %3116 = vmatpush3.xpose.msk.msra.mxu1 %vm792_vm2, %v1676_v48  ;;  %3125 = vmatprep.subr.mxu0 %v3339_v11  ;;  %v2868_v48 = vld [vmem:[%s3862_s5 + $0x78] sm:$0xff] }
 0x6d1   : > { %3120 = vmatprep.subr.mxu1 %v3339_v11  ;;  %v3278_v49 = vpack.c.bf16 %v2868_v48, %v2867_v46 }
 0x6d2   : > { %3113 = vmatmul.mubr.msk.f32.vlgmr.msra.gmra.mrb[14].mxu0 %vm556_vm1, %v3484_v16 }
 0x6d3   : > { %3127 = vmatprep.mubr.msk.f32.mxu0 %vm3338_vm0, %v3339_v11  ;;  %3126 = vmatpush3.msra.mxu0 %v2849_v14 }
 0x6d4   : > { %3268 = vmatprep.subr.bf16.mxu0 %v3337_v3 }
 0x795   : > { %v1436_v50 = vpop.f32.mrb[10].mxu0 }
 0x796   : > { %v3657_v51 = vadd.f32 %v1509_v44, %v1436_v50  ;;  %v3076_v52 = vpop.f32.mrb[11].mxu0  ;;  %v2865_v44 = vld [vmem:[%s3862_s5 + $0x60] sm:$0xff] }
 0x797   : > { %v3275_v47 = vpack.c.bf16 %v2866_v45, %v2865_v44  ;;  %v2880_v44 = vld [vmem:[%s3869_s12] ss:$0 sm:$0xff] }
 0x79d   : > { %v1592_v54 = vpop.f32.mrb[12].mxu0 }
 0x79e   : > { %v1593_v55 = vadd.f32 %v2830_v53, %v1592_v54  ;;  %v3092_v56 = vpop.f32.mrb[13].mxu0 }
 0x7a0   : > { %3118 = vmatmul.mubr.msk.f32.vlgmr.msra.gmra.mrb[14].mxu1 %vm792_vm2, %v1593_v55 }
 0x7a1   : > { %3122 = vmatprep.mubr.msk.f32.mxu1 %vm3338_vm0, %v3339_v11 }
 0x7a5   : > { %v1758_v9 = vpop.f32.mrb[14].mxu0 }
 0x7a6   : > { %v3114_v12 = vpop.f32.mrb[15].mxu0  ;;  %v1759_v13 = vadd.f32 %v2844_v10, %v1758_v9 }
 0x7a8   : > { %3121 = vmatpush3.msra.mxu1 %v1759_v13 }
 0x7a9   : > { %3262 = vmatprep.subr.bf16.mxu1 %v3337_v3 }
 0x873   : > { %v1834_v63 = vpop.f32.mrb[14].mxu1 }
 0x874   : > { %v1838_v0 = vmul.f32 0.35355338, %v1834_v63  ;;  %v3119_v1 = vpop.f32.mrb[15].mxu1  ;;  %v2875_v63 = vld [vmem:[%s3864_s7 + $0x18] sm:$0xff] }
 0x876   : > { %v1839_v2 = vsel %vm792_vm2, %v1838_v0, -inf }
 0x877   : > { %1840 = vmax.xlane.f32.xlu0 %v1839_v2 }
 0x904   : > { %v1841_v4 = vpop.xlane.xlu0 %1840 }
 0x905   : > { %v1842_v5 = vsub.f32 %v1838_v0, %v1841_v4 }
 0x907   : > { %v1843_v6 = vmul.f32 1.442695, %v1842_v5 }
 0x909   : > { %3317 = vpow2.f32 %v1843_v6 }
 0x913   : > { %v3318_v7 = vpop.eup %3317 }
 0x914   : > { %v1845_v8 = vsel %vm792_vm2, %v3318_v7, 0.0 }
 0x915   : > { %1846 = vadd.xlane.f32.xlu1 %v1845_v8 }
 0x9a2   : > { %v1847_v15 = vpop.xlane.xlu1 %1846 }
 0x9a3   : > { %3319 = vrcp.f32 %v1847_v15 }
 0x9ad   : > { %v3320_v17 = vpop.eup %3319 }
 0x9ae   : > { %v1849_v18 = vmul.f32 %v3320_v17, %v3318_v7  ;;  %v2877_v7 = vld [vmem:[%s3865_s8] ss:$0 sm:$0xff] }
 0x9b0   : > { %3123 = vmatmul.mubr.msk.f32.vlgmr.msra.gmra.mrb[16].mxu1 %vm792_vm2, %v1849_v18 }
 0x9b1   : > { %3138 = vmatprep.mubr.msk.f32.mxu1 %vm3338_vm0, %v3339_v11  ;;  %3264 = vmatpush3.bf16.msra.mxu1 %v3263_v21 }
 0x9b2   : > { %3265 = vmatprep.subr.bf16.mxu1 %v3337_v3 }
 0x9b5   : > { %3267 = vmatpush3.bf16.msra.mxu1 %v3266_v24  ;;  %v2609_v24 = vld [vmem:[%s3870_s13] sm:$0xff] }
 0x9b6   : > { %3274 = vmatprep.subr.bf16.mxu1 %v3337_v3 }
 0x9b8   : > { %3139 = vmatmul.mubr.msk.f32.vlgmr.msra.gmra.mrb[18].mxu1 %vm556_vm1, %v3484_v16 }
 0x9b9   : > { %3160 = vmatprep.mubr.msk.f32.mxu1 %vm3338_vm0, %v3339_v11  ;;  %3276 = vmatpush3.bf16.msra.mxu1 %v3275_v47 }
 0x9ba   : > { %3277 = vmatprep.subr.bf16.mxu1 %v3337_v3 }
 0x9bd   : > { %3279 = vmatpush3.bf16.msra.mxu1 %v3278_v49  ;;  %v2882_v49 = vld [vmem:[%s3871_s14] ss:$0 sm:$0xff] }
 0x9be   : > { %3173 = vmatprep.subr.mxu1 %v3339_v11 }
 0x9c0   : > { %3161 = vmatmul.mubr.msk.f32.vlgmr.msra.gmra.mrb[20].mxu1 %vm556_vm1, %v3484_v16 }
 0x9c1   : > { %3175 = vmatprep.mubr.msk.f32.mxu1 %vm3338_vm0, %v3339_v11  ;;  %3174 = vmatpush3.msra.mxu1 %v2875_v63 }
 0x9c2   : > { %3286 = vmatprep.subr.bf16.mxu1 %v3337_v3 }
 0xa83   : > { %v1919_v30 = vpop.f32.mrb[16].mxu1 }
 0xa84   : > { %v3124_v31 = vpop.f32.mrb[17].mxu1  ;;  %3128 = vmatmul.mubr.msk.f32.vlgmr.msra.gmra.mrb[16].mxu0 %vm792_vm2, %v1919_v30  ;;  %v2613_v30 = vld [vmem:[%s3870_s13 + $0x20] sm:$0xff] }
 0xa85   : > { %3270 = vmatpush3.bf16.msra.mxu0 %v3269_v27  ;;  %3149 = vmatprep.mubr.msk.f32.mxu0 %vm3338_vm0, %v3339_v11  ;;  %v3287_v27 = vpack.c.bf16 %v2610_v25, %v2609_v24  ;;  %v2614_v31 = vld [vmem:[%s3870_s13 + $0x28] sm:$0xff] }
 0xa86   : > { %3271 = vmatprep.subr.bf16.mxu0 %v3337_v3 }
 0xa89   : > { %3273 = vmatpush3.bf16.msra.mxu0 %v3272_v32  ;;  %v3293_v32 = vpack.c.bf16 %v2614_v31, %v2613_v30 }
 0xa8a   : > { %3163 = vmatprep.subr.mxu0 %v3339_v11 }
 0xa8b   : > { %v2078_v33 = vpop.f32.mrb[18].mxu1 }
 0xa8c   : > { %3150 = vmatmul.mubr.msk.f32.vlgmr.msra.gmra.mrb[18].mxu0 %vm556_vm1, %v3484_v16  ;;  %v3140_v34 = vpop.f32.mrb[19].mxu1  ;;  %v2079_v43 = vadd.f32 %v2856_v39, %v2078_v33  ;;  %v2879_v39 = vld [vmem:[%s3867_s10] ss:$0 sm:$0xff] }
 0xa8d   : > { %3165 = vmatprep.mubr.msk.f32.mxu0 %vm3338_vm0, %v3339_v11 }
 0xa93   : > { %v2244_v59 = vpop.f32.mrb[20].mxu1 }
 0xa94   : > { %v3162_v61 = vpop.f32.mrb[21].mxu1  ;;  %v2245_v62 = vadd.f32 %v2870_v60, %v2244_v59 }
 0xb57   : > { %v1994_v35 = vpop.f32.mrb[16].mxu0 }
 0xb58   : > { %v1998_v36 = vadd.f32 %v1994_v35, %v3657_v51  ;;  %v3129_v37 = vpop.f32.mrb[17].mxu0 }
 0xb59   : > { %v2878_v37 = vld [vmem:[%s3866_s9] ss:$0 sm:$0xff] }
 0xb5f   : > { %v2161_v40 = vpop.f32.mrb[18].mxu0 }
 0xb60   : > { %v2162_v41 = vadd.f32 %v2863_v38, %v2161_v40  ;;  %v3151_v42 = vpop.f32.mrb[19].mxu0 }
 0xb61   : > { %v2616_v42 = vld [vmem:[%s3870_s13 + $0x38] sm:$0xff] }
 0xb62   : > { %3164 = vmatpush3.xpose.msk.msra.mxu0 %vm792_vm2, %v2162_v41 }
 0xb63   : > { %3168 = vmatprep.subr.mxu0 %v3339_v11 }
 0xb65   : > { %3166 = vmatmul.mubr.msk.f32.vlgmr.msra.gmra.mrb[20].mxu0 %vm792_vm2, %v2079_v43 }
 0xb66   : > { %3170 = vmatprep.mubr.msk.f32.mxu0 %vm3338_vm0, %v3339_v11  ;;  %3169 = vmatpush3.msra.mxu0 %v2245_v62 }
 0xb67   : > { %3280 = vmatprep.subr.bf16.mxu0 %v3337_v3 }
 0xc38   : > { %v2320_v50 = vpop.f32.mrb[20].mxu0 }
 0xc39   : > { %v2324_v51 = vmul.f32 0.35355338, %v2320_v50  ;;  %v3167_v52 = vpop.f32.mrb[21].mxu0 }
 0xc3b   : > { %v2325_v53 = vsel %vm792_vm2, %v2324_v51, -inf }
 0xc3c   : > { %2326 = vmax.xlane.f32.xlu0 %v2325_v53 }
 0xcc9   : > { %v2327_v54 = vpop.xlane.xlu0 %2326 }
 0xcca   : > { %v2328_v55 = vsub.f32 %v2324_v51, %v2327_v54 }
 0xccc   : > { %v2329_v56 = vmul.f32 1.442695, %v2328_v55 }
 0xcce   : > { %3321 = vpow2.f32 %v2329_v56 }
 0xcd8   : > { %v3322_v57 = vpop.eup %3321 }
 0xcd9   : > { %v2331_v58 = vsel %vm792_vm2, %v3322_v57, 0.0 }
 0xcda   : > { %2332 = vadd.xlane.f32.xlu1 %v2331_v58 }
 0xd67   : > { %v2333_v0 = vpop.xlane.xlu1 %2332 }
 0xd68   : > { %3323 = vrcp.f32 %v2333_v0  ;;  %v2884_v0 = vld [vmem:[%s3872_s15] ss:$0 sm:$0xff] }
 0xd72   : > { %v3324_v1 = vpop.eup %3323 }
 0xd73   : > { %v2335_v2 = vmul.f32 %v3324_v1, %v3322_v57 }
 0xd75   : > { %3171 = vmatmul.mubr.msk.f32.vlgmr.msra.gmra.mrb[22].mxu0 %vm792_vm2, %v2335_v2  ;;  %v2885_v2 = vld [vmem:[%s3873_s16] ss:$0 sm:$0xff] }
 0xd76   : > { %3186 = vmatprep.mubr.msk.f32.mxu0 %vm3338_vm0, %v3339_v11 }
 0xe48   : > { %v2405_v4 = vpop.f32.mrb[22].mxu0 }
 0xe49   : > { %v3172_v5 = vpop.f32.mrb[23].mxu0  ;;  %3176 = vmatmul.mubr.msk.f32.vlgmr.msra.gmra.mrb[22].mxu1 %vm792_vm2, %v2405_v4 }
 0xe4a   : > { %3205 = vmatprep.mubr.msk.f32.mxu1 %vm3338_vm0, %v3339_v11  ;;  %v2524_v11 = vld [vmem:[%s3868_s11] sm:$0xff]  ;;  %3288 = vmatpush3.bf16.msra.mxu1 %v3287_v27 }
 0xe4b   : > { %v3281_v21 = vpack.c.bf16 %v2525_v20, %v2524_v11  ;;  %3289 = vmatprep.subr.bf16.mxu1 %v3337_v3 }
 0xe4d   : > { %3282 = vmatpush3.bf16.msra.mxu0 %v3281_v21 }
 0xe4e   : > { %3283 = vmatprep.subr.bf16.mxu0 %v3337_v3  ;;  %3291 = vmatpush3.bf16.msra.mxu1 %v3290_v29 }
 0xe4f   : > { %3292 = vmatprep.subr.bf16.mxu1 %v3337_v3 }
 0xe52   : > { %3294 = vmatpush3.bf16.msra.mxu1 %v3293_v32 }
 0xe53   : > { %3295 = vmatprep.subr.bf16.mxu1 %v3337_v3  ;;  %v2615_v3 = vld [vmem:[%s3870_s13 + $0x30] sm:$0xff] }
 0xe54   : > { %v3296_v43 = vpack.c.bf16 %v2616_v42, %v2615_v3 }
 0xe56   : > { %3297 = vmatpush3.bf16.msra.mxu1 %v3296_v43 }
 0xf1c   : > { %v2480_v6 = vpop.f32.mrb[22].mxu1 }
 0xf1d   : > { %v2484_v8 = vadd.f32 %v2480_v6, %v1998_v36  ;;  %v3177_v9 = vpop.f32.mrb[23].mxu1 }
 0xf1f   : > { %v2492_v10 = vadd.f32 %v2877_v7, %v2484_v8 }
 0xf21   : > { %v2493_v12 = vadd.f32 %v2492_v10, %v3484_v16  ;;  %v2526_v16 = vld [vmem:[%s3868_s11 + $0x10] sm:$0xff] }
 0xf22   : > { %v3284_v23 = vpack.c.bf16 %v2527_v22, %v2526_v16 }
 0xf23   : > { %v2496_v13 = vsel %vm556_vm1, %v2493_v12, 0.0 }
 0xf24   : > { %2497 = vadd.xlane.f32.xlu0 %v2496_v13  ;;  %3285 = vmatpush3.bf16.msra.mxu0 %v3284_v23 }
 0xfb1   : > { %v2498_v14 = vpop.xlane.xlu0 %2497 }
 0xfb2   : > { %v2500_v15 = vmul.f32 0.03125, %v2498_v14 }
 0xfb4   : > { %v2501_v17 = vsub.f32 %v2493_v12, %v2500_v15 }
 0xfb6   : > { %v2502_v18 = vmul.f32 %v2501_v17, %v2501_v17 }
 0xfb8   : > { %v2503_v19 = vsel %vm556_vm1, %v2502_v18, 0.0 }
 0xfb9   : > { %2504 = vadd.xlane.f32.xlu1 %v2503_v19 }
0x1046   : > { %v2505_v33 = vpop.xlane.xlu1 %2504 }
0x1047   : > { %v2506_v34 = vmul.f32 0.03125, %v2505_v33 }
0x1049   : > { %v2507_v35 = vadd.f32 1e-05, %v2506_v34 }
0x104b   : > { %3325 = vrsqrt.f32 %v2507_v35 }
0x1055   : > { %v3326_v36 = vpop.eup %3325 }
0x1056   : > { %v2509_v38 = vmul.f32 %v3326_v36, %v2501_v17 }
0x1058   : > { %v2516_v40 = vmul.f32 %v2878_v37, %v2509_v38 }
0x105a   : > { %v2523_v41 = vadd.f32 %v2879_v39, %v2516_v40 }
0x105c   : > { %3187 = vmatmul.mubr.msk.f32.vlgmr.msra.gmra.mrb[24].mxu0 %vm556_vm1, %v2523_v41 }
0x112f   : > { %v2604_v45 = vpop.f32.mrb[24].mxu0 }
0x1130   : > { %v2605_v46 = vadd.f32 %v2880_v44, %v2604_v45  ;;  %v3188_v47 = vpop.f32.mrb[25].mxu0 }
0x1132   : > { %v2608_v48 = vmax.f32 %v2605_v46, 0.0 }
0x1134   : > { %3206 = vmatmul.mubr.msk.f32.vlgmr.msra.gmra.mrb[24].mxu1 %vm2624_vm3, %v2608_v48 }
0x1207   : > { %v2694_v50 = vpop.f32.mrb[24].mxu1 }
0x1208   : > { %v2695_v51 = vadd.f32 %v2882_v49, %v2694_v50  ;;  %v3207_v52 = vpop.f32.mrb[25].mxu1 }
0x120a   : > { %v2698_v53 = vadd.f32 %v2695_v51, %v2523_v41 }
0x120c   : > { %v2701_v54 = vsel %vm556_vm1, %v2698_v53, 0.0 }
0x120d   : > { %2702 = vadd.xlane.f32.xlu0 %v2701_v54 }
0x129a   : > { %v2703_v55 = vpop.xlane.xlu0 %2702 }
0x129b   : > { %v2704_v56 = vmul.f32 0.03125, %v2703_v55 }
0x129d   : > { %v2705_v57 = vsub.f32 %v2698_v53, %v2704_v56 }
0x129f   : > { %v2706_v58 = vmul.f32 %v2705_v57, %v2705_v57 }
0x12a1   : > { %v2707_v59 = vsel %vm556_vm1, %v2706_v58, 0.0 }
0x12a2   : > { %2708 = vadd.xlane.f32.xlu1 %v2707_v59 }
0x132f   : > { %v2709_v60 = vpop.xlane.xlu1 %2708 }
0x1330   : > { %v2710_v61 = vmul.f32 0.03125, %v2709_v60 }
0x1332   : > { %v2711_v62 = vadd.f32 1e-05, %v2710_v61 }
0x1334   : > { %3327 = vrsqrt.f32 %v2711_v62 }
0x133e   : > { %v3328_v63 = vpop.eup %3327 }
0x133f   : > { %v2713_v1 = vmul.f32 %v3328_v63, %v2705_v57 }
0x1341   : > { %v2720_v4 = vmul.f32 %v2884_v0, %v2713_v1 }
0x1343   : > { %v2727_v5 = vadd.f32 %v2885_v2, %v2720_v4 }
0x1345   : > { %2728 = vst.msk [vmem:[%s543_s1] sm:$0xff] %vm556_vm1, %v2727_v5 }
0x1346 PF: > { %s27_s24 = sadd.s32 1, %s3335_s24  }
0x1347   : > { %p24_p4 = scmp.ge.s32.totalorder %s27_s24, 4  }
0x1349   :  { %26 = sbr.rel (!%p24_p4) target bundleno = 3 (0x3), region = 139 }

// kernel: my_transformer_forward.9
= control target key start
LH: loop header
LB: loop body
LE: loop exit
PB: predicated region body
PF: predicated region fallthrough
CT: control target
= control target key end

     0   :  { %s7752_s0 = inlined_call_operand.vmem [shape: f32[2,10,32], index: 0, kind: input, shape index: {}]   ;;  %s7753_s1 = inlined_call_operand.vmem [shape: f32[2,8,32], index: 1, kind: input, shape index: {}]   ;;  %s7754_s2 = inlined_call_operand.vmem [shape: f32[4,32,8], index: 2, kind: input, shape index: {}]   ;;  %s7755_s3 = inlined_call_operand.vmem [shape: f32[4,1,8], index: 3, kind: input, shape index: {}]   ;;  %s7756_s4 = inlined_call_operand.vmem [shape: f32[4,32,8], index: 4, kind: input, shape index: {}]   ;;  %s7757_s5 = inlined_call_operand.vmem [shape: f32[4,1,8], index: 5, kind: input, shape index: {}]   ;;  %s7758_s6 = inlined_call_operand.vmem [shape: f32[4,32,8], index: 6, kind: input, shape index: {}]   ;;  %s7759_s7 = inlined_call_operand.vmem [shape: f32[4,1,8], index: 7, kind: input, shape index: {}]   ;;  %s7760_s8 = inlined_call_operand.vmem [shape: f32[4,8,32], index: 8, kind: input, shape index: {}]   ;;  %s7761_s9 = inlined_call_operand.vmem [shape: f32[1,32], index: 9, kind: input, shape index: {}]   ;;  %s7762_s10 = inlined_call_operand.vmem [shape: f32[1,32], index: 10, kind: input, shape index: {}]   ;;  %s7763_s11 = inlined_call_operand.vmem [shape: f32[1,32], index: 11, kind: input, shape index: {}]   ;;  %s7764_s12 = inlined_call_operand.vmem [shape: f32[4,32,8], index: 12, kind: input, shape index: {}]   ;;  %s7765_s13 = inlined_call_operand.vmem [shape: f32[4,1,8], index: 13, kind: input, shape index: {}]   ;;  %s7766_s14 = inlined_call_operand.vmem [shape: f32[4,32,8], index: 14, kind: input, shape index: {}]   ;;  %s7767_s15 = inlined_call_operand.vmem [shape: f32[4,1,8], index: 15, kind: input, shape index: {}]   ;;  %s7768_s16 = inlined_call_operand.vmem [shape: f32[4,32,8], index: 16, kind: input, shape index: {}]   ;;  %s7769_s17 = inlined_call_operand.vmem [shape: f32[4,1,8], index: 17, kind: input, shape index: {}]   ;;  %s7770_s18 = inlined_call_operand.vmem [shape: f32[4,8,32], index: 18, kind: input, shape index: {}]   ;;  %s7771_s19 = inlined_call_operand.vmem [shape: f32[1,32], index: 19, kind: input, shape index: {}]   ;;  %s7772_s20 = inlined_call_operand.vmem [shape: f32[1,32], index: 20, kind: input, shape index: {}]   ;;  %s7773_s21 = inlined_call_operand.vmem [shape: f32[1,32], index: 21, kind: input, shape index: {}]   ;;  %s7774_s22 = inlined_call_operand.vmem [shape: f32[32,64], index: 22, kind: input, shape index: {}]   ;;  %s7775_s23 = inlined_call_operand.vmem [shape: f32[1,64], index: 23, kind: input, shape index: {}]   ;;  %s7776_s24 = inlined_call_operand.vmem [shape: f32[64,32], index: 24, kind: input, shape index: {}]   ;;  %s7777_s25 = inlined_call_operand.vmem [shape: f32[1,32], index: 25, kind: input, shape index: {}]   ;;  %s7778_s26 = inlined_call_operand.vmem [shape: f32[1,32], index: 26, kind: input, shape index: {}]   ;;  %s7779_s27 = inlined_call_operand.vmem [shape: f32[1,32], index: 27, kind: input, shape index: {}]   ;;  %s7780_s28 = inlined_call_operand.vmem [shape: f32[2,10,32], index: 28, kind: output, shape index: {}]  }
   0x1   :  { %7793 = sst [smem:[#allocation3_spill]] %s7752_s0 }
   0x2   :  { %7794 = sst [smem:[#allocation4_spill]] %s7753_s1 }
   0x3   :  { %7795 = sst [smem:[#allocation5_spill]] %s7754_s2 }
   0x4   :  { %7796 = sst [smem:[#allocation6_spill]] %s7755_s3 }
   0x5   :  { %7797 = sst [smem:[#allocation7_spill]] %s7756_s4 }
   0x6   :  { %7798 = sst [smem:[#allocation8_spill]] %s7757_s5 }
   0x7   :  { %7799 = sst [smem:[#allocation9_spill]] %s7758_s6 }
   0x8   :  { %7800 = sst [smem:[#allocation10_spill]] %s7759_s7 }
   0x9   :  { %7801 = sst [smem:[#allocation11_spill]] %s7760_s8  ;;  %s6990_s8 = smov 0  }
   0xa   :  { %7802 = sst [smem:[#allocation12_spill]] %s7761_s9 }
   0xb   :  { %7803 = sst [smem:[#allocation13_spill]] %s7762_s10 }
   0xc   :  { %7804 = sst [smem:[#allocation14_spill]] %s7763_s11 }
   0xd   :  { %7805 = sst [smem:[#allocation15_spill]] %s7764_s12 }
   0xe   :  { %7806 = sst [smem:[#allocation16_spill]] %s7778_s26 }
   0xf   :  { %7807 = sst [smem:[#allocation17_spill]] %s7779_s27 }
  0x10   :  { %7808 = sst [smem:[#allocation18_spill]] %s7780_s28 }
  0x11 LB: > { %7809 = sst [smem:[#allocation2_spill]] %s6839_s8  ;;  %s5571_s5 = sadd.s32 4294967295, %s6839_s8   ;;  %s6839_s8 = sphi %s6990_s8, %s38_s8  }
  0x12   : > { %p5575_p0 = scmp.ge.s32.totalorder %s6839_s8, 1  ;;  %p771_p1 = scmp.lt.s32.totalorder %s6839_s8, 3 }
  0x14   : > { %p772_p2 = pnand %p5575_p0, %p771_p1 }
  0x15   : > { %s7810_s3 = sld [smem:[#allocation5_spill]] (!%p772_p2)  ;;  %p849_p3 = scmp.lt.s32.totalorder (!%p772_p2), %s5571_s5, 1  ;;  %vm877_vm0 = vcmask (!%p772_p2), 261120   ;;  %vm1131_vm1 = vcmask (!%p772_p2), 64512   ;;  %vm1221_vm3 = vcmask (!%p772_p2), 80896   ;;  %vm1225_vm4 = vcmask (!%p772_p2), 74752  }
  0x16   : > { %775 = sbr.rel (%p772_p2) target bundleno = 9218 (0x2402), region = 132  ;;  %s7811_s1 = sld [smem:[#allocation7_spill]] (!%p772_p2)  ;;  %vm7053_vm2 = vmpackc.low (!%p772_p2), %vm1131_vm1, %vm1131_vm1  ;;  %vm1251_vm5 = vcmask (!%p772_p2), 1041408   ;;  %vm6841_vm6 = vmmov (!%p772_p2), 1   ;;  %vm3058_vm8 = vcmask (!%p772_p2), 254976   ;;  %vm6843_vm9 = vmmov (!%p772_p2), 0  }
  0x17   : > { %s7812_s0 = sld [smem:[#allocation3_spill]] (!%p772_p2)  ;;  %s7813_s6 = sld [smem:[#allocation6_spill]] (!%p772_p2)  ;;  %vm7085_vm7 = vmpackc.low (!%p772_p2), %vm1251_vm5, %vm6841_vm6  ;;  %vm3445_vm10 = vcmask (!%p772_p2), 58368   ;;  %vm5374_vm11 = vcmask (!%p772_p2), 523264  }
  0x18   : > { %s7817_s7 = sld [smem:[#allocation9_spill]] (!%p772_p2)  ;;  %s7818_s2 = sld [smem:[#allocation10_spill]] (!%p772_p2) }
  0x19   : > { %s7821_s27 = sld [smem:[#allocation11_spill]] (!%p772_p2)  ;;  %s7822_s12 = sld [smem:[#allocation12_spill]] (!%p772_p2) }
  0x1a   : > { %s7824_s28 = sld [smem:[#allocation4_spill]] (!%p772_p2)  ;;  %s7825_s26 = sld [smem:[#allocation13_spill]] (!%p772_p2) }
  0x1b   : > { %v866_v0 = vld [vmem:[%s7810_s3] sm:$0xff] (!%p772_p2)  ;;  %v867_v1 = vld [vmem:[%s7810_s3 + $0x8] sm:$0xff] (!%p772_p2)  ;;  %v868_v2 = vld [vmem:[%s7810_s3 + $0x10] sm:$0xff] (!%p772_p2)  ;;  %s7830_s10 = sld [smem:[#allocation18_spill]] (!%p772_p2) }
  0x1c   : > { %v6485_v3 = vpack.c.bf16 (!%p772_p2), %v867_v1, %v866_v0  ;;  %v869_v4 = vld [vmem:[%s7810_s3 + $0x18] sm:$0xff] (!%p772_p2)  ;;  %v959_v6 = vld [vmem:[%s7811_s1] sm:$0xff] (!%p772_p2)  ;;  %v960_v7 = vld [vmem:[%s7811_s1 + $0x8] sm:$0xff] (!%p772_p2) }
  0x1d   : > { %v6489_v5 = vpack.c.bf16 %v869_v4, %v868_v2  ;;  %s7833_s5 = smov (!%p849_p3, %s5571_s5), 1  ;;  %v6493_v8 = vpack.c.bf16 %v960_v7, %v959_v6  ;;  %v961_v10 = vld [vmem:[%s7811_s1 + $0x10] sm:$0xff]  ;;  %v962_v11 = vld [vmem:[%s7811_s1 + $0x18] sm:$0xff]  ;;  %v5581_v14 = vld [vmem:[%s7813_s6] ss:$0 sm:$0xff] }
  0x1e   : > { %6486 = vmatprep.subr.bf16.mxu1 %v6485_v3  ;;  %s7789_s30 = sshll.u32 %s7833_s5, 4  ;;  %v6497_v13 = vpack.c.bf16 %v962_v11, %v961_v10  ;;  %v1045_v26 = vld [vmem:[%s7817_s7] sm:$0xff]  ;;  %v1046_v27 = vld [vmem:[%s7817_s7 + $0x8] sm:$0xff]  ;;  %v1047_v28 = vld [vmem:[%s7817_s7 + $0x10] sm:$0xff]  ;;  %s5578_s29 = sshll.u32 %s7833_s5, 3 }
  0x1f   : > { %6488 = vmatpush3.bf16.msra.mxu1 %v6485_v3  ;;  %s853_s11 = scalar_lea.vmem %s7812_s0, %s7789_s30  ;;  %v6501_v29 = vpack.c.bf16 %v1046_v27, %v1045_v26  ;;  %v1048_v30 = vld [vmem:[%s7817_s7 + $0x18] sm:$0xff]  ;;  %v5587_v49 = vld [vmem:[%s7818_s2] ss:$0 sm:$0xff]  ;;  %v5606_v56 = vld [vmem:[%s7811_s1 + $0x28] sm:$0xff]  ;;  %s7823_s0 = sld [smem:[#allocation15_spill]] }
  0x20   : > { %6490 = vmatprep.subr.bf16.mxu1 %v6489_v5  ;;  %v7024_v9 = vld [vmem:[%s853_s11] sm:$0xff]  ;;  %v7036_v12 = vld [vmem:[%s853_s11 + $0x8] sm:$0x3]  ;;  %s7814_s11 = sld [smem:[#allocation8_spill]]  ;;  %v6505_v31 = vpack.c.bf16 %v1048_v30, %v1047_v28  ;;  %v5599_v61 = vld [vmem:[%s7810_s3 + $0x30] sm:$0xff]  ;;  %s857_s8 = scalar_lea.vmem %s7824_s28, %s5578_s29 }
  0x21   : > { %6063 = vmatprep.mubr.msk.f32.mxu1 %vm877_vm0, %v7024_v9  ;;  %6085 = vmatprep.mubr.msk.f32.mxu0 %vm877_vm0, %v7024_v9  ;;  %v5605_v55 = vld [vmem:[%s7811_s1 + $0x20] sm:$0xff]  ;;  %v5598_v59 = vld [vmem:[%s7810_s3 + $0x28] sm:$0xff]  ;;  %v5600_v62 = vld [vmem:[%s7810_s3 + $0x38] sm:$0xff]  ;;  %s7827_s29 = sld [smem:[#allocation16_spill]]  ;;  %s7828_s28 = sld [smem:[#allocation17_spill]] }
  0x22   : > { %6502 = vmatprep.subr.bf16.mxu0 %v6501_v29  ;;  %v6529_v57 = vpack.c.bf16 %v5606_v56, %v5605_v55  ;;  %v5597_v58 = vld [vmem:[%s7810_s3 + $0x20] sm:$0xff]  ;;  %v6525_v63 = vpack.c.bf16 %v5600_v62, %v5599_v61  ;;  %v5607_v4 = vld [vmem:[%s7811_s1 + $0x30] sm:$0xff]  ;;  %v5614_v26 = vld [vmem:[%s7817_s7 + $0x28] sm:$0xff] }
  0x23   : > { %6492 = vmatpush3.bf16.msra.mxu1 %v6489_v5  ;;  %6504 = vmatpush3.bf16.msra.mxu0 %v6501_v29  ;;  %v6521_v60 = vpack.c.bf16 %v5598_v59, %v5597_v58  ;;  %v5608_v5 = vld [vmem:[%s7811_s1 + $0x38] sm:$0xff]  ;;  %v5602_v10 = vld [vmem:[%s7813_s6 + $0x1] ss:$0 sm:$0xff]  ;;  %v5615_v27 = vld [vmem:[%s7817_s7 + $0x30] sm:$0xff] }
  0x24   : > { %6494 = vmatprep.subr.bf16.mxu1 %v6493_v8  ;;  %6506 = vmatprep.subr.bf16.mxu0 %v6505_v31  ;;  %v5616_v29 = vld [vmem:[%s7817_s7 + $0x38] sm:$0xff]  ;;  %v1330_v61 = vld [vmem:[%s7821_s27] sm:$0xff] }
  0x25   : > { %v6541_v30 = vpack.c.bf16 %v5616_v29, %v5615_v27  ;;  %v5633_v62 = vld [vmem:[%s7810_s3 + $0x40] sm:$0xff]  ;;  %v5650_v27 = vld [vmem:[%s7817_s7 + $0x48] sm:$0xff]  ;;  %v5686_v23 = vld [vmem:[%s7817_s7 + $0x78] sm:$0xff] }
  0x26   : > { %6064 = vmatmul.mubr.msk.f32.vlgmr.msra.gmra.mrb[0].mxu1 %vm877_vm0, %v7036_v12  ;;  %v5584_v18 = vld [vmem:[%s7814_s11] ss:$0 sm:$0xff] }
  0x27   : > { %6496 = vmatpush3.bf16.msra.mxu1 %v6493_v8  ;;  %6074 = vmatprep.mubr.msk.f32.mxu1 %vm877_vm0, %v7024_v9  ;;  %v6533_v8 = vpack.c.bf16 %v5608_v5, %v5607_v4  ;;  %v5641_v4 = vld [vmem:[%s7811_s1 + $0x40] sm:$0xff]  ;;  %v5642_v5 = vld [vmem:[%s7811_s1 + $0x48] sm:$0xff] }
  0x28   : > { %6498 = vmatprep.subr.bf16.mxu1 %v6497_v13  ;;  %6508 = vmatpush3.bf16.msra.mxu0 %v6505_v31 }
  0x2b   : > { %6500 = vmatpush3.bf16.msra.mxu1 %v6497_v13  ;;  %6086 = vmatmul.mubr.msk.f32.vlgmr.msra.gmra.mrb[0].mxu0 %vm877_vm0, %v7036_v12 }
  0x2e   : > { %6075 = vmatmul.mubr.msk.f32.vlgmr.msra.gmra.mrb[2].mxu1 %vm877_vm0, %v7036_v12 }
  0xf9   : > { %v6065_v15 = vpop.f32.mrb[0].mxu1 }
  0xfa   : > { %v950_v16 = vpop.f32.mrb[1].mxu1  ;;  %v956_v25 = vadd.f32 %v6065_v15, %v5581_v14 }
  0xfb   : > { %v951_v17 = vadd.f32 %v5581_v14, %v950_v16 }
  0xfd   : > { %6092 = vmatprep.mubr.msk.f32.mxu1 %vm1131_vm1, %v951_v17 }
  0xfe   : > { %v6087_v48 = vpop.f32.mrb[0].mxu0 }
  0xff   : > { %v1122_v50 = vpop.f32.mrb[1].mxu0  ;;  %v1128_v51 = vadd.f32 %v6087_v48, %v5587_v49  ;;  %v5618_v48 = vld [vmem:[%s7818_s2 + $0x1] ss:$0 sm:$0xff] }
 0x100   : > { %v1123_v52 = vadd.f32 %v5587_v49, %v1122_v50 }
 0x101   : > { %v6076_v19 = vpop.f32.mrb[2].mxu1 }
 0x102   : > { %v1042_v20 = vadd.f32 %v6076_v19, %v5584_v18  ;;  %v1036_v21 = vpop.f32.mrb[3].mxu1  ;;  %v6515_v53 = vpack.c.bf16 %v1128_v51, %v1123_v52 }
 0x103   : > { %v1037_v22 = vadd.f32 %v5584_v18, %v1036_v21  ;;  %v5610_v18 = vld [vmem:[%s7814_s11 + $0x1] ss:$0 sm:$0xff] }
 0x104   : > { %6517 = vmatprep.subr.msk.bf16.mxu0 %vm7085_vm7, %v6515_v53 }
 0x105   : > { %v6509_v24 = vpack.c.bf16 %v1042_v20, %v1037_v22  ;;  %6520 = vmatpush3.bf16.msk.msra.mxu0 %vm7085_vm7, %v6515_v53  ;;  %v5628_v53 = vld [vmem:[%s7821_s27 + $0x8] sm:$0xff] }
 0x106   : > { %6530 = vmatprep.subr.bf16.mxu0 %v6529_v57 }
 0x107   : > { %6511 = vmatprep.subr.msk.bf16.mxu1 %vm7053_vm2, %v6509_v24 }
 0x108   : > { %6514 = vmatpush3.bf16.xpose.msk.msra.mxu1 %vm7053_vm2, %v6509_v24 }
 0x109   : > { %6522 = vmatprep.subr.bf16.mxu1 %v6521_v60 }
 0x10f   : > { %6093 = vmatmul.mubr.msk.f32.vlgmr.msra.gmra.mrb[4].mxu1 %vm1131_vm1, %v956_v25  ;;  %v5613_v25 = vld [vmem:[%s7817_s7 + $0x20] sm:$0xff] }
 0x110   : > { %6110 = vmatprep.mubr.msk.f32.mxu1 %vm877_vm0, %v7024_v9  ;;  %6524 = vmatpush3.bf16.msra.mxu1 %v6521_v60  ;;  %v6537_v28 = vpack.c.bf16 %v5614_v26, %v5613_v25  ;;  %v5649_v26 = vld [vmem:[%s7817_s7 + $0x40] sm:$0xff] }
 0x111   : > { %6526 = vmatprep.subr.bf16.mxu1 %v6525_v63  ;;  %v6573_v29 = vpack.c.bf16 %v5650_v27, %v5649_v26  ;;  %v5683_v26 = vld [vmem:[%s7817_s7 + $0x60] sm:$0xff]  ;;  %v5684_v27 = vld [vmem:[%s7817_s7 + $0x68] sm:$0xff] }
 0x114   : > { %6528 = vmatpush3.bf16.msra.mxu1 %v6525_v63  ;;  %v5634_v63 = vld [vmem:[%s7810_s3 + $0x48] sm:$0xff] }
 0x115   : > { %6538 = vmatprep.subr.bf16.mxu1 %v6537_v28 }
 0x117   : > { %6111 = vmatmul.mubr.msk.f32.vlgmr.msra.gmra.mrb[6].mxu1 %vm877_vm0, %v7036_v12 }
 0x118   : > { %6132 = vmatprep.mubr.msk.f32.mxu1 %vm877_vm0, %v7024_v9  ;;  %6540 = vmatpush3.bf16.msra.mxu1 %v6537_v28  ;;  %v5651_v28 = vld [vmem:[%s7817_s7 + $0x50] sm:$0xff] }
 0x119   : > { %6542 = vmatprep.subr.bf16.mxu1 %v6541_v30 }
 0x11c   : > { %6544 = vmatpush3.bf16.msra.mxu1 %v6541_v30  ;;  %v5652_v30 = vld [vmem:[%s7817_s7 + $0x58] sm:$0xff] }
 0x11f   : > { %6133 = vmatmul.mubr.msk.f32.vlgmr.msra.gmra.mrb[8].mxu1 %vm877_vm0, %v7036_v12 }
 0x1e2   : > { %v6094_v32 = vpop.f32.mrb[4].mxu1 }
 0x1e3   : > { %v1210_v33 = vpop.f32.mrb[5].mxu1  ;;  %v1220_v35 = vmul.f32 0.35355338, %v6094_v32 }
 0x1e4   : > { %v1219_v34 = vmul.f32 0.35355338, %v1210_v33 }
 0x1e5   : > { %v1226_v37 = vsel %vm1225_vm4, %v1220_v35, -inf }
 0x1e6   : > { %v1222_v36 = vsel %vm1221_vm3, %v1219_v34, -inf }
 0x1e7   : > { %1223 = vmax.xlane.f32.xlu0 %v1222_v36 }
 0x1ea   : > { %v6112_v11 = vpop.f32.mrb[6].mxu1 }
 0x1eb   : > { %1227 = vmax.xlane.f32.xlu0 %v1226_v37  ;;  %v1416_v13 = vadd.f32 %v6112_v11, %v5602_v10  ;;  %v1410_v14 = vpop.f32.mrb[7].mxu1  ;;  %v5644_v11 = vld [vmem:[%s7811_s1 + $0x58] sm:$0xff] }
 0x1ec   : > { %v1411_v15 = vadd.f32 %v5602_v10, %v1410_v14  ;;  %v5643_v10 = vld [vmem:[%s7811_s1 + $0x50] sm:$0xff]  ;;  %v5638_v14 = vld [vmem:[%s7813_s6 + $0x2] ss:$0 sm:$0xff] }
 0x274   : > { %v1224_v38 = vpop.xlane.xlu0 %1223 }
 0x275   : > { %v1229_v39 = vsub.f32 %v1219_v34, %v1224_v38 }
 0x277   : > { %v1231_v40 = vmul.f32 1.442695, %v1229_v39 }
 0x278   : > { %v1228_v41 = vpop.xlane.xlu0 %1227 }
 0x279   : > { %6757 = vpow2.f32 %v1231_v40  ;;  %v1230_v42 = vsub.f32 %v1220_v35, %v1228_v41 }
 0x27b   : > { %v1233_v43 = vmul.f32 1.442695, %v1230_v42 }
 0x27d   : > { %6759 = vpow2.f32 %v1233_v43 }
 0x283   : > { %v6758_v44 = vpop.eup %6757 }
 0x284   : > { %v1235_v45 = vsel %vm1221_vm3, %v6758_v44, 0.0 }
 0x285   : > { %1236 = vadd.xlane.f32.xlu1 %v1235_v45 }
 0x287   : > { %v6760_v46 = vpop.eup %6759 }
 0x288   : > { %v1238_v47 = vsel %vm1225_vm4, %v6760_v46, 0.0 }
 0x289   : > { %1239 = vadd.xlane.f32.xlu1 %v1238_v47  ;;  %v6134_v47 = vpop.f32.mrb[8].mxu1 }
 0x28a   : > { %v1586_v49 = vpop.f32.mrb[9].mxu1  ;;  %v1592_v50 = vadd.f32 %v6134_v47, %v5618_v48 }
 0x28b   : > { %v1587_v51 = vadd.f32 %v5618_v48, %v1586_v49  ;;  %v5654_v49 = vld [vmem:[%s7818_s2 + $0x2] ss:$0 sm:$0xff] }
 0x28d   : > { %v6551_v52 = vpack.c.bf16 %v1592_v50, %v1587_v51 }
 0x28f   : > { %6553 = vmatprep.subr.msk.bf16.mxu1 %vm7085_vm7, %v6551_v52 }
 0x290   : > { %6556 = vmatpush3.bf16.msk.msra.mxu1 %vm7085_vm7, %v6551_v52 }
 0x312   : > { %v1237_v0 = vpop.xlane.xlu1 %1236 }
 0x313   : > { %6761 = vrcp.f32 %v1237_v0  ;;  %v6557_v0 = vpack.c.bf16 %v5634_v63, %v5633_v62  ;;  %v5675_v62 = vld [vmem:[%s7811_s1 + $0x60] sm:$0xff]  ;;  %v5676_v63 = vld [vmem:[%s7811_s1 + $0x68] sm:$0xff] }
 0x315   : > { %6558 = vmatprep.subr.bf16.mxu1 %v6557_v0 }
 0x316   : > { %v1240_v1 = vpop.xlane.xlu1 %1239 }
 0x317   : > { %6763 = vrcp.f32 %v1240_v1  ;;  %v5635_v1 = vld [vmem:[%s7810_s3 + $0x50] sm:$0xff] }
 0x31d   : > { %v6762_v2 = vpop.eup %6761 }
 0x31e   : > { %v1243_v3 = vmul.f32 %v6762_v2, %v6758_v44  ;;  %v5636_v2 = vld [vmem:[%s7810_s3 + $0x58] sm:$0xff] }
 0x320   : > { %6099 = vmatprep.mubr.msk.f32.mxu0 %vm1221_vm3, %v1243_v3  ;;  %v6561_v3 = vpack.c.bf16 %v5636_v2, %v5635_v1  ;;  %v5667_v1 = vld [vmem:[%s7810_s3 + $0x60] sm:$0xff]  ;;  %v5668_v2 = vld [vmem:[%s7810_s3 + $0x68] sm:$0xff] }
 0x321   : > { %v6764_v6 = vpop.eup %6763 }
 0x322   : > { %v1244_v7 = vmul.f32 %v6764_v6, %v6760_v46 }
 0x324   : > { %6100 = vmatmul.mubr.msk.f32.vlgmr.msra.gmra.mrb[2].mxu0 %vm1221_vm3, %v1244_v7 }
 0x325   : > { %6532 = vmatpush3.bf16.msra.mxu0 %v6529_v57  ;;  %6121 = vmatprep.mubr.msk.f32.mxu0 %vm877_vm0, %v7024_v9 }
 0x326   : > { %6534 = vmatprep.subr.bf16.mxu0 %v6533_v8 }
 0x329   : > { %6536 = vmatpush3.bf16.msra.mxu0 %v6533_v8  ;;  %v6565_v8 = vpack.c.bf16 %v5642_v5, %v5641_v4  ;;  %v5669_v4 = vld [vmem:[%s7810_s3 + $0x70] sm:$0xff]  ;;  %v5670_v5 = vld [vmem:[%s7810_s3 + $0x78] sm:$0xff] }
 0x32c   : > { %6122 = vmatmul.mubr.msk.f32.vlgmr.msra.gmra.mrb[4].mxu0 %vm877_vm0, %v7036_v12 }
 0x32d   : > { %6139 = vmatprep.mubr.msk.f32.mxu0 %vm1131_vm1, %v1411_v15 }
 0x3f7   : > { %v7131_v16 = vpop.f32.mrb[2].mxu0 }
 0x3f8   : > { %v7133_v17 = vpop.f32.mrb[3].mxu0 }
 0x3ff   : > { %v6123_v19 = vpop.f32.mrb[4].mxu0 }
 0x400   : > { %v1504_v20 = vadd.f32 %v6123_v19, %v5610_v18  ;;  %v1498_v21 = vpop.f32.mrb[5].mxu0 }
 0x401   : > { %v1499_v22 = vadd.f32 %v5610_v18, %v1498_v21 }
 0x403   : > { %v6545_v24 = vpack.c.bf16 %v1504_v20, %v1499_v22 }
 0x405   : > { %6547 = vmatprep.subr.msk.bf16.mxu0 %vm7053_vm2, %v6545_v24 }
 0x406   : > { %6550 = vmatpush3.bf16.xpose.msk.msra.mxu0 %vm7053_vm2, %v6545_v24 }
 0x407   : > { %6149 = vmatprep.subr.mxu0 %v5628_v53 }
 0x40d   : > { %6140 = vmatmul.mubr.msk.f32.vlgmr.msra.gmra.mrb[6].mxu0 %vm1131_vm1, %v1416_v13  ;;  %v6569_v13 = vpack.c.bf16 %v5644_v11, %v5643_v10 }
 0x40e   : > { %6150 = vmatpush3.msra.mxu0 %v5628_v53 }
 0x40f   : > { %6154 = vmatprep.subr.mxu0 %v1330_v61 }
 0x4e0   : > { %v6141_v31 = vpop.f32.mrb[6].mxu0 }
 0x4e1   : > { %v1683_v32 = vmul.f32 0.35355338, %v6141_v31  ;;  %v1673_v33 = vpop.f32.mrb[7].mxu0  ;;  %v6577_v31 = vpack.c.bf16 %v5652_v30, %v5651_v28  ;;  %v5685_v28 = vld [vmem:[%s7817_s7 + $0x70] sm:$0xff] }
 0x4e2   : > { %v1682_v34 = vmul.f32 0.35355338, %v1673_v33  ;;  %v6613_v30 = vpack.c.bf16 %v5686_v23, %v5685_v28  ;;  %v3101_v28 = vld [vmem:[%s7823_s0 + $0x10] sm:$0xff] }
 0x4e3   : > { %v1687_v35 = vsel %vm1225_vm4, %v1683_v32, -inf }
 0x4e4   : > { %1688 = vmax.xlane.f32.xlu1 %v1687_v35  ;;  %v1684_v36 = vsel %vm1221_vm3, %v1682_v34, -inf }
 0x4e5   : > { %1685 = vmax.xlane.f32.xlu0 %v1684_v36 }
 0x571   : > { %v1689_v37 = vpop.xlane.xlu1 %1688 }
 0x572   : > { %v1691_v38 = vsub.f32 %v1683_v32, %v1689_v37  ;;  %v1686_v39 = vpop.xlane.xlu0 %1685 }
 0x573   : > { %v1690_v40 = vsub.f32 %v1682_v34, %v1686_v39 }
 0x574   : > { %v1694_v41 = vmul.f32 1.442695, %v1691_v38 }
 0x575   : > { %v1692_v42 = vmul.f32 1.442695, %v1690_v40 }
 0x576   : > { %6765 = vpow2.f32 %v1694_v41 }
 0x577   : > { %6767 = vpow2.f32 %v1692_v42 }
 0x580   : > { %v6766_v43 = vpop.eup %6765 }
 0x581   : > { %v6768_v44 = vpop.eup %6767  ;;  %v1699_v45 = vsel %vm1225_vm4, %v6766_v43, 0.0 }
 0x582   : > { %1700 = vadd.xlane.f32.xlu1 %v1699_v45  ;;  %v1696_v46 = vsel %vm1221_vm3, %v6768_v44, 0.0 }
 0x583   : > { %1697 = vadd.xlane.f32.xlu0 %v1696_v46 }
 0x60f   : > { %v1701_v55 = vpop.xlane.xlu1 %1700 }
 0x610   : > { %6769 = vrcp.f32 %v1701_v55  ;;  %v1698_v56 = vpop.xlane.xlu0 %1697  ;;  %v5664_v55 = vld [vmem:[%s7821_s27 + $0x10] sm:$0xff] }
 0x611   : > { %6771 = vrcp.f32 %v1698_v56 }
 0x61a   : > { %v6770_v57 = vpop.eup %6769 }
 0x61b   : > { %v6772_v58 = vpop.eup %6771  ;;  %v1705_v60 = vmul.f32 %v6770_v57, %v6766_v43 }
 0x61c   : > { %v1704_v59 = vmul.f32 %v6772_v58, %v6768_v44 }
 0x61e   : > { %6146 = vmatprep.mubr.msk.f32.mxu1 %vm1221_vm3, %v1704_v59 }
 0x61f   : > { %6147 = vmatmul.mubr.msk.f32.vlgmr.msra.gmra.mrb[10].mxu1 %vm1221_vm3, %v1705_v60 }
 0x620   : > { %6167 = vmatprep.mubr.msk.f32.mxu1 %vm877_vm0, %v7024_v9  ;;  %6560 = vmatpush3.bf16.msra.mxu1 %v6557_v0  ;;  %v6601_v0 = vpack.c.bf16 %v5676_v63, %v5675_v62  ;;  %v5701_v62 = vld [vmem:[%s7822_s12] ss:$0 sm:$0xff]  ;;  %s7826_s12 = sld [smem:[#allocation14_spill]] }
 0x621   : > { %6562 = vmatprep.subr.bf16.mxu1 %v6561_v3 }
 0x624   : > { %6564 = vmatpush3.bf16.msra.mxu1 %v6561_v3  ;;  %v6593_v3 = vpack.c.bf16 %v5668_v2, %v5667_v1 }
 0x625   : > { %6574 = vmatprep.subr.bf16.mxu1 %v6573_v29 }
 0x627   : > { %6168 = vmatmul.mubr.msk.f32.vlgmr.msra.gmra.mrb[12].mxu1 %vm877_vm0, %v7036_v12 }
 0x628   : > { %6189 = vmatprep.mubr.msk.f32.mxu1 %vm877_vm0, %v7024_v9  ;;  %6576 = vmatpush3.bf16.msra.mxu1 %v6573_v29  ;;  %v6609_v29 = vpack.c.bf16 %v5684_v27, %v5683_v26  ;;  %v3194_v26 = vld [vmem:[%s7766_s14 + $0x18] sm:$0xff] }
 0x629   : > { %6578 = vmatprep.subr.bf16.mxu1 %v6577_v31 }
 0x62c   : > { %6580 = vmatpush3.bf16.msra.mxu1 %v6577_v31 }
 0x62f   : > { %6190 = vmatmul.mubr.msk.f32.vlgmr.msra.gmra.mrb[14].mxu1 %vm877_vm0, %v7036_v12 }
 0x6f2   : > { %v6148_v6 = vpop.f32.mrb[10].mxu1 }
 0x6f3   : > { %v1781_v7 = vpop.f32.mrb[11].mxu1 }
 0x6f4   : > { %6151 = vmatprep.mubr.msk.f32.mxu0 %vm1131_vm1, %v1781_v7  ;;  %v5677_v7 = vld [vmem:[%s7811_s1 + $0x70] sm:$0xff] }
 0x6f5   : > { %6152 = vmatmul.mubr.msk.f32.vlgmr.msra.gmra.mrb[8].mxu0 %vm1131_vm1, %v6148_v6  ;;  %v6597_v6 = vpack.c.bf16 %v5670_v5, %v5669_v4 }
 0x6f6   : > { %6155 = vmatpush3.msra.mxu0 %v1330_v61  ;;  %6156 = vmatprep.mubr.msk.f32.mxu0 %vm1131_vm1, %v7133_v17 }
 0x6f7   : > { %6566 = vmatprep.subr.bf16.mxu0 %v6565_v8 }
 0x6fa   : > { %v6169_v15 = vpop.f32.mrb[12].mxu1 }
 0x6fb   : > { %v2039_v17 = vadd.f32 %v6169_v15, %v5638_v14  ;;  %v2033_v18 = vpop.f32.mrb[13].mxu1 }
 0x6fc   : > { %v2034_v19 = vadd.f32 %v5638_v14, %v2033_v18  ;;  %v5672_v14 = vld [vmem:[%s7813_s6 + $0x3] ss:$0 sm:$0xff] }
 0x6fd   : > { %6157 = vmatmul.mubr.msk.f32.vlgmr.msra.gmra.mrb[8].mxu0 %vm1131_vm1, %v7131_v16  ;;  %v5646_v16 = vld [vmem:[%s7814_s11 + $0x2] ss:$0 sm:$0xff] }
 0x6fe   : > { %6568 = vmatpush3.bf16.msra.mxu0 %v6565_v8  ;;  %6178 = vmatprep.mubr.msk.f32.mxu0 %vm877_vm0, %v7024_v9  ;;  %v5678_v8 = vld [vmem:[%s7811_s1 + $0x78] sm:$0xff]  ;;  %s7829_s1 = sshll.u32 %s7833_s5, 4 }
 0x6ff   : > { %6570 = vmatprep.subr.bf16.mxu0 %v6569_v13 }
 0x702   : > { %6572 = vmatpush3.bf16.msra.mxu0 %v6569_v13  ;;  %v6191_v48 = vpop.f32.mrb[14].mxu1  ;;  %v6605_v13 = vpack.c.bf16 %v5678_v8, %v5677_v7 }
 0x703   : > { %v2209_v50 = vpop.f32.mrb[15].mxu1  ;;  %v2215_v51 = vadd.f32 %v6191_v48, %v5654_v49  ;;  %v5688_v48 = vld [vmem:[%s7818_s2 + $0x3] ss:$0 sm:$0xff] }
 0x704   : > { %v2210_v52 = vadd.f32 %v5654_v49, %v2209_v50 }
 0x705   : > { %6179 = vmatmul.mubr.msk.f32.vlgmr.msra.gmra.mrb[10].mxu0 %vm877_vm0, %v7036_v12 }
 0x706   : > { %6196 = vmatprep.mubr.msk.f32.mxu0 %vm1131_vm1, %v2034_v19  ;;  %v6587_v53 = vpack.c.bf16 %v2215_v51, %v2210_v52 }
 0x708   : > { %6589 = vmatprep.subr.msk.bf16.mxu1 %vm7085_vm7, %v6587_v53 }
 0x709   : > { %6592 = vmatpush3.bf16.msk.msra.mxu1 %vm7085_vm7, %v6587_v53  ;;  %v5698_v53 = vld [vmem:[%s7821_s27 + $0x18] sm:$0xff] }
 0x70a   : > { %6594 = vmatprep.subr.bf16.mxu1 %v6593_v3 }
 0x7d8   : > { %v6180_v20 = vpop.f32.mrb[10].mxu0 }
 0x7d9   : > { %v2127_v21 = vadd.f32 %v6180_v20, %v5646_v16  ;;  %v2121_v22 = vpop.f32.mrb[11].mxu0 }
 0x7da   : > { %v2122_v24 = vadd.f32 %v5646_v16, %v2121_v22  ;;  %v5680_v16 = vld [vmem:[%s7814_s11 + $0x3] ss:$0 sm:$0xff] }
 0x7dc   : > { %v6581_v25 = vpack.c.bf16 %v2127_v21, %v2122_v24 }
 0x7de   : > { %6583 = vmatprep.subr.msk.bf16.mxu0 %vm7053_vm2, %v6581_v25 }
 0x7df   : > { %6586 = vmatpush3.bf16.xpose.msk.msra.mxu0 %vm7053_vm2, %v6581_v25 }
 0x7e0   : > { %6206 = vmatprep.subr.mxu0 %v5664_v55 }
 0x7e6   : > { %6197 = vmatmul.mubr.msk.f32.vlgmr.msra.gmra.mrb[12].mxu0 %vm1131_vm1, %v2039_v17 }
 0x7e7   : > { %6207 = vmatpush3.msra.mxu0 %v5664_v55 }
 0x7e8   : > { %6602 = vmatprep.subr.bf16.mxu0 %v6601_v0 }
 0x8b9   : > { %v6198_v32 = vpop.f32.mrb[12].mxu0 }
 0x8ba   : > { %v2306_v33 = vmul.f32 0.35355338, %v6198_v32  ;;  %v2296_v34 = vpop.f32.mrb[13].mxu0 }
 0x8bb   : > { %v2305_v35 = vmul.f32 0.35355338, %v2296_v34 }
 0x8bc   : > { %v2310_v36 = vsel %vm1225_vm4, %v2306_v33, -inf }
 0x8bd   : > { %2311 = vmax.xlane.f32.xlu1 %v2310_v36  ;;  %v2307_v37 = vsel %vm1221_vm3, %v2305_v35, -inf }
 0x8be   : > { %2308 = vmax.xlane.f32.xlu0 %v2307_v37 }
 0x94a   : > { %v2312_v38 = vpop.xlane.xlu1 %2311 }
 0x94b   : > { %v2314_v39 = vsub.f32 %v2306_v33, %v2312_v38  ;;  %v2309_v40 = vpop.xlane.xlu0 %2308 }
 0x94c   : > { %v2313_v41 = vsub.f32 %v2305_v35, %v2309_v40 }
 0x94d   : > { %v2317_v42 = vmul.f32 1.442695, %v2314_v39 }
 0x94e   : > { %v2315_v43 = vmul.f32 1.442695, %v2313_v41 }
 0x94f   : > { %6773 = vpow2.f32 %v2317_v42 }
 0x950   : > { %6775 = vpow2.f32 %v2315_v43 }
 0x959   : > { %v6774_v44 = vpop.eup %6773 }
 0x95a   : > { %v6776_v45 = vpop.eup %6775  ;;  %v2322_v46 = vsel %vm1225_vm4, %v6774_v44, 0.0 }
 0x95b   : > { %2323 = vadd.xlane.f32.xlu1 %v2322_v46  ;;  %v2319_v47 = vsel %vm1221_vm3, %v6776_v45, 0.0 }
 0x95c   : > { %2320 = vadd.xlane.f32.xlu0 %v2319_v47 }
 0x9e8   : > { %v2324_v56 = vpop.xlane.xlu1 %2323 }
 0x9e9   : > { %6777 = vrcp.f32 %v2324_v56  ;;  %v2321_v57 = vpop.xlane.xlu0 %2320 }
 0x9ea   : > { %6779 = vrcp.f32 %v2321_v57 }
 0x9f3   : > { %v6778_v58 = vpop.eup %6777 }
 0x9f4   : > { %v6780_v59 = vpop.eup %6779  ;;  %v2328_v61 = vmul.f32 %v6778_v58, %v6774_v44 }
 0x9f5   : > { %v2327_v60 = vmul.f32 %v6780_v59, %v6776_v45 }
 0x9f7   : > { %6203 = vmatprep.mubr.msk.f32.mxu1 %vm1221_vm3, %v2327_v60 }
 0x9f8   : > { %6204 = vmatmul.mubr.msk.f32.vlgmr.msra.gmra.mrb[16].mxu1 %vm1221_vm3, %v2328_v61 }
 0x9f9   : > { %6219 = vmatprep.mubr.msk.f32.mxu1 %vm877_vm0, %v7024_v9  ;;  %6596 = vmatpush3.bf16.msra.mxu1 %v6593_v3 }
 0x9fa   : > { %6598 = vmatprep.subr.bf16.mxu1 %v6597_v6 }
 0x9fd   : > { %6600 = vmatpush3.bf16.msra.mxu1 %v6597_v6 }
 0x9fe   : > { %6610 = vmatprep.subr.bf16.mxu1 %v6609_v29 }
 0xa00   : > { %6220 = vmatmul.mubr.msk.f32.vlgmr.msra.gmra.mrb[18].mxu1 %vm877_vm0, %v7036_v12 }
 0xa01   : > { %6241 = vmatprep.mubr.msk.f32.mxu1 %vm877_vm0, %v7024_v9  ;;  %6612 = vmatpush3.bf16.msra.mxu1 %v6609_v29  ;;  %v3102_v29 = vld [vmem:[%s7823_s0 + $0x18] sm:$0xff] }
 0xa02   : > { %6614 = vmatprep.subr.bf16.mxu1 %v6613_v30  ;;  %v6633_v23 = vpack.c.bf16 %v3102_v29, %v3101_v28 }
 0xa05   : > { %6616 = vmatpush3.bf16.msra.mxu1 %v6613_v30  ;;  %v6844_v30 = vmov 0.0  }
 0xa08   : > { %6242 = vmatmul.mubr.msk.f32.vlgmr.msra.gmra.mrb[20].mxu1 %vm877_vm0, %v7036_v12 }
 0xacb   : > { %v6205_v10 = vpop.f32.mrb[16].mxu1 }
 0xacc   : > { %v2404_v11 = vpop.f32.mrb[17].mxu1 }
 0xacd   : > { %6208 = vmatprep.mubr.msk.f32.mxu0 %vm1131_vm1, %v2404_v11 }
 0xace   : > { %6209 = vmatmul.mubr.msk.f32.vlgmr.msra.gmra.mrb[8].mxu0 %vm1131_vm1, %v6205_v10 }
 0xacf   : > { %6604 = vmatpush3.bf16.msra.mxu0 %v6601_v0  ;;  %6230 = vmatprep.mubr.msk.f32.mxu0 %vm877_vm0, %v7024_v9 }
 0xad0   : > { %6606 = vmatprep.subr.bf16.mxu0 %v6605_v13 }
 0xad3   : > { %6608 = vmatpush3.bf16.msra.mxu0 %v6605_v13  ;;  %v6221_v15 = vpop.f32.mrb[18].mxu1 }
 0xad4   : > { %v2583_v17 = vadd.f32 %v6221_v15, %v5672_v14  ;;  %v2577_v18 = vpop.f32.mrb[19].mxu1 }
 0xad5   : > { %v2578_v19 = vadd.f32 %v5672_v14, %v2577_v18 }
 0xad6   : > { %6231 = vmatmul.mubr.msk.f32.vlgmr.msra.gmra.mrb[14].mxu0 %vm877_vm0, %v7036_v12 }
 0xad7   : > { %6248 = vmatprep.mubr.msk.f32.mxu0 %vm1131_vm1, %v2578_v19  ;;  %v3192_v19 = vld [vmem:[%s7766_s14 + $0x8] sm:$0xff] }
 0xadb   : > { %v6243_v47 = vpop.f32.mrb[20].mxu1 }
 0xadc   : > { %v2753_v49 = vpop.f32.mrb[21].mxu1  ;;  %v2759_v50 = vadd.f32 %v6243_v47, %v5688_v48 }
 0xadd   : > { %v2754_v51 = vadd.f32 %v5688_v48, %v2753_v49  ;;  %v5707_v48 = vld [vmem:[%s7767_s15] ss:$0 sm:$0xff] }
 0xadf   : > { %v6623_v52 = vpack.c.bf16 %v2759_v50, %v2754_v51 }
 0xae1   : > { %6625 = vmatprep.subr.msk.bf16.mxu1 %vm7085_vm7, %v6623_v52 }
 0xae2   : > { %6628 = vmatpush3.bf16.msk.msra.mxu1 %vm7085_vm7, %v6623_v52  ;;  %v5716_v52 = vld [vmem:[%s7823_s0 + $0x20] sm:$0xff] }
 0xba9   : > { %v6232_v20 = vpop.f32.mrb[14].mxu0 }
 0xbaa   : > { %v2671_v21 = vadd.f32 %v6232_v20, %v5680_v16  ;;  %v2665_v22 = vpop.f32.mrb[15].mxu0  ;;  %v6842_v20 = vmov 0.0|0.0  }
 0xbab   : > { %v2666_v24 = vadd.f32 %v5680_v16, %v2665_v22  ;;  %v3100_v22 = vld [vmem:[%s7823_s0 + $0x8] sm:$0xff] }
 0xbad   : > { %v6617_v25 = vpack.c.bf16 %v2671_v21, %v2666_v24  ;;  %v3099_v21 = vld [vmem:[%s7823_s0] sm:$0xff] }
 0xbae   : > { %v6629_v24 = vpack.c.bf16 %v3100_v22, %v3099_v21 }
 0xbaf   : > { %6619 = vmatprep.subr.msk.bf16.mxu0 %vm7053_vm2, %v6617_v25 }
 0xbb0   : > { %6622 = vmatpush3.bf16.xpose.msk.msra.mxu0 %vm7053_vm2, %v6617_v25  ;;  %v3193_v25 = vld [vmem:[%s7766_s14 + $0x10] sm:$0xff]  ;;  %6630 = vmatprep.subr.bf16.mxu1 %v6629_v24 }
 0xbb1   : > { %6258 = vmatprep.subr.mxu0 %v5698_v53  ;;  %v6641_v27 = vpack.c.bf16 %v3194_v26, %v3193_v25 }
 0xbb7   : > { %6249 = vmatmul.mubr.msk.f32.vlgmr.msra.gmra.mrb[16].mxu0 %vm1131_vm1, %v2583_v17 }
 0xbb8   : > { %6259 = vmatpush3.msra.mxu0 %v5698_v53  ;;  %v5717_v53 = vld [vmem:[%s7823_s0 + $0x28] sm:$0xff] }
 0xbb9   : > { %6637 = vmatprep.subr.bf16.mxu0 %v6842_v20 }
 0xc8a   : > { %v6250_v31 = vpop.f32.mrb[16].mxu0 }
 0xc8b   : > { %v2850_v32 = vmul.f32 0.35355338, %v6250_v31  ;;  %v2840_v33 = vpop.f32.mrb[17].mxu0  ;;  %v7379_v31 = vld [vmem:[%s857_s8] sm:$0xff] }
 0xc8c   : > { %v2849_v34 = vmul.f32 0.35355338, %v2840_v33 }
 0xc8d   : > { %v2854_v35 = vsel %vm1225_vm4, %v2850_v32, -inf }
 0xc8e   : > { %2855 = vmax.xlane.f32.xlu1 %v2854_v35  ;;  %v2851_v36 = vsel %vm1221_vm3, %v2849_v34, -inf }
 0xc8f   : > { %2852 = vmax.xlane.f32.xlu0 %v2851_v36 }
 0xd1b   : > { %v2856_v37 = vpop.xlane.xlu1 %2855 }
 0xd1c   : > { %v2858_v38 = vsub.f32 %v2850_v32, %v2856_v37  ;;  %v2853_v39 = vpop.xlane.xlu0 %2852 }
 0xd1d   : > { %v2857_v40 = vsub.f32 %v2849_v34, %v2853_v39  ;;  %v5702_v39 = vld [vmem:[%s7825_s26] ss:$0 sm:$0xff] }
 0xd1e   : > { %v2861_v41 = vmul.f32 1.442695, %v2858_v38 }
 0xd1f   : > { %v2859_v42 = vmul.f32 1.442695, %v2857_v40 }
 0xd20   : > { %6781 = vpow2.f32 %v2861_v41 }
 0xd21   : > { %6783 = vpow2.f32 %v2859_v42 }
 0xd2a   : > { %v6782_v43 = vpop.eup %6781 }
 0xd2b   : > { %v6784_v44 = vpop.eup %6783  ;;  %v2866_v45 = vsel %vm1225_vm4, %v6782_v43, 0.0 }
 0xd2c   : > { %2867 = vadd.xlane.f32.xlu1 %v2866_v45  ;;  %v2863_v46 = vsel %vm1221_vm3, %v6784_v44, 0.0 }
 0xd2d   : > { %2864 = vadd.xlane.f32.xlu0 %v2863_v46 }
 0xdb9   : > { %v2868_v55 = vpop.xlane.xlu1 %2867 }
 0xdba   : > { %6785 = vrcp.f32 %v2868_v55  ;;  %v2865_v56 = vpop.xlane.xlu0 %2864  ;;  %v6649_v55 = vpack.c.bf16 %v5717_v53, %v5716_v52  ;;  %v5731_v53 = vld [vmem:[%s7768_s16 + $0x20] sm:$0xff] }
 0xdbb   : > { %6787 = vrcp.f32 %v2865_v56  ;;  %v5704_v56 = vld [vmem:[%s7765_s13] ss:$0 sm:$0xff] }
 0xdc4   : > { %v6786_v57 = vpop.eup %6785 }
 0xdc5   : > { %v6788_v58 = vpop.eup %6787  ;;  %v2872_v60 = vmul.f32 %v6786_v57, %v6782_v43  ;;  %v5703_v43 = vld [vmem:[%s7826_s12] ss:$0 sm:$0xff] }
 0xdc6   : > { %v2871_v59 = vmul.f32 %v6788_v58, %v6784_v44  ;;  %v5718_v58 = vld [vmem:[%s7823_s0 + $0x30] sm:$0xff] }
 0xdc8   : > { %6255 = vmatprep.mubr.msk.f32.mxu1 %vm1221_vm3, %v2871_v59  ;;  %v5719_v59 = vld [vmem:[%s7823_s0 + $0x38] sm:$0xff] }
 0xdc9   : > { %6256 = vmatmul.mubr.msk.f32.vlgmr.msra.gmra.mrb[22].mxu1 %vm1221_vm3, %v2872_v60 }
 0xdca   : > { %6632 = vmatpush3.bf16.msra.mxu1 %v6629_v24 }
 0xdcb   : > { %6634 = vmatprep.subr.bf16.mxu1 %v6633_v23 }
 0xdce   : > { %6636 = vmatpush3.bf16.msra.mxu1 %v6633_v23 }
 0xdcf   : > { %6643 = vmatprep.subr.bf16.mxu1 %v6842_v20 }
 0xe9c   : > { %v6257_v54 = vpop.f32.mrb[22].mxu1 }
 0xe9d   : > { %v2948_v61 = vpop.f32.mrb[23].mxu1 }
 0xe9e   : > { %6260 = vmatprep.mubr.msk.f32.mxu0 %vm1131_vm1, %v2948_v61 }
 0xe9f   : > { %6261 = vmatmul.mubr.msk.f32.vlgmr.msra.gmra.mrb[8].mxu0 %vm1131_vm1, %v6257_v54 }
 0xea0   : > { %6282 = vmatprep.mubr.msk.f32.mxu0 %vm6843_vm9, %v6844_v30 }
 0xf72   : > { %v6262_v63 = vpop.f32.mrb[8].mxu0 }
 0xf73   : > { %v3050_v0 = vadd.f32 %v6262_v63, %v5701_v62  ;;  %v3031_v1 = vpop.f32.mrb[9].mxu0  ;;  %v3275_v63 = vld [vmem:[%s7768_s16] sm:$0xff] }
 0xf74   : > { %v3049_v2 = vadd.f32 %v5701_v62, %v3031_v1  ;;  %v6653_v62 = vpack.c.bf16 %v5719_v59, %v5718_v58  ;;  %v3277_v1 = vld [vmem:[%s7768_s16 + $0x10] sm:$0xff]  ;;  %v5734_v58 = vld [vmem:[%s7768_s16 + $0x38] sm:$0xff] }
 0xf75   : > { %v3052_v3 = vadd.f32 %v3050_v0, %v7036_v12  ;;  %v3276_v0 = vld [vmem:[%s7768_s16 + $0x8] sm:$0xff] }
 0xf76   : > { %v3051_v4 = vadd.f32 %v3049_v2, %v7024_v9  ;;  %v3191_v9 = vld [vmem:[%s7766_s14] sm:$0xff]  ;;  %v6644_v2 = vpack.c.bf16 %v3276_v0, %v3275_v63 }
 0xf77   : > { %v3059_v5 = vsel %vm3058_vm8, %v3052_v3, 0.0  ;;  %v6638_v16 = vpack.c.bf16 %v3192_v19, %v3191_v9 }
 0xf78   : > { %3060 = vadd.xlane.f32.xlu1 %v3059_v5  ;;  %v3055_v6 = vsel %vm877_vm0, %v3051_v4, 0.0 }
 0xf79   : > { %3056 = vadd.xlane.f32.xlu0 %v3055_v6  ;;  %6639 = vmatpush3.bf16.msra.mxu0 %v6638_v16 }
 0xf7a   : > { %6640 = vmatprep.subr.bf16.mxu0 %v6842_v20 }
 0xf7d   : > { %6642 = vmatpush3.bf16.msra.mxu0 %v6641_v27  ;;  %v5709_v27 = vld [vmem:[%s7769_s17] ss:$0 sm:$0xff] }
 0xf80   : > { %6283 = vmatmul.mubr.msk.f32.vlgmr.msra.gmra.mrb[18].mxu0 %vm877_vm0, %v7379_v31 }
0x1005   : > { %v3061_v7 = vpop.xlane.xlu1 %3060 }
0x1006   : > { %v3064_v8 = vmul.f32 0.03125, %v3061_v7  ;;  %v3057_v10 = vpop.xlane.xlu0 %3056 }
0x1007   : > { %v3063_v11 = vmul.f32 0.03125, %v3057_v10 }
0x1008   : > { %v3066_v13 = vsub.f32 %v3052_v3, %v3064_v8  ;;  %v3278_v3 = vld [vmem:[%s7768_s16 + $0x18] sm:$0xff] }
0x1009   : > { %v3065_v14 = vsub.f32 %v3051_v4, %v3063_v11  ;;  %v6647_v4 = vpack.c.bf16 %v3278_v3, %v3277_v1 }
0x100a   : > { %v3068_v15 = vmul.f32 %v3066_v13, %v3066_v13 }
0x100b   : > { %v3067_v17 = vmul.f32 %v3065_v14, %v3065_v14 }
0x100c   : > { %v3072_v18 = vsel %vm3058_vm8, %v3068_v15, 0.0 }
0x100d   : > { %3073 = vadd.xlane.f32.xlu1 %v3072_v18  ;;  %v3069_v12 = vsel %vm877_vm0, %v3067_v17, 0.0 }
0x100e   : > { %3070 = vadd.xlane.f32.xlu0 %v3069_v12 }
0x1053   : > { %v3271_v49 = vpop.f32.mrb[18].mxu0 }
0x1054   : > { %v3272_v50 = vadd.f32 %v5707_v48, %v3271_v49  ;;  %v6284_v51 = vpop.f32.mrb[19].mxu0  ;;  %v5729_v49 = vld [vmem:[%s7767_s15 + $0x1] ss:$0 sm:$0xff] }
0x1056   : > { %6296 = vmatprep.subr.msk.mxu0 %vm1131_vm1, %v3272_v50 }
0x1057   : > { %6297 = vmatpush3.xpose.msk.msra.mxu0 %vm1131_vm1, %v3272_v50 }
0x1058   : > { %6650 = vmatprep.subr.bf16.mxu0 %v6649_v55 }
0x109a   : > { %v3074_v32 = vpop.xlane.xlu1 %3073 }
0x109b   : > { %v3076_v33 = vmul.f32 0.03125, %v3074_v32  ;;  %v3071_v34 = vpop.xlane.xlu0 %3070 }
0x109c   : > { %v3075_v35 = vmul.f32 0.03125, %v3071_v34  ;;  %v5724_v34 = vld [vmem:[%s7766_s14 + $0x20] sm:$0xff] }
0x109d   : > { %v3078_v36 = vadd.f32 1e-05, %v3076_v33 }
0x109e   : > { %v3077_v37 = vadd.f32 1e-05, %v3075_v35  ;;  %v5725_v35 = vld [vmem:[%s7766_s14 + $0x28] sm:$0xff] }
0x109f   : > { %6789 = vrsqrt.f32 %v3078_v36 }
0x10a0   : > { %6791 = vrsqrt.f32 %v3077_v37 }
0x10a9   : > { %v6790_v38 = vpop.eup %6789 }
0x10aa   : > { %v6792_v40 = vpop.eup %6791  ;;  %v3082_v41 = vmul.f32 %v6790_v38, %v3066_v13  ;;  %v5721_v13 = vld [vmem:[%s7765_s13 + $0x1] ss:$0 sm:$0xff] }
0x10ab   : > { %v3081_v42 = vmul.f32 %v6792_v40, %v3065_v14 }
0x10ac   : > { %v3090_v44 = vmul.f32 %v5702_v39, %v3082_v41  ;;  %v5726_v41 = vld [vmem:[%s7766_s14 + $0x30] sm:$0xff] }
0x10ad   : > { %v3089_v45 = vmul.f32 %v5702_v39, %v3081_v42  ;;  %v6658_v39 = vpack.c.bf16 %v5725_v35, %v5724_v34  ;;  %v5727_v42 = vld [vmem:[%s7766_s14 + $0x38] sm:$0xff]  ;;  %v5756_v34 = vld [vmem:[%s7766_s14 + $0x40] sm:$0xff]  ;;  %v5757_v35 = vld [vmem:[%s7766_s14 + $0x48] sm:$0xff] }
0x10ae   : > { %v7392_v47 = vadd.f32 %v5703_v43, %v3090_v44 }
0x10af   : > { %v7390_v46 = vadd.f32 %v5703_v43, %v3089_v45  ;;  %v6661_v43 = vpack.c.bf16 %v5727_v42, %v5726_v41  ;;  %v5758_v41 = vld [vmem:[%s7766_s14 + $0x50] sm:$0xff]  ;;  %v5759_v42 = vld [vmem:[%s7766_s14 + $0x58] sm:$0xff] }
0x10b1   : > { %6271 = vmatprep.mubr.msk.f32.mxu1 %vm877_vm0, %v7390_v46 }
0x10b2   : > { %6272 = vmatmul.mubr.msk.f32.vlgmr.msra.gmra.mrb[24].mxu1 %vm877_vm0, %v7392_v47 }
0x10b3   : > { %6293 = vmatprep.mubr.msk.f32.mxu1 %vm6843_vm9, %v6844_v30  ;;  %6645 = vmatpush3.bf16.msra.mxu1 %v6644_v2 }
0x10b4   : > { %6646 = vmatprep.subr.bf16.mxu1 %v6842_v20 }
0x10b7   : > { %6648 = vmatpush3.bf16.msra.mxu1 %v6647_v4 }
0x10ba   : > { %6294 = vmatmul.mubr.msk.f32.vlgmr.msra.gmra.mrb[26].mxu1 %vm877_vm0, %v7379_v31 }
0x1185   : > { %v6273_v57 = vpop.f32.mrb[24].mxu1 }
0x1186   : > { %v3182_v60 = vpop.f32.mrb[25].mxu1  ;;  %v3188_v61 = vadd.f32 %v6273_v57, %v5704_v56 }
0x1187   : > { %v3183_v54 = vadd.f32 %v5704_v56, %v3182_v60  ;;  %v5733_v56 = vld [vmem:[%s7768_s16 + $0x30] sm:$0xff] }
0x1188   : > { %v6667_v59 = vpack.c.bf16 %v5734_v58, %v5733_v56  ;;  %v5766_v56 = vld [vmem:[%s7768_s16 + $0x58] sm:$0xff] }
0x1189   : > { %6298 = vmatprep.mubr.msk.f32.mxu0 %vm1131_vm1, %v3183_v54 }
0x118a   : > { %6299 = vmatmul.mubr.msk.f32.vlgmr.msra.gmra.mrb[20].mxu0 %vm1131_vm1, %v3188_v61 }
0x118b   : > { %6652 = vmatpush3.bf16.msra.mxu0 %v6649_v55  ;;  %6314 = vmatprep.mubr.msk.f32.mxu0 %vm877_vm0, %v7390_v46  ;;  %v5732_v55 = vld [vmem:[%s7768_s16 + $0x28] sm:$0xff] }
0x118c   : > { %6654 = vmatprep.subr.bf16.mxu0 %v6653_v62  ;;  %v6664_v57 = vpack.c.bf16 %v5732_v55, %v5731_v53  ;;  %v5765_v53 = vld [vmem:[%s7768_s16 + $0x50] sm:$0xff] }
0x118d   : > { %v3352_v28 = vpop.f32.mrb[26].mxu1 }
0x118e   : > { %v3353_v29 = vadd.f32 %v5709_v27, %v3352_v28  ;;  %v6295_v23 = vpop.f32.mrb[27].mxu1 }
0x118f   : > { %6656 = vmatpush3.bf16.msra.mxu0 %v6653_v62  ;;  %v3546_v23 = vld [vmem:[%s7770_s18] sm:$0xff] }
0x1190   : > { %6663 = vmatprep.subr.bf16.mxu0 %v6842_v20  ;;  %6301 = vmatprep.subr.mxu1 %v3353_v29 }
0x1191   : > { %6302 = vmatpush3.msra.mxu1 %v3353_v29 }
0x1192   : > { %6315 = vmatmul.mubr.msk.f32.vlgmr.msra.gmra.mrb[22].mxu0 %vm877_vm0, %v7392_v47  ;;  %6657 = vmatprep.subr.bf16.mxu1 %v6842_v20 }
0x1193   : > { %6336 = vmatprep.mubr.msk.f32.mxu0 %vm6843_vm9, %v6844_v30  ;;  %6665 = vmatpush3.bf16.msra.mxu0 %v6664_v57  ;;  %v6687_v57 = vpack.c.bf16 %v5766_v56, %v5765_v53 }
0x1194   : > { %6666 = vmatprep.subr.bf16.mxu0 %v6842_v20 }
0x1197   : > { %6668 = vmatpush3.bf16.msra.mxu0 %v6667_v59 }
0x119a   : > { %6337 = vmatmul.mubr.msk.f32.vlgmr.msra.gmra.mrb[24].mxu0 %vm877_vm0, %v7379_v31 }
0x125d   : > { %v6300_v5 = vpop.f32.mrb[20].mxu0 }
0x125e   : > { %v3441_v6 = vmul.f32 0.35355338, %v6300_v5  ;;  %v3431_v7 = vpop.f32.mrb[21].mxu0 }
0x125f   : > { %v3440_v8 = vmul.f32 0.35355338, %v3431_v7 }
0x1260   : > { %v3446_v10 = vsel %vm3445_vm10, %v3441_v6, -inf }
0x1261   : > { %3447 = vmax.xlane.f32.xlu1 %v3446_v10  ;;  %v3442_v11 = vsel %vm1131_vm1, %v3440_v8, -inf }
0x1262   : > { %3443 = vmax.xlane.f32.xlu0 %v3442_v11 }
0x1265   : > { %v6316_v14 = vpop.f32.mrb[22].mxu0 }
0x1266   : > { %v3632_v15 = vadd.f32 %v6316_v14, %v5721_v13  ;;  %v3626_v17 = vpop.f32.mrb[23].mxu0 }
0x1267   : > { %v3627_v44 = vadd.f32 %v5721_v13, %v3626_v17  ;;  %v5736_v13 = vld [vmem:[%s7769_s17 + $0x1] ss:$0 sm:$0xff] }
0x126d   : > { %v3797_v14 = vpop.f32.mrb[24].mxu0 }
0x126e   : > { %v6338_v17 = vpop.f32.mrb[25].mxu0 }
0x126f   : > { %v5779_v17 = vld [vmem:[%s7823_s0 + $0x68] sm:$0xff] }
0x12ee   : > { %v3448_v18 = vpop.xlane.xlu1 %3447 }
0x12ef   : > { %v3450_v12 = vsub.f32 %v3441_v6, %v3448_v18  ;;  %v3444_v9 = vpop.xlane.xlu0 %3443  ;;  %v5748_v18 = vld [vmem:[%s7823_s0 + $0x40] sm:$0xff] }
0x12f0   : > { %v3449_v19 = vsub.f32 %v3440_v8, %v3444_v9 }
0x12f1   : > { %v3453_v16 = vmul.f32 1.442695, %v3450_v12  ;;  %v5749_v12 = vld [vmem:[%s7823_s0 + $0x48] sm:$0xff] }
0x12f2   : > { %v3451_v21 = vmul.f32 1.442695, %v3449_v19  ;;  %v6669_v9 = vpack.c.bf16 %v5749_v12, %v5748_v18  ;;  %v5743_v19 = vld [vmem:[%s7770_s18 + $0x8] sm:$0xff]  ;;  %v5775_v12 = vld [vmem:[%s7770_s18 + $0x10] sm:$0xff] }
0x12f3   : > { %6793 = vpow2.f32 %v3453_v16  ;;  %6349 = vmatprep.subr.mxu0 %v5743_v19 }
0x12f4   : > { %6795 = vpow2.f32 %v3451_v21  ;;  %6350 = vmatpush3.msra.mxu0 %v5743_v19 }
0x12f5   : > { %6354 = vmatprep.subr.mxu0 %v3546_v23 }
0x12fd   : > { %v6794_v22 = vpop.eup %6793 }
0x12fe   : > { %v6796_v24 = vpop.eup %6795  ;;  %v3458_v25 = vsel %vm3445_vm10, %v6794_v22, 0.0 }
0x12ff   : > { %3459 = vadd.xlane.f32.xlu1 %v3458_v25  ;;  %v3455_v26 = vsel %vm1131_vm1, %v6796_v24, 0.0  ;;  %v5751_v25 = vld [vmem:[%s7823_s0 + $0x58] sm:$0xff] }
0x1300   : > { %3456 = vadd.xlane.f32.xlu0 %v3455_v26 }
0x138c   : > { %v3460_v32 = vpop.xlane.xlu1 %3459 }
0x138d   : > { %6797 = vrcp.f32 %v3460_v32  ;;  %v3457_v33 = vpop.xlane.xlu0 %3456 }
0x138e   : > { %6799 = vrcp.f32 %v3457_v33 }
0x1397   : > { %v6798_v36 = vpop.eup %6797 }
0x1398   : > { %v6800_v37 = vpop.eup %6799  ;;  %v3464_v40 = vmul.f32 %v6798_v36, %v6794_v22  ;;  %v5753_v36 = vld [vmem:[%s7765_s13 + $0x2] ss:$0 sm:$0xff] }
0x1399   : > { %v3463_v38 = vmul.f32 %v6800_v37, %v6796_v24  ;;  %v5750_v24 = vld [vmem:[%s7823_s0 + $0x50] sm:$0xff] }
0x139a   : > { %v6673_v29 = vpack.c.bf16 %v5751_v25, %v5750_v24 }
0x139b   : > { %6303 = vmatprep.mubr.msk.f32.mxu1 %vm1131_vm1, %v3463_v38  ;;  %v6678_v38 = vpack.c.bf16 %v5757_v35, %v5756_v34  ;;  %v5788_v34 = vld [vmem:[%s7766_s14 + $0x70] sm:$0xff]  ;;  %v5789_v35 = vld [vmem:[%s7766_s14 + $0x78] sm:$0xff] }
0x139c   : > { %6304 = vmatmul.mubr.msk.f32.vlgmr.msra.gmra.mrb[28].mxu1 %vm1131_vm1, %v3464_v40 }
0x139d   : > { %6659 = vmatpush3.bf16.msra.mxu1 %v6658_v39  ;;  %6325 = vmatprep.mubr.msk.f32.mxu1 %vm6843_vm9, %v6844_v30 }
0x139e   : > { %6660 = vmatprep.subr.bf16.mxu1 %v6842_v20 }
0x13a1   : > { %6662 = vmatpush3.bf16.msra.mxu1 %v6661_v43  ;;  %v6681_v43 = vpack.c.bf16 %v5759_v42, %v5758_v41 }
0x13a4   : > { %6326 = vmatmul.mubr.msk.f32.vlgmr.msra.gmra.mrb[30].mxu1 %vm877_vm0, %v7379_v31 }
0x13a5   : > { %6341 = vmatprep.mubr.msk.f32.mxu1 %vm1131_vm1, %v3627_v44 }
0x146f   : > { %v7475_v45 = vpop.f32.mrb[28].mxu1 }
0x1470   : > { %v7477_v48 = vpop.f32.mrb[29].mxu1 }
0x1477   : > { %v3714_v50 = vpop.f32.mrb[30].mxu1 }
0x1478   : > { %v3715_v51 = vadd.f32 %v5729_v49, %v3714_v50  ;;  %v6327_v52 = vpop.f32.mrb[31].mxu1 }
0x1479   : > { %v5764_v52 = vld [vmem:[%s7768_s16 + $0x48] sm:$0xff] }
0x147a   : > { %6339 = vmatprep.subr.msk.mxu1 %vm1131_vm1, %v3715_v51 }
0x147b   : > { %6340 = vmatpush3.xpose.msk.msra.mxu1 %vm1131_vm1, %v3715_v51  ;;  %v5763_v51 = vld [vmem:[%s7768_s16 + $0x40] sm:$0xff] }
0x147c   : > { %v6684_v55 = vpack.c.bf16 %v5764_v52, %v5763_v51  ;;  %v5796_v51 = vld [vmem:[%s7768_s16 + $0x78] sm:$0xff] }
0x147e   : > { %6342 = vmatmul.mubr.msk.f32.vlgmr.msra.gmra.mrb[32].mxu1 %vm1131_vm1, %v3632_v15  ;;  %v3798_v15 = vadd.f32 %v5736_v13, %v3797_v14 }
0x1480   : > { %6344 = vmatprep.subr.mxu1 %v3798_v15 }
0x1481   : > { %6345 = vmatpush3.msra.mxu1 %v3798_v15  ;;  %v5778_v15 = vld [vmem:[%s7823_s0 + $0x60] sm:$0xff] }
0x1482   : > { %6670 = vmatprep.subr.bf16.mxu1 %v6669_v9  ;;  %v6689_v18 = vpack.c.bf16 %v5779_v17, %v5778_v15 }
0x1551   : > { %v6343_v60 = vpop.f32.mrb[32].mxu1 }
0x1552   : > { %v3886_v54 = vmul.f32 0.35355338, %v6343_v60  ;;  %v3876_v61 = vpop.f32.mrb[33].mxu1 }
0x1553   : > { %v3885_v62 = vmul.f32 0.35355338, %v3876_v61 }
0x1554   : > { %v3890_v63 = vsel %vm3445_vm10, %v3886_v54, -inf }
0x1555   : > { %3891 = vmax.xlane.f32.xlu1 %v3890_v63  ;;  %v3887_v0 = vsel %vm1131_vm1, %v3885_v62, -inf }
0x1556   : > { %3888 = vmax.xlane.f32.xlu0 %v3887_v0 }
0x15e2   : > { %v3892_v1 = vpop.xlane.xlu1 %3891 }
0x15e3   : > { %v3894_v2 = vsub.f32 %v3886_v54, %v3892_v1  ;;  %v3889_v3 = vpop.xlane.xlu0 %3888 }
0x15e4   : > { %v3893_v4 = vsub.f32 %v3885_v62, %v3889_v3 }
0x15e5   : > { %v3897_v5 = vmul.f32 1.442695, %v3894_v2 }
0x15e6   : > { %v3895_v6 = vmul.f32 1.442695, %v3893_v4 }
0x15e7   : > { %6801 = vpow2.f32 %v3897_v5 }
0x15e8   : > { %6803 = vpow2.f32 %v3895_v6 }
0x15f1   : > { %v6802_v7 = vpop.eup %6801 }
0x15f2   : > { %v6804_v8 = vpop.eup %6803  ;;  %v3902_v10 = vsel %vm3445_vm10, %v6802_v7, 0.0 }
0x15f3   : > { %3903 = vadd.xlane.f32.xlu1 %v3902_v10  ;;  %v3899_v11 = vsel %vm1131_vm1, %v6804_v8, 0.0  ;;  %v5768_v10 = vld [vmem:[%s7769_s17 + $0x2] ss:$0 sm:$0xff] }
0x15f4   : > { %3900 = vadd.xlane.f32.xlu0 %v3899_v11 }
0x1680   : > { %v3904_v16 = vpop.xlane.xlu1 %3903 }
0x1681   : > { %6805 = vrcp.f32 %v3904_v16  ;;  %v3901_v21 = vpop.xlane.xlu0 %3900 }
0x1682   : > { %6807 = vrcp.f32 %v3901_v21  ;;  %v5780_v21 = vld [vmem:[%s7823_s0 + $0x70] sm:$0xff] }
0x168b   : > { %v6806_v22 = vpop.eup %6805 }
0x168c   : > { %v6808_v26 = vpop.eup %6807  ;;  %v3908_v28 = vmul.f32 %v6806_v22, %v6802_v7  ;;  %v5781_v22 = vld [vmem:[%s7823_s0 + $0x78] sm:$0xff]  ;;  %s862_s0 = scalar_lea.vmem %s7830_s10, %s7829_s1 }
0x168d   : > { %v3907_v27 = vmul.f32 %v6808_v26, %v6804_v8 }
0x168f   : > { %6346 = vmatprep.mubr.msk.f32.mxu1 %vm1131_vm1, %v3907_v27  ;;  %v6693_v27 = vpack.c.bf16 %v5781_v22, %v5780_v21 }
0x1690   : > { %6347 = vmatmul.mubr.msk.f32.vlgmr.msra.gmra.mrb[34].mxu1 %vm1131_vm1, %v3908_v28  ;;  %v5786_v28 = vld [vmem:[%s7766_s14 + $0x60] sm:$0xff] }
0x1691   : > { %6672 = vmatpush3.bf16.msra.mxu1 %v6669_v9  ;;  %6367 = vmatprep.mubr.msk.f32.mxu1 %vm877_vm0, %v7390_v46 }
0x1692   : > { %6674 = vmatprep.subr.bf16.mxu1 %v6673_v29 }
0x1695   : > { %6676 = vmatpush3.bf16.msra.mxu1 %v6673_v29  ;;  %v5787_v29 = vld [vmem:[%s7766_s14 + $0x68] sm:$0xff] }
0x1696   : > { %6683 = vmatprep.subr.bf16.mxu1 %v6842_v20 }
0x1698   : > { %6368 = vmatmul.mubr.msk.f32.vlgmr.msra.gmra.mrb[36].mxu1 %vm877_vm0, %v7392_v47 }
0x1699   : > { %6389 = vmatprep.mubr.msk.f32.mxu1 %vm6843_vm9, %v6844_v30  ;;  %6685 = vmatpush3.bf16.msra.mxu1 %v6684_v55 }
0x169a   : > { %6686 = vmatprep.subr.bf16.mxu1 %v6842_v20 }
0x169d   : > { %6688 = vmatpush3.bf16.msra.mxu1 %v6687_v57 }
0x16a0   : > { %6390 = vmatmul.mubr.msk.f32.vlgmr.msra.gmra.mrb[38].mxu1 %vm877_vm0, %v7379_v31 }
0x1763   : > { %v6348_v32 = vpop.f32.mrb[34].mxu1 }
0x1764   : > { %v3981_v33 = vpop.f32.mrb[35].mxu1 }
0x1765   : > { %6351 = vmatprep.mubr.msk.f32.mxu0 %vm1131_vm1, %v3981_v33 }
0x1766   : > { %6352 = vmatmul.mubr.msk.f32.vlgmr.msra.gmra.mrb[26].mxu0 %vm1131_vm1, %v6348_v32  ;;  %v6698_v32 = vpack.c.bf16 %v5787_v29, %v5786_v28 }
0x1767   : > { %6355 = vmatpush3.msra.mxu0 %v3546_v23  ;;  %6356 = vmatprep.mubr.msk.f32.mxu0 %vm1131_vm1, %v7477_v48  ;;  %v5761_v48 = vld [vmem:[%s7767_s15 + $0x2] ss:$0 sm:$0xff] }
0x1768   : > { %6677 = vmatprep.subr.bf16.mxu0 %v6842_v20 }
0x176b   : > { %v6369_v37 = vpop.f32.mrb[36].mxu1 }
0x176c   : > { %v4239_v39 = vadd.f32 %v6369_v37, %v5753_v36  ;;  %v4233_v40 = vpop.f32.mrb[37].mxu1  ;;  %v5783_v37 = vld [vmem:[%s7765_s13 + $0x3] ss:$0 sm:$0xff] }
0x176d   : > { %v4234_v44 = vadd.f32 %v5753_v36, %v4233_v40  ;;  %v6701_v36 = vpack.c.bf16 %v5789_v35, %v5788_v34 }
0x176e   : > { %6357 = vmatmul.mubr.msk.f32.vlgmr.msra.gmra.mrb[26].mxu0 %vm1131_vm1, %v7475_v45 }
0x176f   : > { %6679 = vmatpush3.bf16.msra.mxu0 %v6678_v38  ;;  %6378 = vmatprep.mubr.msk.f32.mxu0 %vm6843_vm9, %v6844_v30 }
0x1770   : > { %6680 = vmatprep.subr.bf16.mxu0 %v6842_v20 }
0x1773   : > { %6682 = vmatpush3.bf16.msra.mxu0 %v6681_v43  ;;  %v4404_v11 = vpop.f32.mrb[38].mxu1 }
0x1774   : > { %v4405_v13 = vadd.f32 %v5768_v10, %v4404_v11  ;;  %v6391_v14 = vpop.f32.mrb[39].mxu1 }
0x1776   : > { %6379 = vmatmul.mubr.msk.f32.vlgmr.msra.gmra.mrb[28].mxu0 %vm877_vm0, %v7379_v31  ;;  %6397 = vmatprep.subr.mxu1 %v4405_v13 }
0x1777   : > { %6394 = vmatprep.mubr.msk.f32.mxu0 %vm1131_vm1, %v4234_v44  ;;  %6398 = vmatpush3.msra.mxu1 %v4405_v13 }
0x1778   : > { %6690 = vmatprep.subr.bf16.mxu1 %v6689_v18 }
0x1849   : > { %v4321_v49 = vpop.f32.mrb[28].mxu0 }
0x184a   : > { %v4322_v45 = vadd.f32 %v5761_v48, %v4321_v49  ;;  %v6380_v50 = vpop.f32.mrb[29].mxu0  ;;  %v5793_v48 = vld [vmem:[%s7768_s16 + $0x60] sm:$0xff]  ;;  %v5794_v49 = vld [vmem:[%s7768_s16 + $0x68] sm:$0xff] }
0x184b   : > { %v6704_v50 = vpack.c.bf16 %v5794_v49, %v5793_v48  ;;  %v5362_v48 = vld [vmem:[%s7776_s24 + $0x18] sm:$0xff] }
0x184c   : > { %6392 = vmatprep.subr.msk.mxu0 %vm1131_vm1, %v4322_v45 }
0x184d   : > { %6393 = vmatpush3.xpose.msk.msra.mxu0 %vm1131_vm1, %v4322_v45  ;;  %v5795_v45 = vld [vmem:[%s7768_s16 + $0x70] sm:$0xff] }
0x184e   : > { %6402 = vmatprep.subr.mxu0 %v5775_v12  ;;  %v6707_v52 = vpack.c.bf16 %v5796_v51, %v5795_v45  ;;  %v5363_v45 = vld [vmem:[%s7776_s24 + $0x20] sm:$0xff] }
0x1850   : > { %6395 = vmatmul.mubr.msk.f32.vlgmr.msra.gmra.mrb[30].mxu0 %vm1131_vm1, %v4239_v39 }
0x1851   : > { %6403 = vmatpush3.msra.mxu0 %v5775_v12  ;;  %v5808_v12 = vld [vmem:[%s7771_s19] ss:$0 sm:$0xff] }
0x1852   : > { %6697 = vmatprep.subr.bf16.mxu0 %v6842_v20 }
0x1923   : > { %v6396_v58 = vpop.f32.mrb[30].mxu0 }
0x1924   : > { %v4493_v59 = vmul.f32 0.35355338, %v6396_v58  ;;  %v4483_v60 = vpop.f32.mrb[31].mxu0 }
0x1925   : > { %v4492_v54 = vmul.f32 0.35355338, %v4483_v60 }
0x1926   : > { %v4497_v61 = vsel %vm3445_vm10, %v4493_v59, -inf }
0x1927   : > { %4498 = vmax.xlane.f32.xlu1 %v4497_v61  ;;  %v4494_v62 = vsel %vm1131_vm1, %v4492_v54, -inf }
0x1928   : > { %4495 = vmax.xlane.f32.xlu0 %v4494_v62 }
0x19b4   : > { %v4499_v63 = vpop.xlane.xlu1 %4498 }
0x19b5   : > { %v4501_v0 = vsub.f32 %v4493_v59, %v4499_v63  ;;  %v4496_v1 = vpop.xlane.xlu0 %4495 }
0x19b6   : > { %v4500_v2 = vsub.f32 %v4492_v54, %v4496_v1 }
0x19b7   : > { %v4504_v3 = vmul.f32 1.442695, %v4501_v0 }
0x19b8   : > { %v4502_v4 = vmul.f32 1.442695, %v4500_v2 }
0x19b9   : > { %6809 = vpow2.f32 %v4504_v3  ;;  %v5798_v3 = vld [vmem:[%s7769_s17 + $0x3] ss:$0 sm:$0xff] }
0x19ba   : > { %6811 = vpow2.f32 %v4502_v4 }
0x19c3   : > { %v6810_v5 = vpop.eup %6809 }
0x19c4   : > { %v6812_v6 = vpop.eup %6811  ;;  %v4509_v7 = vsel %vm3445_vm10, %v6810_v5, 0.0 }
0x19c5   : > { %4510 = vadd.xlane.f32.xlu1 %v4509_v7  ;;  %v4506_v8 = vsel %vm1131_vm1, %v6812_v6, 0.0  ;;  %v5805_v7 = vld [vmem:[%s7770_s18 + $0x18] sm:$0xff] }
0x19c6   : > { %4507 = vadd.xlane.f32.xlu0 %v4506_v8 }
0x1a52   : > { %v4511_v9 = vpop.xlane.xlu1 %4510 }
0x1a53   : > { %6813 = vrcp.f32 %v4511_v9  ;;  %v4508_v19 = vpop.xlane.xlu0 %4507 }
0x1a54   : > { %6815 = vrcp.f32 %v4508_v19 }
0x1a5d   : > { %v6814_v16 = vpop.eup %6813 }
0x1a5e   : > { %v6816_v24 = vpop.eup %6815  ;;  %v4515_v26 = vmul.f32 %v6814_v16, %v6810_v5 }
0x1a5f   : > { %v4514_v25 = vmul.f32 %v6816_v24, %v6812_v6 }
0x1a61   : > { %6399 = vmatprep.mubr.msk.f32.mxu1 %vm1131_vm1, %v4514_v25 }
0x1a62   : > { %6400 = vmatmul.mubr.msk.f32.vlgmr.msra.gmra.mrb[40].mxu1 %vm1131_vm1, %v4515_v26 }
0x1a63   : > { %6692 = vmatpush3.bf16.msra.mxu1 %v6689_v18  ;;  %6415 = vmatprep.mubr.msk.f32.mxu1 %vm877_vm0, %v7390_v46 }
0x1a64   : > { %6694 = vmatprep.subr.bf16.mxu1 %v6693_v27 }
0x1a67   : > { %6696 = vmatpush3.bf16.msra.mxu1 %v6693_v27 }
0x1a68   : > { %6703 = vmatprep.subr.bf16.mxu1 %v6842_v20 }
0x1a6a   : > { %6416 = vmatmul.mubr.msk.f32.vlgmr.msra.gmra.mrb[42].mxu1 %vm877_vm0, %v7392_v47 }
0x1a6b   : > { %6437 = vmatprep.mubr.msk.f32.mxu1 %vm6843_vm9, %v6844_v30  ;;  %6705 = vmatpush3.bf16.msra.mxu1 %v6704_v50  ;;  %v5364_v50 = vld [vmem:[%s7776_s24 + $0x28] sm:$0xff] }
0x1a6c   : > { %6706 = vmatprep.subr.bf16.mxu1 %v6842_v20  ;;  %v6725_v51 = vpack.c.bf16 %v5364_v50, %v5363_v45 }
0x1a6f   : > { %6708 = vmatpush3.bf16.msra.mxu1 %v6707_v52 }
0x1a72   : > { %6438 = vmatmul.mubr.msk.f32.vlgmr.msra.gmra.mrb[44].mxu1 %vm877_vm0, %v7379_v31 }
0x1b35   : > { %v6401_v23 = vpop.f32.mrb[40].mxu1 }
0x1b36   : > { %v4588_v33 = vpop.f32.mrb[41].mxu1 }
0x1b37   : > { %6404 = vmatprep.mubr.msk.f32.mxu0 %vm1131_vm1, %v4588_v33 }
0x1b38   : > { %6405 = vmatmul.mubr.msk.f32.vlgmr.msra.gmra.mrb[26].mxu0 %vm1131_vm1, %v6401_v23 }
0x1b39   : > { %6699 = vmatpush3.bf16.msra.mxu0 %v6698_v32  ;;  %6426 = vmatprep.mubr.msk.f32.mxu0 %vm6843_vm9, %v6844_v30  ;;  %v5791_v30 = vld [vmem:[%s7767_s15 + $0x3] ss:$0 sm:$0xff] }
0x1b3a   : > { %6700 = vmatprep.subr.bf16.mxu0 %v6842_v20 }
0x1b3d   : > { %v6417_v38 = vpop.f32.mrb[42].mxu1  ;;  %6702 = vmatpush3.bf16.msra.mxu0 %v6701_v36 }
0x1b3e   : > { %v4767_v39 = vadd.f32 %v6417_v38, %v5783_v37  ;;  %v4761_v40 = vpop.f32.mrb[43].mxu1 }
0x1b3f   : > { %v4762_v41 = vadd.f32 %v5783_v37, %v4761_v40  ;;  %v5266_v37 = vld [vmem:[%s7774_s22 + $0x8] sm:$0xff]  ;;  %v5268_v40 = vld [vmem:[%s7774_s22 + $0x18] sm:$0xff] }
0x1b40   : > { %6427 = vmatmul.mubr.msk.f32.vlgmr.msra.gmra.mrb[32].mxu0 %vm877_vm0, %v7379_v31 }
0x1b41   : > { %6442 = vmatprep.mubr.msk.f32.mxu0 %vm1131_vm1, %v4762_v41 }
0x1b45   : > { %v4932_v4 = vpop.f32.mrb[44].mxu1 }
0x1b46   : > { %v4933_v5 = vadd.f32 %v5798_v3, %v4932_v4  ;;  %v6439_v6 = vpop.f32.mrb[45].mxu1  ;;  %v5366_v3 = vld [vmem:[%s7776_s24 + $0x38] sm:$0xff] }
0x1c13   : > { %v4849_v42 = vpop.f32.mrb[32].mxu0 }
0x1c14   : > { %v4850_v43 = vadd.f32 %v5791_v30, %v4849_v42  ;;  %v6428_v44 = vpop.f32.mrb[33].mxu0  ;;  %v5359_v30 = vld [vmem:[%s7776_s24] sm:$0xff]  ;;  %v5360_v42 = vld [vmem:[%s7776_s24 + $0x8] sm:$0xff] }
0x1c15   : > { %v6717_v44 = vpack.c.bf16 %v5360_v42, %v5359_v30  ;;  %v5818_v30 = vld [vmem:[%s7828_s28] ss:$0 sm:$0xff] }
0x1c16   : > { %6440 = vmatprep.subr.msk.mxu0 %vm1131_vm1, %v4850_v43 }
0x1c17   : > { %6441 = vmatpush3.xpose.msk.msra.mxu0 %vm1131_vm1, %v4850_v43  ;;  %v5361_v43 = vld [vmem:[%s7776_s24 + $0x10] sm:$0xff] }
0x1c18   : > { %6445 = vmatprep.subr.mxu0 %v4933_v5  ;;  %v6721_v49 = vpack.c.bf16 %v5362_v48, %v5361_v43 }
0x1c1a   : > { %6443 = vmatmul.mubr.msk.f32.vlgmr.msra.gmra.mrb[34].mxu0 %vm1131_vm1, %v4767_v39  ;;  %v5267_v39 = vld [vmem:[%s7774_s22 + $0x10] sm:$0xff] }
0x1c1b   : > { %6446 = vmatpush3.msra.mxu0 %v4933_v5  ;;  %v6713_v41 = vpack.c.bf16 %v5268_v40, %v5267_v39  ;;  %v5811_v5 = vld [vmem:[%s7775_s23] ss:$0 sm:$0xff] }
0x1c1c   : > { %6450 = vmatprep.subr.mxu0 %v5805_v7  ;;  %v5817_v39 = vld [vmem:[%s7827_s29] ss:$0 sm:$0xff] }
0x1ced   : > { %v6444_v53 = vpop.f32.mrb[34].mxu0 }
0x1cee   : > { %v5021_v55 = vmul.f32 0.35355338, %v6444_v53  ;;  %v5011_v56 = vpop.f32.mrb[35].mxu0 }
0x1cef   : > { %v5020_v57 = vmul.f32 0.35355338, %v5011_v56 }
0x1cf0   : > { %v5025_v58 = vsel %vm3445_vm10, %v5021_v55, -inf }
0x1cf1   : > { %5026 = vmax.xlane.f32.xlu1 %v5025_v58  ;;  %v5022_v59 = vsel %vm1131_vm1, %v5020_v57, -inf }
0x1cf2   : > { %5023 = vmax.xlane.f32.xlu0 %v5022_v59 }
0x1d7e   : > { %v5027_v60 = vpop.xlane.xlu1 %5026 }
0x1d7f   : > { %v5029_v54 = vsub.f32 %v5021_v55, %v5027_v60  ;;  %v5024_v61 = vpop.xlane.xlu0 %5023  ;;  %v5809_v60 = vld [vmem:[%s7772_s20] ss:$0 sm:$0xff] }
0x1d80   : > { %v5028_v62 = vsub.f32 %v5020_v57, %v5024_v61 }
0x1d81   : > { %v5032_v63 = vmul.f32 1.442695, %v5029_v54 }
0x1d82   : > { %v5030_v20 = vmul.f32 1.442695, %v5028_v62 }
0x1d83   : > { %6817 = vpow2.f32 %v5032_v63  ;;  %v5810_v63 = vld [vmem:[%s7773_s21] ss:$0 sm:$0xff] }
0x1d84   : > { %6819 = vpow2.f32 %v5030_v20 }
0x1d8d   : > { %v6818_v0 = vpop.eup %6817 }
0x1d8e   : > { %v6820_v31 = vpop.eup %6819  ;;  %v5037_v1 = vsel %vm3445_vm10, %v6818_v0, 0.0 }
0x1d8f   : > { %5038 = vadd.xlane.f32.xlu1 %v5037_v1  ;;  %v5034_v2 = vsel %vm1131_vm1, %v6820_v31, 0.0 }
0x1d90   : > { %5035 = vadd.xlane.f32.xlu0 %v5034_v2  ;;  %v5365_v2 = vld [vmem:[%s7776_s24 + $0x30] sm:$0xff] }
0x1d91   : > { %v6729_v4 = vpack.c.bf16 %v5366_v3, %v5365_v2 }
0x1e1c   : > { %v5039_v8 = vpop.xlane.xlu1 %5038 }
0x1e1d   : > { %6821 = vrcp.f32 %v5039_v8  ;;  %v5036_v10 = vpop.xlane.xlu0 %5035 }
0x1e1e   : > { %6823 = vrcp.f32 %v5036_v10 }
0x1e27   : > { %v6822_v11 = vpop.eup %6821 }
0x1e28   : > { %v6824_v13 = vpop.eup %6823  ;;  %v5043_v15 = vmul.f32 %v6822_v11, %v6818_v0 }
0x1e29   : > { %v5042_v14 = vmul.f32 %v6824_v13, %v6820_v31 }
0x1e2b   : > { %6447 = vmatprep.mubr.msk.f32.mxu0 %vm1131_vm1, %v5042_v14  ;;  %v5814_v14 = vld [vmem:[%s7777_s25] ss:$0 sm:$0xff] }
0x1e2c   : > { %6448 = vmatmul.mubr.msk.f32.vlgmr.msra.gmra.mrb[36].mxu0 %vm1131_vm1, %v5043_v15 }
0x1e2d   : > { %6451 = vmatpush3.msra.mxu0 %v5805_v7 }
0x1e2e   : > { %6718 = vmatprep.subr.bf16.mxu0 %v6717_v44 }
0x1eff   : > { %v6449_v17 = vpop.f32.mrb[36].mxu0 }
0x1f00   : > { %v5116_v18 = vpop.f32.mrb[37].mxu0 }
0x1f01   : > { %6452 = vmatprep.mubr.msk.f32.mxu0 %vm1131_vm1, %v5116_v18 }
0x1f02   : > { %6453 = vmatmul.mubr.msk.f32.vlgmr.msra.gmra.mrb[26].mxu0 %vm1131_vm1, %v6449_v17 }
0x1f03   : > { %6720 = vmatpush3.bf16.msra.mxu0 %v6717_v44 }
0x1f04   : > { %6722 = vmatprep.subr.bf16.mxu0 %v6721_v49 }
0x1f07   : > { %6724 = vmatpush3.bf16.msra.mxu0 %v6721_v49 }
0x1f08   : > { %6726 = vmatprep.subr.bf16.mxu0 %v6725_v51 }
0x1f0b   : > { %6728 = vmatpush3.bf16.msra.mxu0 %v6725_v51 }
0x1f0c   : > { %6730 = vmatprep.subr.bf16.mxu0 %v6729_v4 }
0x1f0f   : > { %6732 = vmatpush3.bf16.msra.mxu0 %v6729_v4 }
0x1fd5   : > { %v6454_v9 = vpop.f32.mrb[26].mxu0 }
0x1fd6   : > { %v5218_v19 = vadd.f32 %v6454_v9, %v5808_v12  ;;  %v5199_v16 = vpop.f32.mrb[27].mxu0 }
0x1fd7   : > { %v5217_v21 = vadd.f32 %v5808_v12, %v5199_v16 }
0x1fd8   : > { %v5220_v22 = vadd.f32 %v5218_v19, %v7392_v47 }
0x1fd9   : > { %v5219_v24 = vadd.f32 %v5217_v21, %v7390_v46  ;;  %v5265_v46 = vld [vmem:[%s7774_s22] sm:$0xff] }
0x1fda   : > { %v5226_v25 = vsel %vm3058_vm8, %v5220_v22, 0.0  ;;  %v6709_v38 = vpack.c.bf16 %v5266_v37, %v5265_v46 }
0x1fdb   : > { %5227 = vadd.xlane.f32.xlu1 %v5226_v25  ;;  %v5223_v26 = vsel %vm877_vm0, %v5219_v24, 0.0 }
0x1fdc   : > { %5224 = vadd.xlane.f32.xlu0 %v5223_v26  ;;  %6710 = vmatprep.subr.bf16.mxu1 %v6709_v38 }
0x1fdd   : > { %6712 = vmatpush3.bf16.msra.mxu1 %v6709_v38 }
0x1fde   : > { %6714 = vmatprep.subr.bf16.mxu1 %v6713_v41 }
0x1fe1   : > { %6716 = vmatpush3.bf16.msra.mxu1 %v6713_v41 }
0x2068   : > { %v5228_v27 = vpop.xlane.xlu1 %5227 }
0x2069   : > { %v5230_v28 = vmul.f32 0.03125, %v5228_v27  ;;  %v5225_v29 = vpop.xlane.xlu0 %5224 }
0x206a   : > { %v5229_v23 = vmul.f32 0.03125, %v5225_v29 }
0x206b   : > { %v5232_v32 = vsub.f32 %v5220_v22, %v5230_v28 }
0x206c   : > { %v5231_v33 = vsub.f32 %v5219_v24, %v5229_v23 }
0x206d   : > { %v5234_v34 = vmul.f32 %v5232_v32, %v5232_v32 }
0x206e   : > { %v5233_v35 = vmul.f32 %v5231_v33, %v5231_v33 }
0x206f   : > { %v5238_v36 = vsel %vm3058_vm8, %v5234_v34, 0.0 }
0x2070   : > { %5239 = vadd.xlane.f32.xlu1 %v5238_v36  ;;  %v5235_v47 = vsel %vm877_vm0, %v5233_v35, 0.0 }
0x2071   : > { %5236 = vadd.xlane.f32.xlu0 %v5235_v47 }
0x20fd   : > { %v5240_v52 = vpop.xlane.xlu1 %5239 }
0x20fe   : > { %v5242_v53 = vmul.f32 0.03125, %v5240_v52  ;;  %v5237_v55 = vpop.xlane.xlu0 %5236 }
0x20ff   : > { %v5241_v56 = vmul.f32 0.03125, %v5237_v55 }
0x2100   : > { %v5244_v57 = vadd.f32 1e-05, %v5242_v53 }
0x2101   : > { %v5243_v58 = vadd.f32 1e-05, %v5241_v56 }
0x2102   : > { %6825 = vrsqrt.f32 %v5244_v57 }
0x2103   : > { %6827 = vrsqrt.f32 %v5243_v58 }
0x210c   : > { %v6826_v59 = vpop.eup %6825 }
0x210d   : > { %v6828_v54 = vpop.eup %6827  ;;  %v5248_v61 = vmul.f32 %v6826_v59, %v5232_v32 }
0x210e   : > { %v5247_v62 = vmul.f32 %v6828_v54, %v5231_v33 }
0x210f   : > { %v5256_v20 = vmul.f32 %v5809_v60, %v5248_v61 }
0x2110   : > { %v5255_v0 = vmul.f32 %v5809_v60, %v5247_v62 }
0x2111   : > { %v5264_v1 = vadd.f32 %v5810_v63, %v5256_v20 }
0x2112   : > { %v5263_v31 = vadd.f32 %v5810_v63, %v5255_v0 }
0x2114   : > { %6463 = vmatprep.mubr.msk.f32.mxu1 %vm877_vm0, %v5263_v31 }
0x2115   : > { %6464 = vmatmul.mubr.msk.f32.vlgmr.msra.gmra.mrb[46].mxu1 %vm877_vm0, %v5264_v1 }
0x21e8   : > { %v6465_v6 = vpop.f32.mrb[46].mxu1 }
0x21e9   : > { %v5354_v7 = vadd.f32 %v6465_v6, %v5811_v5  ;;  %v5348_v8 = vpop.f32.mrb[47].mxu1 }
0x21ea   : > { %v5349_v10 = vadd.f32 %v5811_v5, %v5348_v8 }
0x21eb   : > { %v5358_v13 = vmax.f32 %v5354_v7, 0.0 }
0x21ec   : > { %v5357_v11 = vmax.f32 %v5349_v10, 0.0 }
0x21ee   : > { %6482 = vmatprep.mubr.msk.f32.mxu0 %vm5374_vm11, %v5357_v11 }
0x21ef   : > { %6483 = vmatmul.mubr.msk.f32.vlgmr.msra.gmra.mrb[38].mxu0 %vm5374_vm11, %v5358_v13 }
0x22c2   : > { %v6484_v15 = vpop.f32.mrb[38].mxu0 }
0x22c3   : > { %v5453_v17 = vadd.f32 %v6484_v15, %v5814_v14  ;;  %v5447_v18 = vpop.f32.mrb[39].mxu0 }
0x22c4   : > { %v5448_v12 = vadd.f32 %v5814_v14, %v5447_v18 }
0x22c5   : > { %v5457_v9 = vadd.f32 %v5453_v17, %v5264_v1 }
0x22c6   : > { %v5456_v19 = vadd.f32 %v5448_v12, %v5263_v31 }
0x22c7   : > { %v5463_v16 = vsel %vm3058_vm8, %v5457_v9, 0.0 }
0x22c8   : > { %5464 = vadd.xlane.f32.xlu1 %v5463_v16  ;;  %v5460_v21 = vsel %vm877_vm0, %v5456_v19, 0.0 }
0x22c9   : > { %5461 = vadd.xlane.f32.xlu0 %v5460_v21 }
0x2355   : > { %v5465_v22 = vpop.xlane.xlu1 %5464 }
0x2356   : > { %v5467_v24 = vmul.f32 0.03125, %v5465_v22  ;;  %v5462_v25 = vpop.xlane.xlu0 %5461 }
0x2357   : > { %v5466_v26 = vmul.f32 0.03125, %v5462_v25 }
0x2358   : > { %v5469_v27 = vsub.f32 %v5457_v9, %v5467_v24 }
0x2359   : > { %v5468_v28 = vsub.f32 %v5456_v19, %v5466_v26 }
0x235a   : > { %v5471_v29 = vmul.f32 %v5469_v27, %v5469_v27 }
0x235b   : > { %v5470_v23 = vmul.f32 %v5468_v28, %v5468_v28 }
0x235c   : > { %v5475_v32 = vsel %vm3058_vm8, %v5471_v29, 0.0 }
0x235d   : > { %5476 = vadd.xlane.f32.xlu1 %v5475_v32  ;;  %v5472_v33 = vsel %vm877_vm0, %v5470_v23, 0.0 }
0x235e   : > { %5473 = vadd.xlane.f32.xlu0 %v5472_v33 }
0x23ea   : > { %v5477_v34 = vpop.xlane.xlu1 %5476 }
0x23eb   : > { %v5479_v35 = vmul.f32 0.03125, %v5477_v34  ;;  %v5474_v36 = vpop.xlane.xlu0 %5473 }
0x23ec   : > { %v5478_v47 = vmul.f32 0.03125, %v5474_v36 }
0x23ed   : > { %v5481_v46 = vadd.f32 1e-05, %v5479_v35 }
0x23ee   : > { %v5480_v37 = vadd.f32 1e-05, %v5478_v47 }
0x23ef   : > { %6829 = vrsqrt.f32 %v5481_v46 }
0x23f0   : > { %6831 = vrsqrt.f32 %v5480_v37 }
0x23f9   : > { %v6830_v38 = vpop.eup %6829 }
0x23fa   : > { %v6832_v40 = vpop.eup %6831  ;;  %v5485_v41 = vmul.f32 %v6830_v38, %v5469_v27 }
0x23fb   : > { %v5484_v42 = vmul.f32 %v6832_v40, %v5468_v28 }
0x23fc   : > { %v5493_v43 = vmul.f32 %v5817_v39, %v5485_v41 }
0x23fd   : > { %v5492_v44 = vmul.f32 %v5817_v39, %v5484_v42 }
0x23fe   : > { %v5501_v48 = vadd.f32 %v5818_v30, %v5493_v43 }
0x23ff   : > { %v5500_v49 = vadd.f32 %v5818_v30, %v5492_v44 }
0x2400   : > { %5503 = vst.msk [vmem:[%s862_s0 + $0x8] sm:$0x3] %vm3058_vm8, %v5501_v48 }
0x2401   : > { %5502 = vst.msk [vmem:[%s862_s0] sm:$0xff] %vm877_vm0, %v5500_v49 }
0x2402 PF: > { %s7831_s26 = sld [smem:[#allocation2_spill]] }
0x2408   : > { %s38_s8 = sadd.s32 1, %s7831_s26  }
0x2409   : > { %p35_p4 = scmp.ge.s32.totalorder %s38_s8, 4  }
0x240b   :  { %37 = sbr.rel (!%p35_p4) target bundleno = 17 (0x11), region = 207 }

</bundles_post_ra>
